<compile_context>
chip_gen: v7x
topology: tpu7x:2x2x1
jax: 0.10.0
libtpu: 0.0.40
codegen_flags: <defaults>
</compile_context>

<pallas_src>
import functools

import jax
import jax.numpy as jnp
from jax.experimental import pallas as pl
from jax.experimental.pallas import tpu as pltpu

_VMEM = pl.BlockSpec(memory_space=pltpu.MemorySpace.VMEM)


# ------------------------------ fused kernel -------------------------------
def _gru(x, h, w_ih_t, w_hh_t, b_ih, b_hh, hidden_size):
    # input_size == 1, so x @ W_ih^T is a broadcasted multiply [B,1]*[1,3H].
    gi = x * w_ih_t + b_ih                                                # [B,3H]
    gh = jnp.dot(h, w_hh_t, preferred_element_type=jnp.float32) + b_hh    # [B,3H]
    H = hidden_size
    r = jax.nn.sigmoid(gi[:, 0:H] + gh[:, 0:H])
    z = jax.nn.sigmoid(gi[:, H:2 * H] + gh[:, H:2 * H])
    n = jnp.tanh(gi[:, 2 * H:3 * H] + r * gh[:, 2 * H:3 * H])
    return (1.0 - z) * n + z * h


def fused_forward_kernel(*refs, conv_cfg, num_heads, gru_hidden, func_idxes):
    refs = list(refs)
    scores_ref = refs.pop()          # [num_heads*M, M]
    h2_ref = refs.pop()              # [n2, gru_hidden]
    h1_ref = refs.pop()              # [n1, gru_hidden]
    it = iter(refs)

    def nxt():
        return next(it)[...]

    # ---- data inputs ----
    x_var = nxt()                    # [n_var, in_channels]
    adj = nxt()                      # [N, N]  row = target i, col = source j
    msg1 = nxt(); hid1 = nxt()       # [n1,1], [n1,H]
    msg2 = nxt(); hid2 = nxt()       # [n2,1], [n2,H]
    prefix = nxt()                   # [n1+n2, prefix_dim]

    # ---- GRU cells ----
    g1 = [nxt() for _ in range(4)]
    g2 = [nxt() for _ in range(4)]
    h1_new = _gru(msg1, hid1, *g1, hidden_size=gru_hidden)
    h2_new = _gru(msg2, hid2, *g2, hidden_size=gru_hidden)
    h1_ref[...] = h1_new
    h2_ref[...] = h2_new

    # ---- build node feature matrix (all in VMEM) ----
    hidden = jnp.concatenate([h1_new, h2_new], axis=0)
    hidden = jnp.concatenate([prefix, hidden], axis=1)
    x = jnp.concatenate([x_var, hidden], axis=0)          # [N, in_channels]

    # additive softmax mask, computed once and reused by all layers/heads
    neg_mask = jnp.where(adj > 0.0, 0.0, -1e9).astype(jnp.float32)  # [N,N]

    # ---- 4 GAT layers (+ fused post F.leaky_relu(0.01)) ----
    for (fout, heads, concat) in conv_cfg:
        w_t = nxt()                  # [fin, heads*fout]
        blk_src = nxt()              # [heads*fout, heads] block-diag att_src
        blk_dst = nxt()              # [heads*fout, heads] block-diag att_dst
        bias = nxt()                 # [1, out_dim]

        xp = jnp.dot(x, w_t, preferred_element_type=jnp.float32)        # [N, heads*fout]
        a_src = jnp.dot(xp, blk_src, preferred_element_type=jnp.float32)  # [N, heads]
        a_dst = jnp.dot(xp, blk_dst, preferred_element_type=jnp.float32)  # [N, heads]
        a_src_t = a_src.T                                                # [heads, N]

        head_outs = []
        for h in range(heads):
            logits = jax.nn.leaky_relu(
                a_dst[:, h:h + 1] + a_src_t[h:h + 1, :], negative_slope=0.2)  # [N,N]
            masked = logits + neg_mask
            m = jnp.max(masked, axis=1, keepdims=True)
            e = jnp.exp(masked - m)                     # non-edges underflow to exactly 0
            inv = pl.reciprocal(jnp.sum(e, axis=1, keepdims=True), approx=True)
            alpha = e * inv                                             # [N,N]
            head_outs.append(
                jnp.dot(alpha, xp[:, h * fout:(h + 1) * fout],
                        preferred_element_type=jnp.float32))            # [N,fout]

        if concat:
            out = jnp.concatenate(head_outs, axis=1)                    # [N, heads*fout]
        else:
            acc = head_outs[0]
            for ho in head_outs[1:]:
                acc = acc + ho
            out = acc * (1.0 / heads)                                   # mean over heads
        x = jax.nn.leaky_relu(out + bias, negative_slope=0.01)

    # ---- pooling of function nodes (static indices) ----
    pooling = jnp.concatenate([x[i:i + 1, :] for i in func_idxes], axis=0)  # [M, C]
    M = len(func_idxes)
    ones_row = jnp.ones((1, M), dtype=jnp.float32)

    # ---- attention scorers: sc[i,j] = sigmoid(q(pool[i]) + k(pool[j]) + b) ----
    for h in range(num_heads):
        wq_t = nxt(); wk_t = nxt(); ws_q = nxt(); ws_k = nxt(); b_s = nxt()
        qp = jnp.dot(pooling, wq_t, preferred_element_type=jnp.float32)   # [M,C]
        kp = jnp.dot(pooling, wk_t, preferred_element_type=jnp.float32)   # [M,C]
        u = jnp.dot(qp, ws_q, preferred_element_type=jnp.float32)         # [M,1]
        v = jnp.dot(kp, ws_k, preferred_element_type=jnp.float32)         # [M,1]
        # v_row[i,j] = v[j]  (broadcast column -> full matrix, then transpose)
        v_row = jnp.dot(v, ones_row, preferred_element_type=jnp.float32).T
        sc = jax.nn.sigmoid(u + v_row + b_s)                              # [M,M]
        scores_ref[h * M:(h + 1) * M, :] = sc


# ------------------------------- parameters --------------------------------
def _att_block(att):
    """[heads, fout] -> block-diagonal [heads*fout, heads] projection matrix."""
    heads, fout = att.shape
    eye = jnp.eye(heads, dtype=jnp.float32)
    return (att[:, :, None] * eye[:, None, :]).reshape(heads * fout, heads)


def init_params(key, in_channels, out_channels, num_heads, prefix_dim):
    hid = in_channels - prefix_dim
    keys = iter(jax.random.split(key, 64))

    def rnd(shape, scale=0.2):
        return (scale * jax.random.normal(next(keys), shape)).astype(jnp.float32)

    params = {}
    for name in ("gru1", "gru2"):
        params[name] = dict(
            w_ih_t=rnd((1, 3 * hid)),
            w_hh_t=rnd((hid, 3 * hid)),
            b_ih=rnd((1, 3 * hid)),
            b_hh=rnd((1, 3 * hid)),
        )

    conv_cfg = (("conv1", in_channels, 8, 4, True),
                ("conv2", 32, 8, 4, True),
                ("conv3", 32, 8, 4, True),
                ("conv4", 32, out_channels, 4, False))
    for name, fin, fout, heads, concat in conv_cfg:
        att_src = rnd((heads, fout))
        att_dst = rnd((heads, fout))
        params[name] = dict(
            w_t=rnd((fin, heads * fout)),
            blk_src=_att_block(att_src),
            blk_dst=_att_block(att_dst),
            bias=rnd((1, heads * fout if concat else fout)),
        )

    params["attentions"] = []
    for _ in range(num_heads):
        params["attentions"].append(dict(
            wq_t=rnd((out_channels, out_channels)),
            wk_t=rnd((out_channels, out_channels)),
            ws_q=rnd((out_channels, 1)),
            ws_k=rnd((out_channels, 1)),
            b_s=rnd((1, 1)),
        ))
    return params, conv_cfg


# --------------------------------- forward ---------------------------------
def attentive_bp_forward(params, conv_cfg, x, edge_index,
                         ass_to_sum_msg, ass_to_sum_hidden,
                         sum_to_ass_msg, sum_to_ass_hidden,
                         prefix, function_node_idxes, neighbor_idx_info):
    assert ass_to_sum_msg.shape[1] == 1 and sum_to_ass_msg.shape[1] == 1, \
        "GRUCell kernels assume input_size == 1"

    n1, H = ass_to_sum_hidden.shape
    n2 = sum_to_ass_hidden.shape[0]
    n_var = x.shape[0]
    N = n_var + n1 + n2

    # Dense adjacency (target row i aggregates source col j) + self loops,
    # matching GATConv(add_self_loops=True). Data-dependent scatter: plain JAX.
    adj = jnp.zeros((N, N), jnp.float32)
    adj = adj.at[edge_index[1], edge_index[0]].set(1.0)
    adj = adj.at[jnp.arange(N), jnp.arange(N)].set(1.0)

    args = [x, adj, ass_to_sum_msg, ass_to_sum_hidden,
            sum_to_ass_msg, sum_to_ass_hidden, prefix]
    for name in ("gru1", "gru2"):
        p = params[name]
        args += [p["w_ih_t"], p["w_hh_t"], p["b_ih"], p["b_hh"]]
    cfg = []
    for name, _fin, fout, heads, concat in conv_cfg:
        p = params[name]
        args += [p["w_t"], p["blk_src"], p["blk_dst"], p["bias"]]
        cfg.append((fout, heads, concat))
    for p in params["attentions"]:
        args += [p["wq_t"], p["wk_t"], p["ws_q"], p["ws_k"], p["b_s"]]

    num_heads = len(params["attentions"])
    func_idxes = tuple(int(i) for i in function_node_idxes)
    M = len(func_idxes)

    kern = functools.partial(
        fused_forward_kernel,
        conv_cfg=tuple(cfg),
        num_heads=num_heads,
        gru_hidden=H,
        func_idxes=func_idxes,
    )

    out_shape = (
        jax.ShapeDtypeStruct((n1, H), jnp.float32),
        jax.ShapeDtypeStruct((n2, H), jnp.float32),
        jax.ShapeDtypeStruct((num_heads * M, M), jnp.float32),
    )
    hidden1, hidden2, scores = pl.pallas_call(
        kern,
        out_shape=out_shape,
        in_specs=[_VMEM] * len(args),
        out_specs=(_VMEM, _VMEM, _VMEM),
    )(*args)

    # scores[h*M + i, j] = score(query=pooling[i], key=pooling[j]) for head h.
    # Reorder to the torch layout [M*M, num_heads] with flat row = i*M + j
    # (query = repeat_interleave, key = tile).
    scores_mat = scores.reshape(num_heads, M, M)
    attention_scores = jnp.transpose(scores_mat, (1, 2, 0)).reshape(M * M, num_heads)

    # Data-dependent dict-of-dict bookkeeping (host-side control flow, plain JAX).
    # TODO(synk): this irregular per-neighborhood indexing has no clean Pallas equivalent.
    attention_weights = {}
    for x_i, target in neighbor_idx_info.items():
        attention_weights[x_i] = {}
        for idx, src_all in target.items():
            src_list = list(src_all)
            if len(src_list) == 1:
                attention_weights[x_i][idx] = jnp.zeros(
                    (1, attention_scores.shape[1]), jnp.float32)
                continue
            out_i = src_list.index(idx)
            src = [ii for ii in src_list if ii != idx]
            assert len(src) == len(src_list) - 1
            src_idx = jnp.asarray(src, dtype=jnp.int32) + idx * M
            sc = attention_scores[src_idx]                       # [len(src), heads]
            trg_score = attention_scores[idx + idx * M]          # [heads]
            score_sum = jnp.mean(sc, axis=0)
            total_weight = jax.nn.softmax(
                jnp.stack([score_sum, trg_score], axis=0), axis=0)
            weights = jax.nn.softmax(sc, axis=0)
            weights = weights * total_weight[0][None, :]
            weights = weights * (len(target) - 1)
            trg_weights = total_weight[1][None, :]
            weights = jnp.concatenate(
                [weights[:out_i], trg_weights, weights[out_i:]], axis=0)
            attention_weights[x_i][idx] = weights
    return attention_weights, hidden1, hidden2


# ----------------------------------- main -----------------------------------
if __name__ == "__main__":
    in_channels, out_channels, num_heads, prefix_dim = 11, 8, 1, 3
    gru_hidden = in_channels - prefix_dim          # 8

    key = jax.random.PRNGKey(0)
    k_par, k_x, k_m1, k_h1, k_m2, k_h2, k_pref, k_es, k_ed = jax.random.split(key, 9)

    params, conv_cfg = init_params(k_par, in_channels, out_channels,
                                   num_heads, prefix_dim)

    n_var_nodes = 8          # rows of the original x
    n_a2s = 4                # ass->sum message directions
    n_s2a = 4                # sum->ass message directions
    n_total = n_var_nodes + n_a2s + n_s2a          # 16 graph nodes

    x = jax.random.normal(k_x, (n_var_nodes, in_channels), jnp.float32)
    ass_to_sum_msg = jax.random.normal(k_m1, (n_a2s, 1), jnp.float32)
    ass_to_sum_hidden = jax.random.normal(k_h1, (n_a2s, gru_hidden), jnp.float32)
    sum_to_ass_msg = jax.random.normal(k_m2, (n_s2a, 1), jnp.float32)
    sum_to_ass_hidden = jax.random.normal(k_h2, (n_s2a, gru_hidden), jnp.float32)
    prefix = jax.random.normal(k_pref, (n_a2s + n_s2a, prefix_dim), jnp.float32)

    n_edges = 24
    e_src = jax.random.randint(k_es, (n_edges,), 0, n_total)
    e_dst = jax.random.randint(k_ed, (n_edges,), 0, n_total)
    e_dst = jnp.where(e_dst == e_src, (e_dst + 1) % n_total, e_dst)   # no self loops
    edge_index = jnp.stack([e_src, e_dst], axis=0).astype(jnp.int32)

    function_node_idxes = [8, 9, 10, 11]           # 4 function nodes -> M = 4
    neighbor_idx_info = {
        0: {0: [0, 1, 2], 1: [1]},
        1: {2: [2, 0, 3], 3: [3, 1]},
    }

    attention_weights, hidden1, hidden2 = attentive_bp_forward(
        params, conv_cfg, x, edge_index,
        ass_to_sum_msg, ass_to_sum_hidden,
        sum_to_ass_msg, sum_to_ass_hidden,
        prefix, function_node_idxes, neighbor_idx_info)

    jax.tree_util.tree_map(lambda a: a.block_until_ready(),
                           (attention_weights, hidden1, hidden2))
    print("KERNEL_OK")
</pallas_src>

<mosaic_0001>
module attributes {stable_mosaic.version = 11 : i64} {
  func.func @fused_forward_kernel(%arg0: memref<8x11xf32, #tpu.memory_space<vmem>>, %arg1: memref<16x16xf32, #tpu.memory_space<vmem>>, %arg2: memref<4x1xf32, #tpu.memory_space<vmem>>, %arg3: memref<4x8xf32, #tpu.memory_space<vmem>>, %arg4: memref<4x1xf32, #tpu.memory_space<vmem>>, %arg5: memref<4x8xf32, #tpu.memory_space<vmem>>, %arg6: memref<8x3xf32, #tpu.memory_space<vmem>>, %arg7: memref<1x24xf32, #tpu.memory_space<vmem>>, %arg8: memref<8x24xf32, #tpu.memory_space<vmem>>, %arg9: memref<1x24xf32, #tpu.memory_space<vmem>>, %arg10: memref<1x24xf32, #tpu.memory_space<vmem>>, %arg11: memref<1x24xf32, #tpu.memory_space<vmem>>, %arg12: memref<8x24xf32, #tpu.memory_space<vmem>>, %arg13: memref<1x24xf32, #tpu.memory_space<vmem>>, %arg14: memref<1x24xf32, #tpu.memory_space<vmem>>, %arg15: memref<11x32xf32, #tpu.memory_space<vmem>>, %arg16: memref<32x4xf32, #tpu.memory_space<vmem>>, %arg17: memref<32x4xf32, #tpu.memory_space<vmem>>, %arg18: memref<1x32xf32, #tpu.memory_space<vmem>>, %arg19: memref<32x32xf32, #tpu.memory_space<vmem>>, %arg20: memref<32x4xf32, #tpu.memory_space<vmem>>, %arg21: memref<32x4xf32, #tpu.memory_space<vmem>>, %arg22: memref<1x32xf32, #tpu.memory_space<vmem>>, %arg23: memref<32x32xf32, #tpu.memory_space<vmem>>, %arg24: memref<32x4xf32, #tpu.memory_space<vmem>>, %arg25: memref<32x4xf32, #tpu.memory_space<vmem>>, %arg26: memref<1x32xf32, #tpu.memory_space<vmem>>, %arg27: memref<32x32xf32, #tpu.memory_space<vmem>>, %arg28: memref<32x4xf32, #tpu.memory_space<vmem>>, %arg29: memref<32x4xf32, #tpu.memory_space<vmem>>, %arg30: memref<1x8xf32, #tpu.memory_space<vmem>>, %arg31: memref<8x8xf32, #tpu.memory_space<vmem>>, %arg32: memref<8x8xf32, #tpu.memory_space<vmem>>, %arg33: memref<8x1xf32, #tpu.memory_space<vmem>>, %arg34: memref<8x1xf32, #tpu.memory_space<vmem>>, %arg35: memref<1x1xf32, #tpu.memory_space<vmem>>, %arg36: memref<4x8xf32, #tpu.memory_space<vmem>>, %arg37: memref<4x8xf32, #tpu.memory_space<vmem>>, %arg38: memref<4x4xf32, #tpu.memory_space<vmem>>) attributes {dimension_semantics = [], scalar_prefetch = 0 : i64, scratch_operands = 0 : i64, tpu.core_type = #tpu.core_type<tc>} {
    %c0 = arith.constant 0 : index
    %c0_0 = arith.constant 0 : index
    %0 = vector.load %arg0[%c0, %c0_0] : memref<8x11xf32, #tpu.memory_space<vmem>>, vector<8x11xf32>
    %c0_1 = arith.constant 0 : index
    %c0_2 = arith.constant 0 : index
    %1 = vector.load %arg1[%c0_1, %c0_2] : memref<16x16xf32, #tpu.memory_space<vmem>>, vector<16x16xf32>
    %c0_3 = arith.constant 0 : index
    %c0_4 = arith.constant 0 : index
    %2 = vector.load %arg2[%c0_3, %c0_4] : memref<4x1xf32, #tpu.memory_space<vmem>>, vector<4x1xf32>
    %c0_5 = arith.constant 0 : index
    %c0_6 = arith.constant 0 : index
    %3 = vector.load %arg3[%c0_5, %c0_6] : memref<4x8xf32, #tpu.memory_space<vmem>>, vector<4x8xf32>
    %c0_7 = arith.constant 0 : index
    %c0_8 = arith.constant 0 : index
    %4 = vector.load %arg4[%c0_7, %c0_8] : memref<4x1xf32, #tpu.memory_space<vmem>>, vector<4x1xf32>
    %c0_9 = arith.constant 0 : index
    %c0_10 = arith.constant 0 : index
    %5 = vector.load %arg5[%c0_9, %c0_10] : memref<4x8xf32, #tpu.memory_space<vmem>>, vector<4x8xf32>
    %c0_11 = arith.constant 0 : index
    %c0_12 = arith.constant 0 : index
    %6 = vector.load %arg6[%c0_11, %c0_12] : memref<8x3xf32, #tpu.memory_space<vmem>>, vector<8x3xf32>
    %c0_13 = arith.constant 0 : index
    %c0_14 = arith.constant 0 : index
    %7 = vector.load %arg7[%c0_13, %c0_14] : memref<1x24xf32, #tpu.memory_space<vmem>>, vector<1x24xf32>
    %c0_15 = arith.constant 0 : index
    %c0_16 = arith.constant 0 : index
    %8 = vector.load %arg8[%c0_15, %c0_16] : memref<8x24xf32, #tpu.memory_space<vmem>>, vector<8x24xf32>
    %c0_17 = arith.constant 0 : index
    %c0_18 = arith.constant 0 : index
    %9 = vector.load %arg9[%c0_17, %c0_18] : memref<1x24xf32, #tpu.memory_space<vmem>>, vector<1x24xf32>
    %c0_19 = arith.constant 0 : index
    %c0_20 = arith.constant 0 : index
    %10 = vector.load %arg10[%c0_19, %c0_20] : memref<1x24xf32, #tpu.memory_space<vmem>>, vector<1x24xf32>
    %c0_21 = arith.constant 0 : index
    %c0_22 = arith.constant 0 : index
    %11 = vector.load %arg11[%c0_21, %c0_22] : memref<1x24xf32, #tpu.memory_space<vmem>>, vector<1x24xf32>
    %c0_23 = arith.constant 0 : index
    %c0_24 = arith.constant 0 : index
    %12 = vector.load %arg12[%c0_23, %c0_24] : memref<8x24xf32, #tpu.memory_space<vmem>>, vector<8x24xf32>
    %c0_25 = arith.constant 0 : index
    %c0_26 = arith.constant 0 : index
    %13 = vector.load %arg13[%c0_25, %c0_26] : memref<1x24xf32, #tpu.memory_space<vmem>>, vector<1x24xf32>
    %c0_27 = arith.constant 0 : index
    %c0_28 = arith.constant 0 : index
    %14 = vector.load %arg14[%c0_27, %c0_28] : memref<1x24xf32, #tpu.memory_space<vmem>>, vector<1x24xf32>
    %15 = vector.broadcast %2 : vector<4x1xf32> to vector<4x24xf32>
    %16 = vector.broadcast %7 : vector<1x24xf32> to vector<4x24xf32>
    %17 = arith.mulf %15, %16 : vector<4x24xf32>
    %18 = vector.broadcast %9 : vector<1x24xf32> to vector<4x24xf32>
    %19 = arith.addf %17, %18 : vector<4x24xf32>
    %cst = arith.constant dense<0.000000e+00> : vector<4x24xf32>
    %20 = tpu.matmul %3, %8, %cst {dimension_numbers = #tpu.dot_dimension_numbers<[1], [0], [0], [1], [0, 0, 1, 1], [], []>} : vector<4x8xf32>, vector<8x24xf32>, vector<4x24xf32> -> vector<4x24xf32>
    %21 = vector.broadcast %10 : vector<1x24xf32> to vector<4x24xf32>
    %22 = arith.addf %20, %21 : vector<4x24xf32>
    %23 = vector.extract_strided_slice %19 {offsets = [0, 0], sizes = [4, 8], strides = [1, 1]} : vector<4x24xf32> to vector<4x8xf32>
    %24 = vector.extract_strided_slice %22 {offsets = [0, 0], sizes = [4, 8], strides = [1, 1]} : vector<4x24xf32> to vector<4x8xf32>
    %25 = arith.addf %23, %24 : vector<4x8xf32>
    %26 = arith.negf %25 : vector<4x8xf32>
    %27 = math.exp %26 : vector<4x8xf32>
    %cst_29 = arith.constant 1.000000e+00 : f32
    %28 = vector.broadcast %cst_29 : f32 to vector<4x8xf32>
    %29 = arith.addf %28, %27 : vector<4x8xf32>
    %30 = arith.divf %28, %29 : vector<4x8xf32>
    %31 = vector.extract_strided_slice %19 {offsets = [0, 8], sizes = [4, 8], strides = [1, 1]} : vector<4x24xf32> to vector<4x8xf32>
    %32 = vector.extract_strided_slice %22 {offsets = [0, 8], sizes = [4, 8], strides = [1, 1]} : vector<4x24xf32> to vector<4x8xf32>
    %33 = arith.addf %31, %32 : vector<4x8xf32>
    %34 = arith.negf %33 : vector<4x8xf32>
    %35 = math.exp %34 : vector<4x8xf32>
    %cst_30 = arith.constant 1.000000e+00 : f32
    %36 = vector.broadcast %cst_30 : f32 to vector<4x8xf32>
    %37 = arith.addf %36, %35 : vector<4x8xf32>
    %38 = arith.divf %36, %37 : vector<4x8xf32>
    %39 = vector.extract_strided_slice %19 {offsets = [0, 16], sizes = [4, 8], strides = [1, 1]} : vector<4x24xf32> to vector<4x8xf32>
    %40 = vector.extract_strided_slice %22 {offsets = [0, 16], sizes = [4, 8], strides = [1, 1]} : vector<4x24xf32> to vector<4x8xf32>
    %41 = arith.mulf %30, %40 : vector<4x8xf32>
    %42 = arith.addf %39, %41 : vector<4x8xf32>
    %43 = math.tanh %42 : vector<4x8xf32>
    %cst_31 = arith.constant 1.000000e+00 : f32
    %44 = vector.broadcast %cst_31 : f32 to vector<4x8xf32>
    %45 = arith.subf %44, %38 : vector<4x8xf32>
    %46 = arith.mulf %45, %43 : vector<4x8xf32>
    %47 = arith.mulf %38, %3 : vector<4x8xf32>
    %48 = arith.addf %46, %47 : vector<4x8xf32>
    %49 = vector.broadcast %4 : vector<4x1xf32> to vector<4x24xf32>
    %50 = vector.broadcast %11 : vector<1x24xf32> to vector<4x24xf32>
    %51 = arith.mulf %49, %50 : vector<4x24xf32>
    %52 = vector.broadcast %13 : vector<1x24xf32> to vector<4x24xf32>
    %53 = arith.addf %51, %52 : vector<4x24xf32>
    %cst_32 = arith.constant dense<0.000000e+00> : vector<4x24xf32>
    %54 = tpu.matmul %5, %12, %cst_32 {dimension_numbers = #tpu.dot_dimension_numbers<[1], [0], [0], [1], [0, 0, 1, 1], [], []>} : vector<4x8xf32>, vector<8x24xf32>, vector<4x24xf32> -> vector<4x24xf32>
    %55 = vector.broadcast %14 : vector<1x24xf32> to vector<4x24xf32>
    %56 = arith.addf %54, %55 : vector<4x24xf32>
    %57 = vector.extract_strided_slice %53 {offsets = [0, 0], sizes = [4, 8], strides = [1, 1]} : vector<4x24xf32> to vector<4x8xf32>
    %58 = vector.extract_strided_slice %56 {offsets = [0, 0], sizes = [4, 8], strides = [1, 1]} : vector<4x24xf32> to vector<4x8xf32>
    %59 = arith.addf %57, %58 : vector<4x8xf32>
    %60 = arith.negf %59 : vector<4x8xf32>
    %61 = math.exp %60 : vector<4x8xf32>
    %cst_33 = arith.constant 1.000000e+00 : f32
    %62 = vector.broadcast %cst_33 : f32 to vector<4x8xf32>
    %63 = arith.addf %62, %61 : vector<4x8xf32>
    %64 = arith.divf %62, %63 : vector<4x8xf32>
    %65 = vector.extract_strided_slice %53 {offsets = [0, 8], sizes = [4, 8], strides = [1, 1]} : vector<4x24xf32> to vector<4x8xf32>
    %66 = vector.extract_strided_slice %56 {offsets = [0, 8], sizes = [4, 8], strides = [1, 1]} : vector<4x24xf32> to vector<4x8xf32>
    %67 = arith.addf %65, %66 : vector<4x8xf32>
    %68 = arith.negf %67 : vector<4x8xf32>
    %69 = math.exp %68 : vector<4x8xf32>
    %cst_34 = arith.constant 1.000000e+00 : f32
    %70 = vector.broadcast %cst_34 : f32 to vector<4x8xf32>
    %71 = arith.addf %70, %69 : vector<4x8xf32>
    %72 = arith.divf %70, %71 : vector<4x8xf32>
    %73 = vector.extract_strided_slice %53 {offsets = [0, 16], sizes = [4, 8], strides = [1, 1]} : vector<4x24xf32> to vector<4x8xf32>
    %74 = vector.extract_strided_slice %56 {offsets = [0, 16], sizes = [4, 8], strides = [1, 1]} : vector<4x24xf32> to vector<4x8xf32>
    %75 = arith.mulf %64, %74 : vector<4x8xf32>
    %76 = arith.addf %73, %75 : vector<4x8xf32>
    %77 = math.tanh %76 : vector<4x8xf32>
    %cst_35 = arith.constant 1.000000e+00 : f32
    %78 = vector.broadcast %cst_35 : f32 to vector<4x8xf32>
    %79 = arith.subf %78, %72 : vector<4x8xf32>
    %80 = arith.mulf %79, %77 : vector<4x8xf32>
    %81 = arith.mulf %72, %5 : vector<4x8xf32>
    %82 = arith.addf %80, %81 : vector<4x8xf32>
    %c0_36 = arith.constant 0 : index
    %c0_37 = arith.constant 0 : index
    %83 = vector.load %arg36[%c0_36, %c0_37] : memref<4x8xf32, #tpu.memory_space<vmem>>, vector<4x8xf32>
    tpu.vector_store %arg36[%c0_36, %c0_37], %48 {strides = array<i32>} : memref<4x8xf32, #tpu.memory_space<vmem>>, vector<4x8xf32>,
    %c0_38 = arith.constant 0 : index
    %c0_39 = arith.constant 0 : index
    %84 = vector.load %arg37[%c0_38, %c0_39] : memref<4x8xf32, #tpu.memory_space<vmem>>, vector<4x8xf32>
    tpu.vector_store %arg37[%c0_38, %c0_39], %82 {strides = array<i32>} : memref<4x8xf32, #tpu.memory_space<vmem>>, vector<4x8xf32>,
    %85 = tpu.concatenate %48, %82 in 0 : vector<4x8xf32>, vector<4x8xf32> -> vector<8x8xf32>
    %86 = tpu.concatenate %6, %85 in 1 : vector<8x3xf32>, vector<8x8xf32> -> vector<8x11xf32>
    %87 = tpu.concatenate %0, %86 in 0 : vector<8x11xf32>, vector<8x11xf32> -> vector<16x11xf32>
    %cst_40 = arith.constant 0.000000e+00 : f32
    %88 = vector.broadcast %cst_40 : f32 to vector<16x16xf32>
    %89 = arith.cmpf ogt, %1, %88 : vector<16x16xf32>
    %cst_41 = arith.constant 0.000000e+00 : f32
    %cst_42 = arith.constant -1.000000e+09 : f32
    %90 = vector.broadcast %cst_41 : f32 to vector<16x16xf32>
    %91 = vector.broadcast %cst_42 : f32 to vector<16x16xf32>
    %92 = arith.select %89, %90, %91 : vector<16x16xi1>, vector<16x16xf32>
    %c0_43 = arith.constant 0 : index
    %c0_44 = arith.constant 0 : index
    %93 = vector.load %arg15[%c0_43, %c0_44] : memref<11x32xf32, #tpu.memory_space<vmem>>, vector<11x32xf32>
    %c0_45 = arith.constant 0 : index
    %c0_46 = arith.constant 0 : index
    %94 = vector.load %arg16[%c0_45, %c0_46] : memref<32x4xf32, #tpu.memory_space<vmem>>, vector<32x4xf32>
    %c0_47 = arith.constant 0 : index
    %c0_48 = arith.constant 0 : index
    %95 = vector.load %arg17[%c0_47, %c0_48] : memref<32x4xf32, #tpu.memory_space<vmem>>, vector<32x4xf32>
    %c0_49 = arith.constant 0 : index
    %c0_50 = arith.constant 0 : index
    %96 = vector.load %arg18[%c0_49, %c0_50] : memref<1x32xf32, #tpu.memory_space<vmem>>, vector<1x32xf32>
    %cst_51 = arith.constant dense<0.000000e+00> : vector<16x32xf32>
    %97 = tpu.matmul %87, %93, %cst_51 {dimension_numbers = #tpu.dot_dimension_numbers<[1], [0], [0], [1], [0, 0, 1, 1], [], []>} : vector<16x11xf32>, vector<11x32xf32>, vector<16x32xf32> -> vector<16x32xf32>
    %cst_52 = arith.constant dense<0.000000e+00> : vector<16x4xf32>
    %98 = tpu.matmul %97, %94, %cst_52 {dimension_numbers = #tpu.dot_dimension_numbers<[1], [0], [0], [1], [0, 0, 1, 1], [], []>} : vector<16x32xf32>, vector<32x4xf32>, vector<16x4xf32> -> vector<16x4xf32>
    %cst_53 = arith.constant dense<0.000000e+00> : vector<16x4xf32>
    %99 = tpu.matmul %97, %95, %cst_53 {dimension_numbers = #tpu.dot_dimension_numbers<[1], [0], [0], [1], [0, 0, 1, 1], [], []>} : vector<16x32xf32>, vector<32x4xf32>, vector<16x4xf32> -> vector<16x4xf32>
    %100 = tpu.transpose %98, [1, 0] : vector<16x4xf32> -> vector<4x16xf32>
    %101 = vector.extract_strided_slice %99 {offsets = [0, 0], sizes = [16, 1], strides = [1, 1]} : vector<16x4xf32> to vector<16x1xf32>
    %102 = vector.extract_strided_slice %100 {offsets = [0, 0], sizes = [1, 16], strides = [1, 1]} : vector<4x16xf32> to vector<1x16xf32>
    %103 = vector.broadcast %101 : vector<16x1xf32> to vector<16x16xf32>
    %104 = vector.broadcast %102 : vector<1x16xf32> to vector<16x16xf32>
    %105 = arith.addf %103, %104 : vector<16x16xf32>
    %cst_54 = arith.constant 2.000000e-01 : f32
    %cst_55 = arith.constant 0.000000e+00 : f32
    %106 = vector.broadcast %cst_55 : f32 to vector<16x16xf32>
    %107 = arith.cmpf oge, %105, %106 : vector<16x16xf32>
    %108 = vector.broadcast %cst_54 : f32 to vector<16x16xf32>
    %109 = arith.mulf %108, %105 : vector<16x16xf32>
    %110 = arith.select %107, %105, %109 : vector<16x16xi1>, vector<16x16xf32>
    %111 = arith.addf %110, %92 : vector<16x16xf32>
    %cst_56 = arith.constant dense<0xFF800000> : vector<16xf32>
    %112 = vector.multi_reduction <maximumf>, %111, %cst_56 [1] : vector<16x16xf32> to vector<16xf32>
    %113 = vector.shape_cast %112 : vector<16xf32> to vector<16x1xf32>
    %114 = vector.broadcast %113 : vector<16x1xf32> to vector<16x16xf32>
    %115 = arith.subf %111, %114 : vector<16x16xf32>
    %116 = math.exp %115 : vector<16x16xf32>
    %cst_57 = arith.constant dense<0.000000e+00> : vector<16xf32>
    %117 = vector.multi_reduction <add>, %116, %cst_57 [1] : vector<16x16xf32> to vector<16xf32>
    %118 = vector.shape_cast %117 : vector<16xf32> to vector<16x1xf32>
    %119 = tpu.reciprocal %118 {approx = true} : vector<16x1xf32> -> vector<16x1xf32>
    %120 = vector.broadcast %119 : vector<16x1xf32> to vector<16x16xf32>
    %121 = arith.mulf %116, %120 : vector<16x16xf32>
    %122 = vector.extract_strided_slice %97 {offsets = [0, 0], sizes = [16, 8], strides = [1, 1]} : vector<16x32xf32> to vector<16x8xf32>
    %cst_58 = arith.constant dense<0.000000e+00> : vector<16x8xf32>
    %123 = tpu.matmul %121, %122, %cst_58 {dimension_numbers = #tpu.dot_dimension_numbers<[1], [0], [0], [1], [0, 0, 1, 1], [], []>} : vector<16x16xf32>, vector<16x8xf32>, vector<16x8xf32> -> vector<16x8xf32>
    %124 = vector.extract_strided_slice %99 {offsets = [0, 1], sizes = [16, 1], strides = [1, 1]} : vector<16x4xf32> to vector<16x1xf32>
    %125 = vector.extract_strided_slice %100 {offsets = [1, 0], sizes = [1, 16], strides = [1, 1]} : vector<4x16xf32> to vector<1x16xf32>
    %126 = vector.broadcast %124 : vector<16x1xf32> to vector<16x16xf32>
    %127 = vector.broadcast %125 : vector<1x16xf32> to vector<16x16xf32>
    %128 = arith.addf %126, %127 : vector<16x16xf32>
    %cst_59 = arith.constant 2.000000e-01 : f32
    %cst_60 = arith.constant 0.000000e+00 : f32
    %129 = vector.broadcast %cst_60 : f32 to vector<16x16xf32>
    %130 = arith.cmpf oge, %128, %129 : vector<16x16xf32>
    %131 = vector.broadcast %cst_59 : f32 to vector<16x16xf32>
    %132 = arith.mulf %131, %128 : vector<16x16xf32>
    %133 = arith.select %130, %128, %132 : vector<16x16xi1>, vector<16x16xf32>
    %134 = arith.addf %133, %92 : vector<16x16xf32>
    %cst_61 = arith.constant dense<0xFF800000> : vector<16xf32>
    %135 = vector.multi_reduction <maximumf>, %134, %cst_61 [1] : vector<16x16xf32> to vector<16xf32>
    %136 = vector.shape_cast %135 : vector<16xf32> to vector<16x1xf32>
    %137 = vector.broadcast %136 : vector<16x1xf32> to vector<16x16xf32>
    %138 = arith.subf %134, %137 : vector<16x16xf32>
    %139 = math.exp %138 : vector<16x16xf32>
    %cst_62 = arith.constant dense<0.000000e+00> : vector<16xf32>
    %140 = vector.multi_reduction <add>, %139, %cst_62 [1] : vector<16x16xf32> to vector<16xf32>
    %141 = vector.shape_cast %140 : vector<16xf32> to vector<16x1xf32>
    %142 = tpu.reciprocal %141 {approx = true} : vector<16x1xf32> -> vector<16x1xf32>
    %143 = vector.broadcast %142 : vector<16x1xf32> to vector<16x16xf32>
    %144 = arith.mulf %139, %143 : vector<16x16xf32>
    %145 = vector.extract_strided_slice %97 {offsets = [0, 8], sizes = [16, 8], strides = [1, 1]} : vector<16x32xf32> to vector<16x8xf32>
    %cst_63 = arith.constant dense<0.000000e+00> : vector<16x8xf32>
    %146 = tpu.matmul %144, %145, %cst_63 {dimension_numbers = #tpu.dot_dimension_numbers<[1], [0], [0], [1], [0, 0, 1, 1], [], []>} : vector<16x16xf32>, vector<16x8xf32>, vector<16x8xf32> -> vector<16x8xf32>
    %147 = vector.extract_strided_slice %99 {offsets = [0, 2], sizes = [16, 1], strides = [1, 1]} : vector<16x4xf32> to vector<16x1xf32>
    %148 = vector.extract_strided_slice %100 {offsets = [2, 0], sizes = [1, 16], strides = [1, 1]} : vector<4x16xf32> to vector<1x16xf32>
    %149 = vector.broadcast %147 : vector<16x1xf32> to vector<16x16xf32>
    %150 = vector.broadcast %148 : vector<1x16xf32> to vector<16x16xf32>
    %151 = arith.addf %149, %150 : vector<16x16xf32>
    %cst_64 = arith.constant 2.000000e-01 : f32
    %cst_65 = arith.constant 0.000000e+00 : f32
    %152 = vector.broadcast %cst_65 : f32 to vector<16x16xf32>
    %153 = arith.cmpf oge, %151, %152 : vector<16x16xf32>
    %154 = vector.broadcast %cst_64 : f32 to vector<16x16xf32>
    %155 = arith.mulf %154, %151 : vector<16x16xf32>
    %156 = arith.select %153, %151, %155 : vector<16x16xi1>, vector<16x16xf32>
    %157 = arith.addf %156, %92 : vector<16x16xf32>
    %cst_66 = arith.constant dense<0xFF800000> : vector<16xf32>
    %158 = vector.multi_reduction <maximumf>, %157, %cst_66 [1] : vector<16x16xf32> to vector<16xf32>
    %159 = vector.shape_cast %158 : vector<16xf32> to vector<16x1xf32>
    %160 = vector.broadcast %159 : vector<16x1xf32> to vector<16x16xf32>
    %161 = arith.subf %157, %160 : vector<16x16xf32>
    %162 = math.exp %161 : vector<16x16xf32>
    %cst_67 = arith.constant dense<0.000000e+00> : vector<16xf32>
    %163 = vector.multi_reduction <add>, %162, %cst_67 [1] : vector<16x16xf32> to vector<16xf32>
    %164 = vector.shape_cast %163 : vector<16xf32> to vector<16x1xf32>
    %165 = tpu.reciprocal %164 {approx = true} : vector<16x1xf32> -> vector<16x1xf32>
    %166 = vector.broadcast %165 : vector<16x1xf32> to vector<16x16xf32>
    %167 = arith.mulf %162, %166 : vector<16x16xf32>
    %168 = vector.extract_strided_slice %97 {offsets = [0, 16], sizes = [16, 8], strides = [1, 1]} : vector<16x32xf32> to vector<16x8xf32>
    %cst_68 = arith.constant dense<0.000000e+00> : vector<16x8xf32>
    %169 = tpu.matmul %167, %168, %cst_68 {dimension_numbers = #tpu.dot_dimension_numbers<[1], [0], [0], [1], [0, 0, 1, 1], [], []>} : vector<16x16xf32>, vector<16x8xf32>, vector<16x8xf32> -> vector<16x8xf32>
    %170 = vector.extract_strided_slice %99 {offsets = [0, 3], sizes = [16, 1], strides = [1, 1]} : vector<16x4xf32> to vector<16x1xf32>
    %171 = vector.extract_strided_slice %100 {offsets = [3, 0], sizes = [1, 16], strides = [1, 1]} : vector<4x16xf32> to vector<1x16xf32>
    %172 = vector.broadcast %170 : vector<16x1xf32> to vector<16x16xf32>
    %173 = vector.broadcast %171 : vector<1x16xf32> to vector<16x16xf32>
    %174 = arith.addf %172, %173 : vector<16x16xf32>
    %cst_69 = arith.constant 2.000000e-01 : f32
    %cst_70 = arith.constant 0.000000e+00 : f32
    %175 = vector.broadcast %cst_70 : f32 to vector<16x16xf32>
    %176 = arith.cmpf oge, %174, %175 : vector<16x16xf32>
    %177 = vector.broadcast %cst_69 : f32 to vector<16x16xf32>
    %178 = arith.mulf %177, %174 : vector<16x16xf32>
    %179 = arith.select %176, %174, %178 : vector<16x16xi1>, vector<16x16xf32>
    %180 = arith.addf %179, %92 : vector<16x16xf32>
    %cst_71 = arith.constant dense<0xFF800000> : vector<16xf32>
    %181 = vector.multi_reduction <maximumf>, %180, %cst_71 [1] : vector<16x16xf32> to vector<16xf32>
    %182 = vector.shape_cast %181 : vector<16xf32> to vector<16x1xf32>
    %183 = vector.broadcast %182 : vector<16x1xf32> to vector<16x16xf32>
    %184 = arith.subf %180, %183 : vector<16x16xf32>
    %185 = math.exp %184 : vector<16x16xf32>
    %cst_72 = arith.constant dense<0.000000e+00> : vector<16xf32>
    %186 = vector.multi_reduction <add>, %185, %cst_72 [1] : vector<16x16xf32> to vector<16xf32>
    %187 = vector.shape_cast %186 : vector<16xf32> to vector<16x1xf32>
    %188 = tpu.reciprocal %187 {approx = true} : vector<16x1xf32> -> vector<16x1xf32>
    %189 = vector.broadcast %188 : vector<16x1xf32> to vector<16x16xf32>
    %190 = arith.mulf %185, %189 : vector<16x16xf32>
    %191 = vector.extract_strided_slice %97 {offsets = [0, 24], sizes = [16, 8], strides = [1, 1]} : vector<16x32xf32> to vector<16x8xf32>
    %cst_73 = arith.constant dense<0.000000e+00> : vector<16x8xf32>
    %192 = tpu.matmul %190, %191, %cst_73 {dimension_numbers = #tpu.dot_dimension_numbers<[1], [0], [0], [1], [0, 0, 1, 1], [], []>} : vector<16x16xf32>, vector<16x8xf32>, vector<16x8xf32> -> vector<16x8xf32>
    %193 = tpu.concatenate %123, %146, %169, %192 in 1 : vector<16x8xf32>, vector<16x8xf32>, vector<16x8xf32>, vector<16x8xf32> -> vector<16x32xf32>
    %194 = vector.broadcast %96 : vector<1x32xf32> to vector<16x32xf32>
    %195 = arith.addf %193, %194 : vector<16x32xf32>
    %cst_74 = arith.constant 0.00999999977 : f32
    %cst_75 = arith.constant 0.000000e+00 : f32
    %196 = vector.broadcast %cst_75 : f32 to vector<16x32xf32>
    %197 = arith.cmpf oge, %195, %196 : vector<16x32xf32>
    %198 = vector.broadcast %cst_74 : f32 to vector<16x32xf32>
    %199 = arith.mulf %198, %195 : vector<16x32xf32>
    %200 = arith.select %197, %195, %199 : vector<16x32xi1>, vector<16x32xf32>
    %c0_76 = arith.constant 0 : index
    %c0_77 = arith.constant 0 : index
    %201 = vector.load %arg19[%c0_76, %c0_77] : memref<32x32xf32, #tpu.memory_space<vmem>>, vector<32x32xf32>
    %c0_78 = arith.constant 0 : index
    %c0_79 = arith.constant 0 : index
    %202 = vector.load %arg20[%c0_78, %c0_79] : memref<32x4xf32, #tpu.memory_space<vmem>>, vector<32x4xf32>
    %c0_80 = arith.constant 0 : index
    %c0_81 = arith.constant 0 : index
    %203 = vector.load %arg21[%c0_80, %c0_81] : memref<32x4xf32, #tpu.memory_space<vmem>>, vector<32x4xf32>
    %c0_82 = arith.constant 0 : index
    %c0_83 = arith.constant 0 : index
    %204 = vector.load %arg22[%c0_82, %c0_83] : memref<1x32xf32, #tpu.memory_space<vmem>>, vector<1x32xf32>
    %cst_84 = arith.constant dense<0.000000e+00> : vector<16x32xf32>
    %205 = tpu.matmul %200, %201, %cst_84 {dimension_numbers = #tpu.dot_dimension_numbers<[1], [0], [0], [1], [0, 0, 1, 1], [], []>} : vector<16x32xf32>, vector<32x32xf32>, vector<16x32xf32> -> vector<16x32xf32>
    %cst_85 = arith.constant dense<0.000000e+00> : vector<16x4xf32>
    %206 = tpu.matmul %205, %202, %cst_85 {dimension_numbers = #tpu.dot_dimension_numbers<[1], [0], [0], [1], [0, 0, 1, 1], [], []>} : vector<16x32xf32>, vector<32x4xf32>, vector<16x4xf32> -> vector<16x4xf32>
    %cst_86 = arith.constant dense<0.000000e+00> : vector<16x4xf32>
    %207 = tpu.matmul %205, %203, %cst_86 {dimension_numbers = #tpu.dot_dimension_numbers<[1], [0], [0], [1], [0, 0, 1, 1], [], []>} : vector<16x32xf32>, vector<32x4xf32>, vector<16x4xf32> -> vector<16x4xf32>
    %208 = tpu.transpose %206, [1, 0] : vector<16x4xf32> -> vector<4x16xf32>
    %209 = vector.extract_strided_slice %207 {offsets = [0, 0], sizes = [16, 1], strides = [1, 1]} : vector<16x4xf32> to vector<16x1xf32>
    %210 = vector.extract_strided_slice %208 {offsets = [0, 0], sizes = [1, 16], strides = [1, 1]} : vector<4x16xf32> to vector<1x16xf32>
    %211 = vector.broadcast %209 : vector<16x1xf32> to vector<16x16xf32>
    %212 = vector.broadcast %210 : vector<1x16xf32> to vector<16x16xf32>
    %213 = arith.addf %211, %212 : vector<16x16xf32>
    %cst_87 = arith.constant 2.000000e-01 : f32
    %cst_88 = arith.constant 0.000000e+00 : f32
    %214 = vector.broadcast %cst_88 : f32 to vector<16x16xf32>
    %215 = arith.cmpf oge, %213, %214 : vector<16x16xf32>
    %216 = vector.broadcast %cst_87 : f32 to vector<16x16xf32>
    %217 = arith.mulf %216, %213 : vector<16x16xf32>
    %218 = arith.select %215, %213, %217 : vector<16x16xi1>, vector<16x16xf32>
    %219 = arith.addf %218, %92 : vector<16x16xf32>
    %cst_89 = arith.constant dense<0xFF800000> : vector<16xf32>
    %220 = vector.multi_reduction <maximumf>, %219, %cst_89 [1] : vector<16x16xf32> to vector<16xf32>
    %221 = vector.shape_cast %220 : vector<16xf32> to vector<16x1xf32>
    %222 = vector.broadcast %221 : vector<16x1xf32> to vector<16x16xf32>
    %223 = arith.subf %219, %222 : vector<16x16xf32>
    %224 = math.exp %223 : vector<16x16xf32>
    %cst_90 = arith.constant dense<0.000000e+00> : vector<16xf32>
    %225 = vector.multi_reduction <add>, %224, %cst_90 [1] : vector<16x16xf32> to vector<16xf32>
    %226 = vector.shape_cast %225 : vector<16xf32> to vector<16x1xf32>
    %227 = tpu.reciprocal %226 {approx = true} : vector<16x1xf32> -> vector<16x1xf32>
    %228 = vector.broadcast %227 : vector<16x1xf32> to vector<16x16xf32>
    %229 = arith.mulf %224, %228 : vector<16x16xf32>
    %230 = vector.extract_strided_slice %205 {offsets = [0, 0], sizes = [16, 8], strides = [1, 1]} : vector<16x32xf32> to vector<16x8xf32>
    %cst_91 = arith.constant dense<0.000000e+00> : vector<16x8xf32>
    %231 = tpu.matmul %229, %230, %cst_91 {dimension_numbers = #tpu.dot_dimension_numbers<[1], [0], [0], [1], [0, 0, 1, 1], [], []>} : vector<16x16xf32>, vector<16x8xf32>, vector<16x8xf32> -> vector<16x8xf32>
    %232 = vector.extract_strided_slice %207 {offsets = [0, 1], sizes = [16, 1], strides = [1, 1]} : vector<16x4xf32> to vector<16x1xf32>
    %233 = vector.extract_strided_slice %208 {offsets = [1, 0], sizes = [1, 16], strides = [1, 1]} : vector<4x16xf32> to vector<1x16xf32>
    %234 = vector.broadcast %232 : vector<16x1xf32> to vector<16x16xf32>
    %235 = vector.broadcast %233 : vector<1x16xf32> to vector<16x16xf32>
    %236 = arith.addf %234, %235 : vector<16x16xf32>
    %cst_92 = arith.constant 2.000000e-01 : f32
    %cst_93 = arith.constant 0.000000e+00 : f32
    %237 = vector.broadcast %cst_93 : f32 to vector<16x16xf32>
    %238 = arith.cmpf oge, %236, %237 : vector<16x16xf32>
    %239 = vector.broadcast %cst_92 : f32 to vector<16x16xf32>
    %240 = arith.mulf %239, %236 : vector<16x16xf32>
    %241 = arith.select %238, %236, %240 : vector<16x16xi1>, vector<16x16xf32>
    %242 = arith.addf %241, %92 : vector<16x16xf32>
    %cst_94 = arith.constant dense<0xFF800000> : vector<16xf32>
    %243 = vector.multi_reduction <maximumf>, %242, %cst_94 [1] : vector<16x16xf32> to vector<16xf32>
    %244 = vector.shape_cast %243 : vector<16xf32> to vector<16x1xf32>
    %245 = vector.broadcast %244 : vector<16x1xf32> to vector<16x16xf32>
    %246 = arith.subf %242, %245 : vector<16x16xf32>
    %247 = math.exp %246 : vector<16x16xf32>
    %cst_95 = arith.constant dense<0.000000e+00> : vector<16xf32>
    %248 = vector.multi_reduction <add>, %247, %cst_95 [1] : vector<16x16xf32> to vector<16xf32>
    %249 = vector.shape_cast %248 : vector<16xf32> to vector<16x1xf32>
    %250 = tpu.reciprocal %249 {approx = true} : vector<16x1xf32> -> vector<16x1xf32>
    %251 = vector.broadcast %250 : vector<16x1xf32> to vector<16x16xf32>
    %252 = arith.mulf %247, %251 : vector<16x16xf32>
    %253 = vector.extract_strided_slice %205 {offsets = [0, 8], sizes = [16, 8], strides = [1, 1]} : vector<16x32xf32> to vector<16x8xf32>
    %cst_96 = arith.constant dense<0.000000e+00> : vector<16x8xf32>
    %254 = tpu.matmul %252, %253, %cst_96 {dimension_numbers = #tpu.dot_dimension_numbers<[1], [0], [0], [1], [0, 0, 1, 1], [], []>} : vector<16x16xf32>, vector<16x8xf32>, vector<16x8xf32> -> vector<16x8xf32>
    %255 = vector.extract_strided_slice %207 {offsets = [0, 2], sizes = [16, 1], strides = [1, 1]} : vector<16x4xf32> to vector<16x1xf32>
    %256 = vector.extract_strided_slice %208 {offsets = [2, 0], sizes = [1, 16], strides = [1, 1]} : vector<4x16xf32> to vector<1x16xf32>
    %257 = vector.broadcast %255 : vector<16x1xf32> to vector<16x16xf32>
    %258 = vector.broadcast %256 : vector<1x16xf32> to vector<16x16xf32>
    %259 = arith.addf %257, %258 : vector<16x16xf32>
    %cst_97 = arith.constant 2.000000e-01 : f32
    %cst_98 = arith.constant 0.000000e+00 : f32
    %260 = vector.broadcast %cst_98 : f32 to vector<16x16xf32>
    %261 = arith.cmpf oge, %259, %260 : vector<16x16xf32>
    %262 = vector.broadcast %cst_97 : f32 to vector<16x16xf32>
    %263 = arith.mulf %262, %259 : vector<16x16xf32>
    %264 = arith.select %261, %259, %263 : vector<16x16xi1>, vector<16x16xf32>
    %265 = arith.addf %264, %92 : vector<16x16xf32>
    %cst_99 = arith.constant dense<0xFF800000> : vector<16xf32>
    %266 = vector.multi_reduction <maximumf>, %265, %cst_99 [1] : vector<16x16xf32> to vector<16xf32>
    %267 = vector.shape_cast %266 : vector<16xf32> to vector<16x1xf32>
    %268 = vector.broadcast %267 : vector<16x1xf32> to vector<16x16xf32>
    %269 = arith.subf %265, %268 : vector<16x16xf32>
    %270 = math.exp %269 : vector<16x16xf32>
    %cst_100 = arith.constant dense<0.000000e+00> : vector<16xf32>
    %271 = vector.multi_reduction <add>, %270, %cst_100 [1] : vector<16x16xf32> to vector<16xf32>
    %272 = vector.shape_cast %271 : vector<16xf32> to vector<16x1xf32>
    %273 = tpu.reciprocal %272 {approx = true} : vector<16x1xf32> -> vector<16x1xf32>
    %274 = vector.broadcast %273 : vector<16x1xf32> to vector<16x16xf32>
    %275 = arith.mulf %270, %274 : vector<16x16xf32>
    %276 = vector.extract_strided_slice %205 {offsets = [0, 16], sizes = [16, 8], strides = [1, 1]} : vector<16x32xf32> to vector<16x8xf32>
    %cst_101 = arith.constant dense<0.000000e+00> : vector<16x8xf32>
    %277 = tpu.matmul %275, %276, %cst_101 {dimension_numbers = #tpu.dot_dimension_numbers<[1], [0], [0], [1], [0, 0, 1, 1], [], []>} : vector<16x16xf32>, vector<16x8xf32>, vector<16x8xf32> -> vector<16x8xf32>
    %278 = vector.extract_strided_slice %207 {offsets = [0, 3], sizes = [16, 1], strides = [1, 1]} : vector<16x4xf32> to vector<16x1xf32>
    %279 = vector.extract_strided_slice %208 {offsets = [3, 0], sizes = [1, 16], strides = [1, 1]} : vector<4x16xf32> to vector<1x16xf32>
    %280 = vector.broadcast %278 : vector<16x1xf32> to vector<16x16xf32>
    %281 = vector.broadcast %279 : vector<1x16xf32> to vector<16x16xf32>
    %282 = arith.addf %280, %281 : vector<16x16xf32>
    %cst_102 = arith.constant 2.000000e-01 : f32
    %cst_103 = arith.constant 0.000000e+00 : f32
    %283 = vector.broadcast %cst_103 : f32 to vector<16x16xf32>
    %284 = arith.cmpf oge, %282, %283 : vector<16x16xf32>
    %285 = vector.broadcast %cst_102 : f32 to vector<16x16xf32>
    %286 = arith.mulf %285, %282 : vector<16x16xf32>
    %287 = arith.select %284, %282, %286 : vector<16x16xi1>, vector<16x16xf32>
    %288 = arith.addf %287, %92 : vector<16x16xf32>
    %cst_104 = arith.constant dense<0xFF800000> : vector<16xf32>
    %289 = vector.multi_reduction <maximumf>, %288, %cst_104 [1] : vector<16x16xf32> to vector<16xf32>
    %290 = vector.shape_cast %289 : vector<16xf32> to vector<16x1xf32>
    %291 = vector.broadcast %290 : vector<16x1xf32> to vector<16x16xf32>
    %292 = arith.subf %288, %291 : vector<16x16xf32>
    %293 = math.exp %292 : vector<16x16xf32>
    %cst_105 = arith.constant dense<0.000000e+00> : vector<16xf32>
    %294 = vector.multi_reduction <add>, %293, %cst_105 [1] : vector<16x16xf32> to vector<16xf32>
    %295 = vector.shape_cast %294 : vector<16xf32> to vector<16x1xf32>
    %296 = tpu.reciprocal %295 {approx = true} : vector<16x1xf32> -> vector<16x1xf32>
    %297 = vector.broadcast %296 : vector<16x1xf32> to vector<16x16xf32>
    %298 = arith.mulf %293, %297 : vector<16x16xf32>
    %299 = vector.extract_strided_slice %205 {offsets = [0, 24], sizes = [16, 8], strides = [1, 1]} : vector<16x32xf32> to vector<16x8xf32>
    %cst_106 = arith.constant dense<0.000000e+00> : vector<16x8xf32>
    %300 = tpu.matmul %298, %299, %cst_106 {dimension_numbers = #tpu.dot_dimension_numbers<[1], [0], [0], [1], [0, 0, 1, 1], [], []>} : vector<16x16xf32>, vector<16x8xf32>, vector<16x8xf32> -> vector<16x8xf32>
    %301 = tpu.concatenate %231, %254, %277, %300 in 1 : vector<16x8xf32>, vector<16x8xf32>, vector<16x8xf32>, vector<16x8xf32> -> vector<16x32xf32>
    %302 = vector.broadcast %204 : vector<1x32xf32> to vector<16x32xf32>
    %303 = arith.addf %301, %302 : vector<16x32xf32>
    %cst_107 = arith.constant 0.00999999977 : f32
    %cst_108 = arith.constant 0.000000e+00 : f32
    %304 = vector.broadcast %cst_108 : f32 to vector<16x32xf32>
    %305 = arith.cmpf oge, %303, %304 : vector<16x32xf32>
    %306 = vector.broadcast %cst_107 : f32 to vector<16x32xf32>
    %307 = arith.mulf %306, %303 : vector<16x32xf32>
    %308 = arith.select %305, %303, %307 : vector<16x32xi1>, vector<16x32xf32>
    %c0_109 = arith.constant 0 : index
    %c0_110 = arith.constant 0 : index
    %309 = vector.load %arg23[%c0_109, %c0_110] : memref<32x32xf32, #tpu.memory_space<vmem>>, vector<32x32xf32>
    %c0_111 = arith.constant 0 : index
    %c0_112 = arith.constant 0 : index
    %310 = vector.load %arg24[%c0_111, %c0_112] : memref<32x4xf32, #tpu.memory_space<vmem>>, vector<32x4xf32>
    %c0_113 = arith.constant 0 : index
    %c0_114 = arith.constant 0 : index
    %311 = vector.load %arg25[%c0_113, %c0_114] : memref<32x4xf32, #tpu.memory_space<vmem>>, vector<32x4xf32>
    %c0_115 = arith.constant 0 : index
    %c0_116 = arith.constant 0 : index
    %312 = vector.load %arg26[%c0_115, %c0_116] : memref<1x32xf32, #tpu.memory_space<vmem>>, vector<1x32xf32>
    %cst_117 = arith.constant dense<0.000000e+00> : vector<16x32xf32>
    %313 = tpu.matmul %308, %309, %cst_117 {dimension_numbers = #tpu.dot_dimension_numbers<[1], [0], [0], [1], [0, 0, 1, 1], [], []>} : vector<16x32xf32>, vector<32x32xf32>, vector<16x32xf32> -> vector<16x32xf32>
    %cst_118 = arith.constant dense<0.000000e+00> : vector<16x4xf32>
    %314 = tpu.matmul %313, %310, %cst_118 {dimension_numbers = #tpu.dot_dimension_numbers<[1], [0], [0], [1], [0, 0, 1, 1], [], []>} : vector<16x32xf32>, vector<32x4xf32>, vector<16x4xf32> -> vector<16x4xf32>
    %cst_119 = arith.constant dense<0.000000e+00> : vector<16x4xf32>
    %315 = tpu.matmul %313, %311, %cst_119 {dimension_numbers = #tpu.dot_dimension_numbers<[1], [0], [0], [1], [0, 0, 1, 1], [], []>} : vector<16x32xf32>, vector<32x4xf32>, vector<16x4xf32> -> vector<16x4xf32>
    %316 = tpu.transpose %314, [1, 0] : vector<16x4xf32> -> vector<4x16xf32>
    %317 = vector.extract_strided_slice %315 {offsets = [0, 0], sizes = [16, 1], strides = [1, 1]} : vector<16x4xf32> to vector<16x1xf32>
    %318 = vector.extract_strided_slice %316 {offsets = [0, 0], sizes = [1, 16], strides = [1, 1]} : vector<4x16xf32> to vector<1x16xf32>
    %319 = vector.broadcast %317 : vector<16x1xf32> to vector<16x16xf32>
    %320 = vector.broadcast %318 : vector<1x16xf32> to vector<16x16xf32>
    %321 = arith.addf %319, %320 : vector<16x16xf32>
    %cst_120 = arith.constant 2.000000e-01 : f32
    %cst_121 = arith.constant 0.000000e+00 : f32
    %322 = vector.broadcast %cst_121 : f32 to vector<16x16xf32>
    %323 = arith.cmpf oge, %321, %322 : vector<16x16xf32>
    %324 = vector.broadcast %cst_120 : f32 to vector<16x16xf32>
    %325 = arith.mulf %324, %321 : vector<16x16xf32>
    %326 = arith.select %323, %321, %325 : vector<16x16xi1>, vector<16x16xf32>
    %327 = arith.addf %326, %92 : vector<16x16xf32>
    %cst_122 = arith.constant dense<0xFF800000> : vector<16xf32>
    %328 = vector.multi_reduction <maximumf>, %327, %cst_122 [1] : vector<16x16xf32> to vector<16xf32>
    %329 = vector.shape_cast %328 : vector<16xf32> to vector<16x1xf32>
    %330 = vector.broadcast %329 : vector<16x1xf32> to vector<16x16xf32>
    %331 = arith.subf %327, %330 : vector<16x16xf32>
    %332 = math.exp %331 : vector<16x16xf32>
    %cst_123 = arith.constant dense<0.000000e+00> : vector<16xf32>
    %333 = vector.multi_reduction <add>, %332, %cst_123 [1] : vector<16x16xf32> to vector<16xf32>
    %334 = vector.shape_cast %333 : vector<16xf32> to vector<16x1xf32>
    %335 = tpu.reciprocal %334 {approx = true} : vector<16x1xf32> -> vector<16x1xf32>
    %336 = vector.broadcast %335 : vector<16x1xf32> to vector<16x16xf32>
    %337 = arith.mulf %332, %336 : vector<16x16xf32>
    %338 = vector.extract_strided_slice %313 {offsets = [0, 0], sizes = [16, 8], strides = [1, 1]} : vector<16x32xf32> to vector<16x8xf32>
    %cst_124 = arith.constant dense<0.000000e+00> : vector<16x8xf32>
    %339 = tpu.matmul %337, %338, %cst_124 {dimension_numbers = #tpu.dot_dimension_numbers<[1], [0], [0], [1], [0, 0, 1, 1], [], []>} : vector<16x16xf32>, vector<16x8xf32>, vector<16x8xf32> -> vector<16x8xf32>
    %340 = vector.extract_strided_slice %315 {offsets = [0, 1], sizes = [16, 1], strides = [1, 1]} : vector<16x4xf32> to vector<16x1xf32>
    %341 = vector.extract_strided_slice %316 {offsets = [1, 0], sizes = [1, 16], strides = [1, 1]} : vector<4x16xf32> to vector<1x16xf32>
    %342 = vector.broadcast %340 : vector<16x1xf32> to vector<16x16xf32>
    %343 = vector.broadcast %341 : vector<1x16xf32> to vector<16x16xf32>
    %344 = arith.addf %342, %343 : vector<16x16xf32>
    %cst_125 = arith.constant 2.000000e-01 : f32
    %cst_126 = arith.constant 0.000000e+00 : f32
    %345 = vector.broadcast %cst_126 : f32 to vector<16x16xf32>
    %346 = arith.cmpf oge, %344, %345 : vector<16x16xf32>
    %347 = vector.broadcast %cst_125 : f32 to vector<16x16xf32>
    %348 = arith.mulf %347, %344 : vector<16x16xf32>
    %349 = arith.select %346, %344, %348 : vector<16x16xi1>, vector<16x16xf32>
    %350 = arith.addf %349, %92 : vector<16x16xf32>
    %cst_127 = arith.constant dense<0xFF800000> : vector<16xf32>
    %351 = vector.multi_reduction <maximumf>, %350, %cst_127 [1] : vector<16x16xf32> to vector<16xf32>
    %352 = vector.shape_cast %351 : vector<16xf32> to vector<16x1xf32>
    %353 = vector.broadcast %352 : vector<16x1xf32> to vector<16x16xf32>
    %354 = arith.subf %350, %353 : vector<16x16xf32>
    %355 = math.exp %354 : vector<16x16xf32>
    %cst_128 = arith.constant dense<0.000000e+00> : vector<16xf32>
    %356 = vector.multi_reduction <add>, %355, %cst_128 [1] : vector<16x16xf32> to vector<16xf32>
    %357 = vector.shape_cast %356 : vector<16xf32> to vector<16x1xf32>
    %358 = tpu.reciprocal %357 {approx = true} : vector<16x1xf32> -> vector<16x1xf32>
    %359 = vector.broadcast %358 : vector<16x1xf32> to vector<16x16xf32>
    %360 = arith.mulf %355, %359 : vector<16x16xf32>
    %361 = vector.extract_strided_slice %313 {offsets = [0, 8], sizes = [16, 8], strides = [1, 1]} : vector<16x32xf32> to vector<16x8xf32>
    %cst_129 = arith.constant dense<0.000000e+00> : vector<16x8xf32>
    %362 = tpu.matmul %360, %361, %cst_129 {dimension_numbers = #tpu.dot_dimension_numbers<[1], [0], [0], [1], [0, 0, 1, 1], [], []>} : vector<16x16xf32>, vector<16x8xf32>, vector<16x8xf32> -> vector<16x8xf32>
    %363 = vector.extract_strided_slice %315 {offsets = [0, 2], sizes = [16, 1], strides = [1, 1]} : vector<16x4xf32> to vector<16x1xf32>
    %364 = vector.extract_strided_slice %316 {offsets = [2, 0], sizes = [1, 16], strides = [1, 1]} : vector<4x16xf32> to vector<1x16xf32>
    %365 = vector.broadcast %363 : vector<16x1xf32> to vector<16x16xf32>
    %366 = vector.broadcast %364 : vector<1x16xf32> to vector<16x16xf32>
    %367 = arith.addf %365, %366 : vector<16x16xf32>
    %cst_130 = arith.constant 2.000000e-01 : f32
    %cst_131 = arith.constant 0.000000e+00 : f32
    %368 = vector.broadcast %cst_131 : f32 to vector<16x16xf32>
    %369 = arith.cmpf oge, %367, %368 : vector<16x16xf32>
    %370 = vector.broadcast %cst_130 : f32 to vector<16x16xf32>
    %371 = arith.mulf %370, %367 : vector<16x16xf32>
    %372 = arith.select %369, %367, %371 : vector<16x16xi1>, vector<16x16xf32>
    %373 = arith.addf %372, %92 : vector<16x16xf32>
    %cst_132 = arith.constant dense<0xFF800000> : vector<16xf32>
    %374 = vector.multi_reduction <maximumf>, %373, %cst_132 [1] : vector<16x16xf32> to vector<16xf32>
    %375 = vector.shape_cast %374 : vector<16xf32> to vector<16x1xf32>
    %376 = vector.broadcast %375 : vector<16x1xf32> to vector<16x16xf32>
    %377 = arith.subf %373, %376 : vector<16x16xf32>
    %378 = math.exp %377 : vector<16x16xf32>
    %cst_133 = arith.constant dense<0.000000e+00> : vector<16xf32>
    %379 = vector.multi_reduction <add>, %378, %cst_133 [1] : vector<16x16xf32> to vector<16xf32>
    %380 = vector.shape_cast %379 : vector<16xf32> to vector<16x1xf32>
    %381 = tpu.reciprocal %380 {approx = true} : vector<16x1xf32> -> vector<16x1xf32>
    %382 = vector.broadcast %381 : vector<16x1xf32> to vector<16x16xf32>
    %383 = arith.mulf %378, %382 : vector<16x16xf32>
    %384 = vector.extract_strided_slice %313 {offsets = [0, 16], sizes = [16, 8], strides = [1, 1]} : vector<16x32xf32> to vector<16x8xf32>
    %cst_134 = arith.constant dense<0.000000e+00> : vector<16x8xf32>
    %385 = tpu.matmul %383, %384, %cst_134 {dimension_numbers = #tpu.dot_dimension_numbers<[1], [0], [0], [1], [0, 0, 1, 1], [], []>} : vector<16x16xf32>, vector<16x8xf32>, vector<16x8xf32> -> vector<16x8xf32>
    %386 = vector.extract_strided_slice %315 {offsets = [0, 3], sizes = [16, 1], strides = [1, 1]} : vector<16x4xf32> to vector<16x1xf32>
    %387 = vector.extract_strided_slice %316 {offsets = [3, 0], sizes = [1, 16], strides = [1, 1]} : vector<4x16xf32> to vector<1x16xf32>
    %388 = vector.broadcast %386 : vector<16x1xf32> to vector<16x16xf32>
    %389 = vector.broadcast %387 : vector<1x16xf32> to vector<16x16xf32>
    %390 = arith.addf %388, %389 : vector<16x16xf32>
    %cst_135 = arith.constant 2.000000e-01 : f32
    %cst_136 = arith.constant 0.000000e+00 : f32
    %391 = vector.broadcast %cst_136 : f32 to vector<16x16xf32>
    %392 = arith.cmpf oge, %390, %391 : vector<16x16xf32>
    %393 = vector.broadcast %cst_135 : f32 to vector<16x16xf32>
    %394 = arith.mulf %393, %390 : vector<16x16xf32>
    %395 = arith.select %392, %390, %394 : vector<16x16xi1>, vector<16x16xf32>
    %396 = arith.addf %395, %92 : vector<16x16xf32>
    %cst_137 = arith.constant dense<0xFF800000> : vector<16xf32>
    %397 = vector.multi_reduction <maximumf>, %396, %cst_137 [1] : vector<16x16xf32> to vector<16xf32>
    %398 = vector.shape_cast %397 : vector<16xf32> to vector<16x1xf32>
    %399 = vector.broadcast %398 : vector<16x1xf32> to vector<16x16xf32>
    %400 = arith.subf %396, %399 : vector<16x16xf32>
    %401 = math.exp %400 : vector<16x16xf32>
    %cst_138 = arith.constant dense<0.000000e+00> : vector<16xf32>
    %402 = vector.multi_reduction <add>, %401, %cst_138 [1] : vector<16x16xf32> to vector<16xf32>
    %403 = vector.shape_cast %402 : vector<16xf32> to vector<16x1xf32>
    %404 = tpu.reciprocal %403 {approx = true} : vector<16x1xf32> -> vector<16x1xf32>
    %405 = vector.broadcast %404 : vector<16x1xf32> to vector<16x16xf32>
    %406 = arith.mulf %401, %405 : vector<16x16xf32>
    %407 = vector.extract_strided_slice %313 {offsets = [0, 24], sizes = [16, 8], strides = [1, 1]} : vector<16x32xf32> to vector<16x8xf32>
    %cst_139 = arith.constant dense<0.000000e+00> : vector<16x8xf32>
    %408 = tpu.matmul %406, %407, %cst_139 {dimension_numbers = #tpu.dot_dimension_numbers<[1], [0], [0], [1], [0, 0, 1, 1], [], []>} : vector<16x16xf32>, vector<16x8xf32>, vector<16x8xf32> -> vector<16x8xf32>
    %409 = tpu.concatenate %339, %362, %385, %408 in 1 : vector<16x8xf32>, vector<16x8xf32>, vector<16x8xf32>, vector<16x8xf32> -> vector<16x32xf32>
    %410 = vector.broadcast %312 : vector<1x32xf32> to vector<16x32xf32>
    %411 = arith.addf %409, %410 : vector<16x32xf32>
    %cst_140 = arith.constant 0.00999999977 : f32
    %cst_141 = arith.constant 0.000000e+00 : f32
    %412 = vector.broadcast %cst_141 : f32 to vector<16x32xf32>
    %413 = arith.cmpf oge, %411, %412 : vector<16x32xf32>
    %414 = vector.broadcast %cst_140 : f32 to vector<16x32xf32>
    %415 = arith.mulf %414, %411 : vector<16x32xf32>
    %416 = arith.select %413, %411, %415 : vector<16x32xi1>, vector<16x32xf32>
    %c0_142 = arith.constant 0 : index
    %c0_143 = arith.constant 0 : index
    %417 = vector.load %arg27[%c0_142, %c0_143] : memref<32x32xf32, #tpu.memory_space<vmem>>, vector<32x32xf32>
    %c0_144 = arith.constant 0 : index
    %c0_145 = arith.constant 0 : index
    %418 = vector.load %arg28[%c0_144, %c0_145] : memref<32x4xf32, #tpu.memory_space<vmem>>, vector<32x4xf32>
    %c0_146 = arith.constant 0 : index
    %c0_147 = arith.constant 0 : index
    %419 = vector.load %arg29[%c0_146, %c0_147] : memref<32x4xf32, #tpu.memory_space<vmem>>, vector<32x4xf32>
    %c0_148 = arith.constant 0 : index
    %c0_149 = arith.constant 0 : index
    %420 = vector.load %arg30[%c0_148, %c0_149] : memref<1x8xf32, #tpu.memory_space<vmem>>, vector<1x8xf32>
    %cst_150 = arith.constant dense<0.000000e+00> : vector<16x32xf32>
    %421 = tpu.matmul %416, %417, %cst_150 {dimension_numbers = #tpu.dot_dimension_numbers<[1], [0], [0], [1], [0, 0, 1, 1], [], []>} : vector<16x32xf32>, vector<32x32xf32>, vector<16x32xf32> -> vector<16x32xf32>
    %cst_151 = arith.constant dense<0.000000e+00> : vector<16x4xf32>
    %422 = tpu.matmul %421, %418, %cst_151 {dimension_numbers = #tpu.dot_dimension_numbers<[1], [0], [0], [1], [0, 0, 1, 1], [], []>} : vector<16x32xf32>, vector<32x4xf32>, vector<16x4xf32> -> vector<16x4xf32>
    %cst_152 = arith.constant dense<0.000000e+00> : vector<16x4xf32>
    %423 = tpu.matmul %421, %419, %cst_152 {dimension_numbers = #tpu.dot_dimension_numbers<[1], [0], [0], [1], [0, 0, 1, 1], [], []>} : vector<16x32xf32>, vector<32x4xf32>, vector<16x4xf32> -> vector<16x4xf32>
    %424 = tpu.transpose %422, [1, 0] : vector<16x4xf32> -> vector<4x16xf32>
    %425 = vector.extract_strided_slice %423 {offsets = [0, 0], sizes = [16, 1], strides = [1, 1]} : vector<16x4xf32> to vector<16x1xf32>
    %426 = vector.extract_strided_slice %424 {offsets = [0, 0], sizes = [1, 16], strides = [1, 1]} : vector<4x16xf32> to vector<1x16xf32>
    %427 = vector.broadcast %425 : vector<16x1xf32> to vector<16x16xf32>
    %428 = vector.broadcast %426 : vector<1x16xf32> to vector<16x16xf32>
    %429 = arith.addf %427, %428 : vector<16x16xf32>
    %cst_153 = arith.constant 2.000000e-01 : f32
    %cst_154 = arith.constant 0.000000e+00 : f32
    %430 = vector.broadcast %cst_154 : f32 to vector<16x16xf32>
    %431 = arith.cmpf oge, %429, %430 : vector<16x16xf32>
    %432 = vector.broadcast %cst_153 : f32 to vector<16x16xf32>
    %433 = arith.mulf %432, %429 : vector<16x16xf32>
    %434 = arith.select %431, %429, %433 : vector<16x16xi1>, vector<16x16xf32>
    %435 = arith.addf %434, %92 : vector<16x16xf32>
    %cst_155 = arith.constant dense<0xFF800000> : vector<16xf32>
    %436 = vector.multi_reduction <maximumf>, %435, %cst_155 [1] : vector<16x16xf32> to vector<16xf32>
    %437 = vector.shape_cast %436 : vector<16xf32> to vector<16x1xf32>
    %438 = vector.broadcast %437 : vector<16x1xf32> to vector<16x16xf32>
    %439 = arith.subf %435, %438 : vector<16x16xf32>
    %440 = math.exp %439 : vector<16x16xf32>
    %cst_156 = arith.constant dense<0.000000e+00> : vector<16xf32>
    %441 = vector.multi_reduction <add>, %440, %cst_156 [1] : vector<16x16xf32> to vector<16xf32>
    %442 = vector.shape_cast %441 : vector<16xf32> to vector<16x1xf32>
    %443 = tpu.reciprocal %442 {approx = true} : vector<16x1xf32> -> vector<16x1xf32>
    %444 = vector.broadcast %443 : vector<16x1xf32> to vector<16x16xf32>
    %445 = arith.mulf %440, %444 : vector<16x16xf32>
    %446 = vector.extract_strided_slice %421 {offsets = [0, 0], sizes = [16, 8], strides = [1, 1]} : vector<16x32xf32> to vector<16x8xf32>
    %cst_157 = arith.constant dense<0.000000e+00> : vector<16x8xf32>
    %447 = tpu.matmul %445, %446, %cst_157 {dimension_numbers = #tpu.dot_dimension_numbers<[1], [0], [0], [1], [0, 0, 1, 1], [], []>} : vector<16x16xf32>, vector<16x8xf32>, vector<16x8xf32> -> vector<16x8xf32>
    %448 = vector.extract_strided_slice %423 {offsets = [0, 1], sizes = [16, 1], strides = [1, 1]} : vector<16x4xf32> to vector<16x1xf32>
    %449 = vector.extract_strided_slice %424 {offsets = [1, 0], sizes = [1, 16], strides = [1, 1]} : vector<4x16xf32> to vector<1x16xf32>
    %450 = vector.broadcast %448 : vector<16x1xf32> to vector<16x16xf32>
    %451 = vector.broadcast %449 : vector<1x16xf32> to vector<16x16xf32>
    %452 = arith.addf %450, %451 : vector<16x16xf32>
    %cst_158 = arith.constant 2.000000e-01 : f32
    %cst_159 = arith.constant 0.000000e+00 : f32
    %453 = vector.broadcast %cst_159 : f32 to vector<16x16xf32>
    %454 = arith.cmpf oge, %452, %453 : vector<16x16xf32>
    %455 = vector.broadcast %cst_158 : f32 to vector<16x16xf32>
    %456 = arith.mulf %455, %452 : vector<16x16xf32>
    %457 = arith.select %454, %452, %456 : vector<16x16xi1>, vector<16x16xf32>
    %458 = arith.addf %457, %92 : vector<16x16xf32>
    %cst_160 = arith.constant dense<0xFF800000> : vector<16xf32>
    %459 = vector.multi_reduction <maximumf>, %458, %cst_160 [1] : vector<16x16xf32> to vector<16xf32>
    %460 = vector.shape_cast %459 : vector<16xf32> to vector<16x1xf32>
    %461 = vector.broadcast %460 : vector<16x1xf32> to vector<16x16xf32>
    %462 = arith.subf %458, %461 : vector<16x16xf32>
    %463 = math.exp %462 : vector<16x16xf32>
    %cst_161 = arith.constant dense<0.000000e+00> : vector<16xf32>
    %464 = vector.multi_reduction <add>, %463, %cst_161 [1] : vector<16x16xf32> to vector<16xf32>
    %465 = vector.shape_cast %464 : vector<16xf32> to vector<16x1xf32>
    %466 = tpu.reciprocal %465 {approx = true} : vector<16x1xf32> -> vector<16x1xf32>
    %467 = vector.broadcast %466 : vector<16x1xf32> to vector<16x16xf32>
    %468 = arith.mulf %463, %467 : vector<16x16xf32>
    %469 = vector.extract_strided_slice %421 {offsets = [0, 8], sizes = [16, 8], strides = [1, 1]} : vector<16x32xf32> to vector<16x8xf32>
    %cst_162 = arith.constant dense<0.000000e+00> : vector<16x8xf32>
    %470 = tpu.matmul %468, %469, %cst_162 {dimension_numbers = #tpu.dot_dimension_numbers<[1], [0], [0], [1], [0, 0, 1, 1], [], []>} : vector<16x16xf32>, vector<16x8xf32>, vector<16x8xf32> -> vector<16x8xf32>
    %471 = vector.extract_strided_slice %423 {offsets = [0, 2], sizes = [16, 1], strides = [1, 1]} : vector<16x4xf32> to vector<16x1xf32>
    %472 = vector.extract_strided_slice %424 {offsets = [2, 0], sizes = [1, 16], strides = [1, 1]} : vector<4x16xf32> to vector<1x16xf32>
    %473 = vector.broadcast %471 : vector<16x1xf32> to vector<16x16xf32>
    %474 = vector.broadcast %472 : vector<1x16xf32> to vector<16x16xf32>
    %475 = arith.addf %473, %474 : vector<16x16xf32>
    %cst_163 = arith.constant 2.000000e-01 : f32
    %cst_164 = arith.constant 0.000000e+00 : f32
    %476 = vector.broadcast %cst_164 : f32 to vector<16x16xf32>
    %477 = arith.cmpf oge, %475, %476 : vector<16x16xf32>
    %478 = vector.broadcast %cst_163 : f32 to vector<16x16xf32>
    %479 = arith.mulf %478, %475 : vector<16x16xf32>
    %480 = arith.select %477, %475, %479 : vector<16x16xi1>, vector<16x16xf32>
    %481 = arith.addf %480, %92 : vector<16x16xf32>
    %cst_165 = arith.constant dense<0xFF800000> : vector<16xf32>
    %482 = vector.multi_reduction <maximumf>, %481, %cst_165 [1] : vector<16x16xf32> to vector<16xf32>
    %483 = vector.shape_cast %482 : vector<16xf32> to vector<16x1xf32>
    %484 = vector.broadcast %483 : vector<16x1xf32> to vector<16x16xf32>
    %485 = arith.subf %481, %484 : vector<16x16xf32>
    %486 = math.exp %485 : vector<16x16xf32>
    %cst_166 = arith.constant dense<0.000000e+00> : vector<16xf32>
    %487 = vector.multi_reduction <add>, %486, %cst_166 [1] : vector<16x16xf32> to vector<16xf32>
    %488 = vector.shape_cast %487 : vector<16xf32> to vector<16x1xf32>
    %489 = tpu.reciprocal %488 {approx = true} : vector<16x1xf32> -> vector<16x1xf32>
    %490 = vector.broadcast %489 : vector<16x1xf32> to vector<16x16xf32>
    %491 = arith.mulf %486, %490 : vector<16x16xf32>
    %492 = vector.extract_strided_slice %421 {offsets = [0, 16], sizes = [16, 8], strides = [1, 1]} : vector<16x32xf32> to vector<16x8xf32>
    %cst_167 = arith.constant dense<0.000000e+00> : vector<16x8xf32>
    %493 = tpu.matmul %491, %492, %cst_167 {dimension_numbers = #tpu.dot_dimension_numbers<[1], [0], [0], [1], [0, 0, 1, 1], [], []>} : vector<16x16xf32>, vector<16x8xf32>, vector<16x8xf32> -> vector<16x8xf32>
    %494 = vector.extract_strided_slice %423 {offsets = [0, 3], sizes = [16, 1], strides = [1, 1]} : vector<16x4xf32> to vector<16x1xf32>
    %495 = vector.extract_strided_slice %424 {offsets = [3, 0], sizes = [1, 16], strides = [1, 1]} : vector<4x16xf32> to vector<1x16xf32>
    %496 = vector.broadcast %494 : vector<16x1xf32> to vector<16x16xf32>
    %497 = vector.broadcast %495 : vector<1x16xf32> to vector<16x16xf32>
    %498 = arith.addf %496, %497 : vector<16x16xf32>
    %cst_168 = arith.constant 2.000000e-01 : f32
    %cst_169 = arith.constant 0.000000e+00 : f32
    %499 = vector.broadcast %cst_169 : f32 to vector<16x16xf32>
    %500 = arith.cmpf oge, %498, %499 : vector<16x16xf32>
    %501 = vector.broadcast %cst_168 : f32 to vector<16x16xf32>
    %502 = arith.mulf %501, %498 : vector<16x16xf32>
    %503 = arith.select %500, %498, %502 : vector<16x16xi1>, vector<16x16xf32>
    %504 = arith.addf %503, %92 : vector<16x16xf32>
    %cst_170 = arith.constant dense<0xFF800000> : vector<16xf32>
    %505 = vector.multi_reduction <maximumf>, %504, %cst_170 [1] : vector<16x16xf32> to vector<16xf32>
    %506 = vector.shape_cast %505 : vector<16xf32> to vector<16x1xf32>
    %507 = vector.broadcast %506 : vector<16x1xf32> to vector<16x16xf32>
    %508 = arith.subf %504, %507 : vector<16x16xf32>
    %509 = math.exp %508 : vector<16x16xf32>
    %cst_171 = arith.constant dense<0.000000e+00> : vector<16xf32>
    %510 = vector.multi_reduction <add>, %509, %cst_171 [1] : vector<16x16xf32> to vector<16xf32>
    %511 = vector.shape_cast %510 : vector<16xf32> to vector<16x1xf32>
    %512 = tpu.reciprocal %511 {approx = true} : vector<16x1xf32> -> vector<16x1xf32>
    %513 = vector.broadcast %512 : vector<16x1xf32> to vector<16x16xf32>
    %514 = arith.mulf %509, %513 : vector<16x16xf32>
    %515 = vector.extract_strided_slice %421 {offsets = [0, 24], sizes = [16, 8], strides = [1, 1]} : vector<16x32xf32> to vector<16x8xf32>
    %cst_172 = arith.constant dense<0.000000e+00> : vector<16x8xf32>
    %516 = tpu.matmul %514, %515, %cst_172 {dimension_numbers = #tpu.dot_dimension_numbers<[1], [0], [0], [1], [0, 0, 1, 1], [], []>} : vector<16x16xf32>, vector<16x8xf32>, vector<16x8xf32> -> vector<16x8xf32>
    %517 = arith.addf %447, %470 : vector<16x8xf32>
    %518 = arith.addf %517, %493 : vector<16x8xf32>
    %519 = arith.addf %518, %516 : vector<16x8xf32>
    %cst_173 = arith.constant 2.500000e-01 : f32
    %520 = vector.broadcast %cst_173 : f32 to vector<16x8xf32>
    %521 = arith.mulf %519, %520 : vector<16x8xf32>
    %522 = vector.broadcast %420 : vector<1x8xf32> to vector<16x8xf32>
    %523 = arith.addf %521, %522 : vector<16x8xf32>
    %cst_174 = arith.constant 0.00999999977 : f32
    %cst_175 = arith.constant 0.000000e+00 : f32
    %524 = vector.broadcast %cst_175 : f32 to vector<16x8xf32>
    %525 = arith.cmpf oge, %523, %524 : vector<16x8xf32>
    %526 = vector.broadcast %cst_174 : f32 to vector<16x8xf32>
    %527 = arith.mulf %526, %523 : vector<16x8xf32>
    %528 = arith.select %525, %523, %527 : vector<16x8xi1>, vector<16x8xf32>
    %529 = vector.extract_strided_slice %528 {offsets = [8, 0], sizes = [1, 8], strides = [1, 1]} : vector<16x8xf32> to vector<1x8xf32>
    %530 = vector.extract_strided_slice %528 {offsets = [9, 0], sizes = [1, 8], strides = [1, 1]} : vector<16x8xf32> to vector<1x8xf32>
    %531 = vector.extract_strided_slice %528 {offsets = [10, 0], sizes = [1, 8], strides = [1, 1]} : vector<16x8xf32> to vector<1x8xf32>
    %532 = vector.extract_strided_slice %528 {offsets = [11, 0], sizes = [1, 8], strides = [1, 1]} : vector<16x8xf32> to vector<1x8xf32>
    %533 = tpu.concatenate %529, %530, %531, %532 in 0 : vector<1x8xf32>, vector<1x8xf32>, vector<1x8xf32>, vector<1x8xf32> -> vector<4x8xf32>
    %cst_176 = arith.constant 1.000000e+00 : f32
    %534 = vector.broadcast %cst_176 : f32 to vector<1x4xf32>
    %c0_177 = arith.constant 0 : index
    %c0_178 = arith.constant 0 : index
    %535 = vector.load %arg31[%c0_177, %c0_178] : memref<8x8xf32, #tpu.memory_space<vmem>>, vector<8x8xf32>
    %c0_179 = arith.constant 0 : index
    %c0_180 = arith.constant 0 : index
    %536 = vector.load %arg32[%c0_179, %c0_180] : memref<8x8xf32, #tpu.memory_space<vmem>>, vector<8x8xf32>
    %c0_181 = arith.constant 0 : index
    %c0_182 = arith.constant 0 : index
    %537 = vector.load %arg33[%c0_181, %c0_182] : memref<8x1xf32, #tpu.memory_space<vmem>>, vector<8x1xf32>
    %c0_183 = arith.constant 0 : index
    %c0_184 = arith.constant 0 : index
    %538 = vector.load %arg34[%c0_183, %c0_184] : memref<8x1xf32, #tpu.memory_space<vmem>>, vector<8x1xf32>
    %c0_185 = arith.constant 0 : index
    %c0_186 = arith.constant 0 : index
    %539 = vector.load %arg35[%c0_185, %c0_186] : memref<1x1xf32, #tpu.memory_space<vmem>>, vector<1x1xf32>
    %cst_187 = arith.constant dense<0.000000e+00> : vector<4x8xf32>
    %540 = tpu.matmul %533, %535, %cst_187 {dimension_numbers = #tpu.dot_dimension_numbers<[1], [0], [0], [1], [0, 0, 1, 1], [], []>} : vector<4x8xf32>, vector<8x8xf32>, vector<4x8xf32> -> vector<4x8xf32>
    %cst_188 = arith.constant dense<0.000000e+00> : vector<4x8xf32>
    %541 = tpu.matmul %533, %536, %cst_188 {dimension_numbers = #tpu.dot_dimension_numbers<[1], [0], [0], [1], [0, 0, 1, 1], [], []>} : vector<4x8xf32>, vector<8x8xf32>, vector<4x8xf32> -> vector<4x8xf32>
    %cst_189 = arith.constant dense<0.000000e+00> : vector<4x1xf32>
    %542 = tpu.matmul %540, %537, %cst_189 {dimension_numbers = #tpu.dot_dimension_numbers<[1], [0], [0], [1], [0, 0, 1, 1], [], []>} : vector<4x8xf32>, vector<8x1xf32>, vector<4x1xf32> -> vector<4x1xf32>
    %cst_190 = arith.constant dense<0.000000e+00> : vector<4x1xf32>
    %543 = tpu.matmul %541, %538, %cst_190 {dimension_numbers = #tpu.dot_dimension_numbers<[1], [0], [0], [1], [0, 0, 1, 1], [], []>} : vector<4x8xf32>, vector<8x1xf32>, vector<4x1xf32> -> vector<4x1xf32>
    %cst_191 = arith.constant dense<0.000000e+00> : vector<4x4xf32>
    %544 = tpu.matmul %543, %534, %cst_191 {dimension_numbers = #tpu.dot_dimension_numbers<[1], [0], [0], [1], [0, 0, 1, 1], [], []>} : vector<4x1xf32>, vector<1x4xf32>, vector<4x4xf32> -> vector<4x4xf32>
    %545 = tpu.transpose %544, [1, 0] : vector<4x4xf32> -> vector<4x4xf32>
    %546 = vector.broadcast %542 : vector<4x1xf32> to vector<4x4xf32>
    %547 = arith.addf %546, %545 : vector<4x4xf32>
    %548 = vector.broadcast %539 : vector<1x1xf32> to vector<4x4xf32>
    %549 = arith.addf %547, %548 : vector<4x4xf32>
    %550 = arith.negf %549 : vector<4x4xf32>
    %551 = math.exp %550 : vector<4x4xf32>
    %cst_192 = arith.constant 1.000000e+00 : f32
    %552 = vector.broadcast %cst_192 : f32 to vector<4x4xf32>
    %553 = arith.addf %552, %551 : vector<4x4xf32>
    %554 = arith.divf %552, %553 : vector<4x4xf32>
    %c0_193 = arith.constant 0 : index
    %c0_194 = arith.constant 0 : index
    %555 = vector.load %arg38[%c0_193, %c0_194] : memref<4x4xf32, #tpu.memory_space<vmem>>, vector<4x4xf32>
    tpu.vector_store %arg38[%c0_193, %c0_194], %554 {strides = array<i32>} : memref<4x4xf32, #tpu.memory_space<vmem>>, vector<4x4xf32>,
    return
  }
}

</mosaic_0001>

<bundles_post_ra>
// kernel: tpu_custom_call.1
= control target key start
LH: loop header
LB: loop body
LE: loop exit
PB: predicated region body
PF: predicated region fallthrough
CT: control target
= control target key end

     0   :  { %s5346_s6 = smov 1   ;;  %s5347_s10 = smov 2   ;;  %s6102_s0 = inlined_call_operand.smem [shape: u32[39], index: -1, kind: input, shape index: {}] }
   0x1   :  { %s5411_s5 = sld [smem:[%s6102_s0]]   ;;  %s5348_s14 = smov 3  }
   0x2   :  { %s5416_s9 = sld [smem:[%s6102_s0 + %s5346_s6]]   ;;  %s5349_s18 = smov 4  }
   0x3   :  { %s5421_s13 = sld [smem:[%s6102_s0 + %s5347_s10]]   ;;  %s5350_s22 = smov 5  }
   0x4   :  { %s5426_s17 = sld [smem:[%s6102_s0 + %s5348_s14]]   ;;  %s5351_s26 = smov 6  }
   0x5   :  { %s5431_s21 = sld [smem:[%s6102_s0 + %s5349_s18]]   ;;  %s5352_s30 = smov 7  }
   0x6   :  { %s5436_s25 = sld [smem:[%s6102_s0 + %s5350_s22]]   ;;  %s5353_s4 = smov 8  }
   0x7   :  { %s5441_s29 = sld [smem:[%s6102_s0 + %s5351_s26]]   ;;  %s5354_s10 = smov 9  }
   0x8   :  { %6115 = sst [smem:[#allocation10_spill]] %s5416_s9  ;;  %s5355_s15 = smov 10  }
   0x9   :  { %s5446_s3 = sld [smem:[%s6102_s0 + %s5352_s30]]   ;;  %s5356_s20 = smov 11  }
   0xa   :  { %s5451_s8 = sld [smem:[%s6102_s0 + %s5353_s4]]   ;;  %s5357_s26 = smov 12  }
   0xb   :  { %s5456_s14 = sld [smem:[%s6102_s0 + %s5354_s10]]   ;;  %s5358_s1 = smov 13  }
   0xc   :  { %s5461_s19 = sld [smem:[%s6102_s0 + %s5355_s15]]   ;;  %s5359_s7 = smov 14  }
   0xd   :  { %6116 = sst [smem:[#allocation11_spill]] %s5441_s29  ;;  %s5360_s15 = smov 15  }
   0xe   :  { %s5466_s24 = sld [smem:[%s6102_s0 + %s5356_s20]]   ;;  %s5361_s22 = smov 16  }
   0xf   :  { %s5471_s30 = sld [smem:[%s6102_s0 + %s5357_s26]]   ;;  %s5362_s28 = smov 17  }
  0x10   :  { %s5476_s6 = sld [smem:[%s6102_s0 + %s5358_s1]]   ;;  %s5381_s23 = smov 36  }
  0x11   :  { %s5481_s12 = sld [smem:[%s6102_s0 + %s5359_s7]]   ;;  %s5363_s7 = smov 18  }
  0x12   :  { %s5486_s20 = sld [smem:[%s6102_s0 + %s5360_s15]]   ;;  %s5364_s15 = smov 19  }
  0x13   :  { %s5491_s27 = sld [smem:[%s6102_s0 + %s5361_s22]]   ;;  %s5365_s22 = smov 20  }
  0x14   :  { %s5496_s4 = sld [smem:[%s6102_s0 + %s5362_s28]]   ;;  %s5366_s28 = smov 21  }
  0x15   :  { %s5501_s9 = sld [smem:[%s6102_s0 + %s5363_s7]]   ;;  %s5367_s7 = smov 22  }
  0x16   :  { %s5506_s29 = sld [smem:[%s6102_s0 + %s5364_s15]]   ;;  %s5368_s15 = smov 23  }
  0x17   :  { %s5382_s1 = smov 37   ;;  %s5383_s10 = smov 38  }
  0x19   :  { %6117 = sst [smem:[#allocation12_spill]] %s5491_s27 }
  0x1a   :  { %6118 = sst [smem:[#allocation13_spill]] %s5496_s4 }
  0x1b   :  { %6119 = sst [smem:[#allocation14_spill]] %s5501_s9 }
  0x1c   :  { %6120 = sst [smem:[#allocation15_spill]] %s5506_s29 }
  0x1d   :  { %s5511_s27 = sld [smem:[%s6102_s0 + %s5365_s22]]   ;;  %s5369_s22 = smov 24  }
  0x1e   :  { %s5516_s4 = sld [smem:[%s6102_s0 + %s5366_s28]]   ;;  %s5370_s28 = smov 25  }
  0x1f   :  { %s5521_s9 = sld [smem:[%s6102_s0 + %s5367_s7]]   ;;  %s5371_s7 = smov 26  }
  0x20   :  { %s5526_s29 = sld [smem:[%s6102_s0 + %s5368_s15]]   ;;  %s5372_s15 = smov 27  }
  0x23   :  { %6121 = sst [smem:[#allocation16_spill]] %s5511_s27 }
  0x24   :  { %6122 = sst [smem:[#allocation17_spill]] %s5516_s4 }
  0x25   :  { %6123 = sst [smem:[#allocation18_spill]] %s5521_s9 }
  0x26   :  { %6124 = sst [smem:[#allocation19_spill]] %s5526_s29 }
  0x27   :  { %s5531_s27 = sld [smem:[%s6102_s0 + %s5369_s22]]   ;;  %s5373_s22 = smov 28  }
  0x28   :  { %s5536_s4 = sld [smem:[%s6102_s0 + %s5370_s28]]   ;;  %s5374_s28 = smov 29  }
  0x29   :  { %s5541_s9 = sld [smem:[%s6102_s0 + %s5371_s7]]   ;;  %s5375_s7 = smov 30  }
  0x2a   :  { %s5546_s29 = sld [smem:[%s6102_s0 + %s5372_s15]]   ;;  %s5376_s15 = smov 31  }
  0x2d   :  { %6125 = sst [smem:[#allocation20_spill]] %s5531_s27 }
  0x2e   :  { %6126 = sst [smem:[#allocation21_spill]] %s5536_s4 }
  0x2f   :  { %6127 = sst [smem:[#allocation22_spill]] %s5541_s9 }
  0x30   :  { %6128 = sst [smem:[#allocation23_spill]] %s5546_s29 }
  0x31   :  { %s5551_s27 = sld [smem:[%s6102_s0 + %s5373_s22]]   ;;  %s5377_s22 = smov 32  }
  0x32   :  { %s5556_s4 = sld [smem:[%s6102_s0 + %s5374_s28]]   ;;  %s5378_s28 = smov 33  }
  0x33   :  { %s5561_s9 = sld [smem:[%s6102_s0 + %s5375_s7]]   ;;  %s5379_s7 = smov 34  }
  0x34   :  { %s5566_s29 = sld [smem:[%s6102_s0 + %s5376_s15]]   ;;  %s5380_s15 = smov 35  }
  0x37   :  { %6129 = sst [smem:[#allocation24_spill]] %s5551_s27 }
  0x38   :  { %6130 = sst [smem:[#allocation25_spill]] %s5556_s4 }
  0x39   :  { %6131 = sst [smem:[#allocation26_spill]] %s5561_s9 }
  0x3a   :  { %6132 = sst [smem:[#allocation27_spill]] %s5566_s29 }
  0x3b   :  { %s5571_s27 = sld [smem:[%s6102_s0 + %s5377_s22]]  }
  0x3c   :  { %s5576_s4 = sld [smem:[%s6102_s0 + %s5378_s28]]  }
  0x3d   :  { %s5581_s9 = sld [smem:[%s6102_s0 + %s5379_s7]]  }
  0x3e   :  { %s4313_s29 = sld [smem:[%s6102_s0 + %s5380_s15]]  }
  0x41   :  { %6133 = sst [smem:[#allocation28_spill]] %s5571_s27 }
  0x42   :  { %6134 = sst [smem:[#allocation29_spill]] %s5576_s4 }
  0x43   :  { %6135 = sst [smem:[#allocation30_spill]] %s5581_s9 }
  0x44   :  { %s5589_s27 = sld [smem:[%s6102_s0 + %s5381_s23]]   ;;  %v83_v0 = vstv %s4313_s29 }
  0x45   :  { %s5594_s4 = sld [smem:[%s6102_s0 + %s5382_s1]]   ;;  %84 = vst [vmem:[#allocation2] sm:$0x1] %v83_v0 }
  0x46   :  { %s5599_s9 = sld [smem:[%s6102_s0 + %s5383_s10]]  }
  0x47   :  { %85 = vsyncpa [#allocation4], 0  ;;  %v172_v1 = vld [vmem:[%s5471_s30] sm:$0xff]  ;;  %vm200_vm0 = vcmask 64512   ;;  %v5384_v3 = vmov 0.0   ;;  %vm5385_vm1 = vmmov 0  }
  0x48   :  { %v5603_v2 = vld [vmem:[%s5436_s25] sm:$0xf]  ;;  %4549 = vmatprep.subr.mxu1 %v5384_v3  ;;  %4551 = vmatprep.mubr.msk.f32.mxu1 %vm5385_vm1, %v5384_v3 }
  0x49   :  { %v168_v4 = vld [vmem:[%s5451_s8] sm:$0xff]  ;;  %4550 = vmatpush3.msra.mxu1 %v172_v1  ;;  %4544 = vmatprep.subr.mxu0 %v5384_v3 }
  0x4a   :  { %v163_v5 = vld [vmem:[%s5426_s17] sm:$0xf]  ;;  %4552 = vmatmul.mubr.msk.f32.vlgmr.msra.gmra.mrb[0].mxu1 %vm200_vm0, %v5603_v2  ;;  %4545 = vmatpush3.msra.mxu0 %v168_v4 }
  0x4b   :  { %v164_v6 = vld [vmem:[%s5431_s21] sm:$0xf] }
  0x4c   :  { %86 = vsyncpa [#allocation6], 0  ;;  %4546 = vmatprep.mubr.msk.f32.mxu0 %vm5385_vm1, %v5384_v3  ;;  %v5386_v7 = vmov 0   ;;  %v162_v8 = vld [vmem:[%s5421_s13] sm:$0xf]  ;;  %s5387_s0 = smov 112  }
  0x4d   :  { %5040 = vset.pattern.permute.xlu0 %v5386_v7  ;;  %4547 = vmatmul.mubr.msk.f32.vlgmr.msra.gmra.mrb[0].mxu0 %vm200_vm0, %v163_v5  ;;  %v4324_v9 = vld [vmem:[%s5481_s12] ss:$0 sm:$0xff]  ;;  %s5388_s13 = smov 16   ;;  %s5389_s17 = smov 8   ;;  %v456_v46 = vld [vmem:[%s5486_s20 + $0x8] sm:$0x7] }
  0x4e   :  { %305 = vperm.xlu0 %5040, %v164_v6   ;;  %v4319_v11 = vld [vmem:[%s5461_s19] ss:$0 sm:$0xff]  ;;  %s6136_s21 = sld [smem:[#allocation12_spill]]  ;;  %vm473_vm2 = vcmask 1042432   ;;  %s6137_s25 = sld [smem:[#allocation13_spill]]  ;;  %vm5390_vm3 = vmmov 1  }
  0x4f   :  { %v4322_v18 = vld [vmem:[%s5466_s24] ss:$0 sm:$0xff]  ;;  %vm4820_vm4 = vmpackc.low %vm473_vm2, %vm5390_vm3  ;;  %s5391_s29 = smov 120   ;;  %vm466_vm5 = vcmask 89088   ;;  %vm443_vm6 = vcmask 1043456   ;;  %vm449_vm7 = vcmask 23552  }
  0x50   :  { %v4323_v20 = vld [vmem:[%s5476_s6] ss:$0 sm:$0xff]  ;;  %vm552_vm8 = vcmask 261120   ;;  %s6139_s8 = sld [smem:[#allocation10_spill]]  ;;  %vm765_vm13 = vcmask 130048   ;;  %s6140_s19 = sld [smem:[#allocation15_spill]] }
  0x51   :  { %v4317_v21 = vld [vmem:[%s5446_s3] ss:$0 sm:$0xff]  ;;  %s5392_s3 = smov 123   ;;  %s6141_s24 = sld [smem:[#allocation16_spill]] }
  0x52   :  { %177 = vperm.xlu0 %5040, %v162_v8   ;;  %v4318_v25 = vld [vmem:[%s5456_s14] ss:$0 sm:$0xff]  ;;  %s5397_s14 = smov 104   ;;  %s6142_s30 = sld [smem:[#allocation17_spill]] }
  0x53   :  { %v455_v45 = vld [vmem:[%s5486_s20] sm:$0xff]  ;;  %s6143_s6 = sld [smem:[#allocation14_spill]]  ;;  %s5398_s12 = smov 24  }
  0x54   :  { %v4819_v47 = vpack.c.bf16 %v456_v46, %v455_v45  ;;  %v159_v51 = vld [vmem:[%s5411_s5] sm:$0xff]  ;;  %v458_v53 = vld [vmem:[%s6136_s21 + $0x8] sm:$0xff]  ;;  %v459_v58 = vld [vmem:[%s6136_s21 + $0x10] sm:$0xff]  ;;  %s6138_s5 = sld [smem:[#allocation11_spill]]  ;;  %s6145_s15 = sld [smem:[#allocation20_spill]] }
  0x55   :  { %4558 = vmatprep.mubr.msk.f32.mxu0 %vm466_vm5, %v159_v51  ;;  %v457_v52 = vld [vmem:[%s6136_s21] sm:$0xff]  ;;  %v462_v57 = vld [vmem:[%s6137_s25 + $0x8] sm:$0xff]  ;;  %v460_v59 = vld [vmem:[%s6136_s21 + $0x18] sm:$0xff]  ;;  %s6144_s20 = sld [smem:[#allocation19_spill]]  ;;  %s6146_s16 = sld [smem:[#allocation21_spill]] }
  0x56   :  { %4821 = vmatprep.subr.msk.bf16.mxu0 %vm4820_vm4, %v4819_v47  ;;  %v461_v54 = vld [vmem:[%s6137_s25] sm:$0xff]  ;;  %v4825_v56 = vpack.c.bf16 %v458_v53, %v457_v52  ;;  %v4829_v62 = vpack.c.bf16 %v460_v59, %v459_v58  ;;  %v5396_v52 = vmov -1e+09   ;;  %s6147_s18 = sld [smem:[#allocation18_spill]]  ;;  %s6148_s23 = sld [smem:[#allocation23_spill]] }
  0x57   :  { %4824 = vmatpush3.bf16.msk.msra.mxu0 %vm4820_vm4, %v4819_v47  ;;  %v4833_v61 = vpack.c.bf16 %v462_v57, %v461_v54  ;;  %s6149_s22 = sld [smem:[#allocation24_spill]]  ;;  %s6150_s26 = sld [smem:[#allocation25_spill]] }
  0x58   :  { %4826 = vmatprep.subr.bf16.mxu1 %v4825_v56  ;;  %s6151_s1 = sld [smem:[#allocation22_spill]]  ;;  %s6152_s28 = sld [smem:[#allocation27_spill]] }
  0x59   :  { %4834 = vmatprep.subr.bf16.mxu0 %v4833_v61  ;;  %4828 = vmatpush3.bf16.msra.mxu1 %v4825_v56  ;;  %s6153_s2 = sld [smem:[#allocation26_spill]]  ;;  %s6154_s10 = sld [smem:[#allocation28_spill]] }
  0x5a   :  { %4830 = vmatprep.subr.bf16.mxu1 %v4829_v62  ;;  %s6155_s7 = sld [smem:[#allocation29_spill]]  ;;  %s6156_s11 = sld [smem:[#allocation30_spill]] }
  0x5d   :  { %4832 = vmatpush3.bf16.msra.mxu1 %v4829_v62 }
  0xcd   :  { %v306_v17 = vpop.permute.xlu0 %305 }
  0xce   :  { %v314_v19 = vmul.f32 %v4322_v18, %v306_v17  ;;  %v5393_v18 = vmov 2  }
  0xcf   :  { %5042 = vset.pattern.permute.xlu1 %v5393_v18 }
  0xd0   :  { %v321_v23 = vadd.f32 %v4323_v20, %v314_v19 }
  0xd1   :  { %v178_v22 = vpop.permute.xlu0 %177 }
  0xd2   :  { %v186_v24 = vmul.f32 %v4317_v21, %v178_v22 }
  0xd4   :  { %v193_v27 = vadd.f32 %v4318_v25, %v186_v24 }
 0x11d   :  { %v397_v10 = vpop.f32.mrb[0].mxu1 }
 0x11e   :  { %v398_v12 = vadd.f32 %v4324_v9, %v397_v10  ;;  %v4553_v13 = vpop.f32.mrb[1].mxu1 }
 0x11f   :  { %v464_v13 = vld [vmem:[%s6137_s25 + $0x18] sm:$0xff] }
 0x120   :  { %v270_v14 = vpop.f32.mrb[0].mxu0  ;;  %409 = vrot.lane.b32.xlu1 %v398_v12, %s5387_s0  ;;  %v401_v26 = vadd.f32 %v398_v12, %v321_v23  ;;  %v463_v12 = vld [vmem:[%s6137_s25 + $0x10] sm:$0xff] }
 0x121   :  { %v271_v15 = vadd.f32 %v4319_v11, %v270_v14  ;;  %v4548_v16 = vpop.f32.mrb[1].mxu0  ;;  %v166_v14 = vld [vmem:[%s6138_s5] sm:$0xff] }
 0x122   :  { %v4326_v28 = vmul.f32 -1.442695, %v401_v26  ;;  %v4837_v16 = vpack.c.bf16 %v464_v13, %v463_v12 }
 0x123   :  { %v274_v29 = vadd.f32 %v271_v15, %v193_v27 }
 0x124   :  { %282 = vrot.lane.b32.xlu1 %v271_v15, %s5387_s0  ;;  %5132 = vpow2.f32 %v4326_v28  ;;  %v5395_v28 = vmov 3  }
 0x125   :  { %v4321_v30 = vmul.f32 -1.442695, %v274_v29 }
 0x127   :  { %5134 = vpow2.f32 %v4321_v30 }
 0x12e   :  { %v5133_v31 = vpop.eup %5132 }
 0x12f   :  { %v405_v32 = vadd.f32 1.0, %v5133_v31 }
 0x131   :  { %v5135_v33 = vpop.eup %5134  ;;  %5136 = vrcp.f32 %v405_v32  ;;  %v751_v32 = vlaneseq }
 0x132   :  { %v278_v34 = vadd.f32 1.0, %v5135_v33 }
 0x134   :  { %5138 = vrcp.f32 %v278_v34  ;;  %v752_v34 = vshrl.u32 %v751_v32, 7 }
 0x13b   :  { %v5137_v35 = vpop.eup %5136 }
 0x13c   :  { %v419_v55 = vsub.f32 1.0, %v5137_v35 }
 0x13e   :  { %v5139_v38 = vpop.eup %5138 }
 0x13f   :  { %v292_v4 = vsub.f32 1.0, %v5139_v38 }
 0x192   :  { %v410_v36 = vpop.permute.xlu1 %409 }
 0x193   :  { %v412_v37 = vmul.f32 %v5137_v35, %v410_v36 }
 0x195   :  { %414 = vrot.lane.b32.xlu0 %v412_v37, %s5388_s13  ;;  %v5669_v37 = vsub.s32 0, %v752_v34 }
 0x196   :  { %v283_v39 = vpop.permute.xlu1 %282 }
 0x197   :  { %v285_v40 = vmul.f32 %v5139_v38, %v283_v39  ;;  %v5673_v39 = vsub.s32 2, %v752_v34 }
 0x199   :  { %287 = vrot.lane.b32.xlu1 %v285_v40, %s5388_s13  ;;  %v161_v40 = vld [vmem:[%s6139_s8 + $0x8] sm:$0xff] }
 0x19a   :  { %vm452_vm9 = vcmp.gt.f32.partialorder %v161_v40, 0.0 }
 0x19b   :  { %v5682_v53 = vsel %vm452_vm9, 0.0, %v5396_v52 }
 0x19d   :  { %425 = vrot.lane.b32.xlu1 %v5603_v2, %s5389_s17 }
 0x1a1   :  { %298 = vrot.lane.b32.xlu1 %v163_v5, %s5389_s17 }
 0x207   :  { %v415_v41 = vpop.permute.xlu0 %414 }
 0x208   :  { %v417_v42 = vadd.f32 %v415_v41, %v321_v23 }
 0x20a   :  { %5140 = vtanh.f32 %v417_v42  ;;  %v160_v42 = vld [vmem:[%s6139_s8] sm:$0xff] }
 0x20b   :  { %v288_v43 = vpop.permute.xlu1 %287  ;;  %vm451_vm10 = vcmp.gt.f32.partialorder %v160_v42, 0.0 }
 0x20c   :  { %v290_v44 = vadd.f32 %v288_v43, %v193_v27  ;;  %v5394_v27 = vmov 1   ;;  %v5684_v56 = vsel %vm451_vm10, 0.0, %v5396_v52 }
 0x20e   :  { %5142 = vtanh.f32 %v290_v44 }
 0x20f   :  { %v426_v50 = vpop.permute.xlu1 %425 }
 0x210   :  { %v428_v63 = vmul.f32 %v5137_v35, %v426_v50  ;;  %v5680_v50 = vsub.s32 3, %v752_v34 }
 0x213   :  { %v299_v1 = vpop.permute.xlu1 %298 }
 0x214   :  { %v5141_v48 = vpop.eup %5140  ;;  %v301_v6 = vmul.f32 %v5139_v38, %v299_v1  ;;  %v5671_v38 = vsub.s32 1, %v752_v34 }
 0x215   :  { %421 = vrot.lane.b32.xlu0 %v5141_v48, %s5391_s29 }
 0x218   :  { %v5143_v49 = vpop.eup %5142 }
 0x219   :  { %294 = vrot.lane.b32.xlu0 %v5143_v49, %s5391_s29 }
 0x287   :  { %v422_v60 = vpop.permute.xlu0 %421 }
 0x288   :  { %v424_v0 = vmul.f32 %v422_v60, %v419_v55 }
 0x28a   :  { %v5644_v2 = vadd.f32 %v428_v63, %v424_v0 }
 0x28b   :  { %v295_v5 = vpop.permute.xlu0 %294 }
 0x28c   :  { %v297_v8 = vmul.f32 %v295_v5, %v292_v4  ;;  %v441_v9 = vrot.slane %v5644_v2, 4 }
 0x28e   :  { %v5647_v10 = vadd.f32 %v301_v6, %v297_v8 }
 0x290   :  { %v444_v11 = vsel %vm443_vm6, %v5647_v10, %v441_v9  ;;  %vm1290_vm6 = vcmask 195584  }
 0x291   :  { %446 = vrot.lane.b32.xlu0 %v444_v11, %s5392_s3 }
 0x303   :  { %v447_v15 = vpop.permute.xlu0 %446 }
 0x304   :  { %v450_v17 = vsel %vm449_vm7, %v166_v14, %v447_v15 }
 0x305   :  { %4559 = vmatmul.mubr.msk.f32.vlgmr.msra.gmra.mrb[2].mxu0 %vm466_vm5, %v450_v17 }
 0x306   :  { %4836 = vmatpush3.bf16.msra.mxu0 %v4833_v61 }
 0x307   :  { %4838 = vmatprep.subr.bf16.mxu0 %v4837_v16 }
 0x30a   :  { %4840 = vmatpush3.bf16.msra.mxu0 %v4837_v16 }
 0x3d8   :  { %v4560_v19 = vpop.f32.mrb[2].mxu0 }
 0x3d9   :  { %v543_v20 = vpop.f32.mrb[3].mxu0 }
 0x3da   :  { %4569 = vmatprep.mubr.msk.f32.mxu1 %vm552_vm8, %v543_v20  ;;  %4580 = vmatprep.mubr.msk.f32.mxu0 %vm552_vm8, %v543_v20  ;;  %v4841_v21 = vpack.c.bf16 %v4560_v19, %v543_v20  ;;  %v5657_v22 = vpack.i.bf16 %v4560_v19, %v543_v20 }
 0x3db   :  { %4570 = vmatmul.mubr.msk.f32.vlgmr.msra.gmra.mrb[2].mxu1 %vm552_vm8, %v4560_v19  ;;  %4581 = vmatmul.mubr.msk.f32.vlgmr.msra.gmra.mrb[4].mxu0 %vm552_vm8, %v4560_v19 }
 0x3dc   :  { %4842 = vmatprep.subr.bf16.mxu1 %v4841_v21 }
 0x3dd   :  { %4844 = vmatpush3.bf16.msra.mxu1 %v4841_v21 }
 0x4ae   :  { %v4571_v23 = vpop.f32.mrb[2].mxu1  ;;  %v4582_v24 = vpop.f32.mrb[4].mxu0 }
 0x4af   :  { %1005 = vperm.xlu1 %5042, %v4582_v24   ;;  %748 = vperm.xlu0 %5040, %v4582_v24   ;;  %v625_v25 = vpop.f32.mrb[3].mxu1  ;;  %v700_v26 = vpop.f32.mrb[5].mxu0 }
 0x4b3   :  { %5043 = vset.pattern.permute.xlu1 %v5386_v7  ;;  %5041 = vset.pattern.permute.xlu0 %v5394_v27 }
 0x4b4   :  { %874 = vperm.xlu0 %5041, %v4582_v24   ;;  %743 = vperm.xlu1 %5043, %v700_v26  }
 0x4b8   :  { %5046 = vset.pattern.permute.xlu0 %v5395_v28  ;;  %5044 = vset.pattern.permute.xlu1 %v5394_v27 }
 0x4b9   :  { %1132 = vperm.xlu0 %5046, %v700_v26   ;;  %870 = vperm.xlu1 %5044, %v700_v26  }
 0x4bd   :  { %5045 = vset.pattern.permute.xlu1 %v5393_v18  ;;  %5064 = vset.pattern.permute.xlu0 %v5394_v27 }
 0x4be   :  { %1001 = vperm.xlu1 %5045, %v700_v26  }
 0x4c2   :  { %5047 = vset.pattern.permute.xlu1 %v5395_v28 }
 0x4c3   :  { %1136 = vperm.xlu1 %5047, %v4582_v24  }
 0x4ec   :  { %709 = vxpose.xlu1.b32.start [1/2] (short) (narrow) %v625_v25, 8 }
 0x4f0   :  { %710 = vxpose.xlu1.b32.end [2/2] (short) (narrow) %v4571_v23, 8 }
 0x50e   :  { %5063 = vset.pattern.permute.xlu1 %v5386_v7 }
 0x52e   :  { %v1006_v29 = vpop.permute.xlu1 %1005  ;;  %v749_v35 = vpop.permute.xlu0 %748 }
 0x533   :  { %v744_v30 = vpop.permute.xlu1 %743  ;;  %v875_v46 = vpop.permute.xlu0 %874 }
 0x538   :  { %v871_v31 = vpop.permute.xlu1 %870  ;;  %v1133_v12 = vpop.permute.xlu0 %1132 }
 0x53d   :  { %v1002_v33 = vpop.permute.xlu1 %1001 }
 0x542   :  { %v1137_v36 = vpop.permute.xlu1 %1136 }
 0x56c   :  { %v725_v41 = vpop.trf.xlu1 }
 0x56d   :  { %v754_v43 = vrot.slane %v725_v41, %v5669_v37  ;;  %v880_v44 = vrot.slane %v725_v41, %v5671_v38  ;;  %v1011_v45 = vrot.slane %v725_v41, %v5673_v39  ;;  %v1142_v1 = vrot.slane %v725_v41, %v5680_v50 }
 0x56f   :  { %v755_v47 = vadd.f32 %v754_v43, %v744_v30  ;;  %v756_v48 = vadd.f32 %v754_v43, %v749_v35  ;;  %v882_v49 = vadd.f32 %v880_v44, %v875_v46  ;;  %v1012_v51 = vadd.f32 %v1011_v45, %v1002_v33 }
 0x570   :  { %v881_v58 = vadd.f32 %v880_v44, %v871_v31  ;;  %v1013_v6 = vadd.f32 %v1011_v45, %v1006_v29  ;;  %v1143_v15 = vadd.f32 %v1142_v1, %v1133_v12  ;;  %v1144_v21 = vadd.f32 %v1142_v1, %v1137_v36 }
 0x571   :  { %vm758_vm11 = vcmp.ge.f32.partialorder %v756_v48, 0.0  ;;  %v760_v54 = vmul.f32 0.2, %v756_v48  ;;  %vm884_vm12 = vcmp.ge.f32.partialorder %v882_v49, 0.0  ;;  %v886_v55 = vmul.f32 0.2, %v882_v49 }
 0x572   :  { %vm1014_vm14 = vcmp.ge.f32.partialorder %v1012_v51, 0.0  ;;  %v1016_v57 = vmul.f32 0.2, %v1012_v51  ;;  %v759_v61 = vmul.f32 0.2, %v755_v47  ;;  %vm757_vm15 = vcmp.ge.f32.partialorder %v755_v47, 0.0 }
 0x573   :  { %v762_v59 = vsel %vm758_vm11, %v756_v48, %v760_v54  ;;  %v888_v60 = vsel %vm884_vm12, %v882_v49, %v886_v55  ;;  %v885_v11 = vmul.f32 0.2, %v881_v58  ;;  %vm883_vm2 = vcmp.ge.f32.partialorder %v881_v58, 0.0 }
 0x574   :  { %v1018_v62 = vsel %vm1014_vm14, %v1012_v51, %v1016_v57  ;;  %v764_v63 = vadd.f32 %v762_v59, %v5682_v53  ;;  %v890_v5 = vadd.f32 %v888_v60, %v5682_v53  ;;  %v761_v9 = vsel %vm757_vm15, %v755_v47, %v759_v61 }
 0x575   :  { %v5688_v0 = vadd.f32 %v1018_v62, %v5684_v56  ;;  %v763_v14 = vadd.f32 %v761_v9, %v5684_v56  ;;  %v887_v16 = vsel %vm883_vm2, %v881_v58, %v885_v11  ;;  %v1017_v17 = vmul.f32 0.2, %v1013_v6 }
 0x576   :  { %v769_v4 = vsel %vm765_vm13, %v764_v63, -inf  ;;  %v894_v13 = vsel %vm765_vm13, %v890_v5, -inf  ;;  %vm1015_vm3 = vcmp.ge.f32.partialorder %v1013_v6, 0.0  ;;  %v889_v20 = vadd.f32 %v887_v16, %v5684_v56 }
 0x577   :  { %v1022_v8 = vsel %vm765_vm13, %v5688_v0, -inf  ;;  %770 = vmax.xlane.f32.xlu0 %v769_v4  ;;  %v766_v19 = vsel %vm765_vm13, %v763_v14, -inf  ;;  %v1019_v23 = vsel %vm1015_vm3, %v1013_v6, %v1017_v17  ;;  %v1147_v24 = vmul.f32 0.2, %v1143_v15 }
 0x578   :  { %1023 = vmax.xlane.f32.xlu1 %v1022_v8  ;;  %vm1145_vm4 = vcmp.ge.f32.partialorder %v1143_v15, 0.0  ;;  %v891_v25 = vsel %vm765_vm13, %v889_v20, -inf  ;;  %v1021_v26 = vadd.f32 %v1019_v23, %v5682_v53  ;;  %v1148_v30 = vmul.f32 0.2, %v1144_v21 }
 0x579   :  { %v1149_v29 = vsel %vm1145_vm4, %v1143_v15, %v1147_v24  ;;  %vm1146_vm5 = vcmp.ge.f32.partialorder %v1144_v21, 0.0 }
 0x57a   :  { %v1025_v31 = vsel %vm765_vm13, %v1021_v26, -inf  ;;  %v1151_v32 = vadd.f32 %v1149_v29, %v5684_v56  ;;  %v1150_v33 = vsel %vm1146_vm5, %v1144_v21, %v1148_v30 }
 0x57b   :  { %895 = vmax.xlane.f32.xlu0 %v894_v13  ;;  %v1152_v35 = vadd.f32 %v1150_v33, %v5682_v53 }
 0x57c   :  { %v1153_v34 = vsel %vm765_vm13, %v1151_v32, -inf }
 0x57d   :  { %v1156_v36 = vsel %vm765_vm13, %v1152_v35, -inf }
 0x57f   :  { %767 = vmax.xlane.f32.xlu0 %v766_v19 }
 0x583   :  { %892 = vmax.xlane.f32.xlu0 %v891_v25 }
 0x587   :  { %1026 = vmax.xlane.f32.xlu0 %v1025_v31 }
 0x58b   :  { %1154 = vmax.xlane.f32.xlu0 %v1153_v34 }
 0x58f   :  { %1157 = vmax.xlane.f32.xlu0 %v1156_v36 }
 0x604   :  { %v771_v40 = vpop.xlane.xlu0 %770 }
 0x605   :  { %v773_v41 = vsub.f32 %v764_v63, %v771_v40  ;;  %v1024_v60 = vpop.xlane.xlu1 %1023 }
 0x606   :  { %v1028_v63 = vsub.f32 %v5688_v0, %v1024_v60 }
 0x607   :  { %v776_v42 = vmul.f32 1.442695, %v773_v41 }
 0x608   :  { %v896_v43 = vpop.xlane.xlu0 %895  ;;  %v1030_v6 = vmul.f32 1.442695, %v1028_v63 }
 0x609   :  { %5144 = vpow2.f32 %v776_v42  ;;  %v898_v44 = vsub.f32 %v890_v5, %v896_v43 }
 0x60b   :  { %v901_v45 = vmul.f32 1.442695, %v898_v44 }
 0x60c   :  { %v768_v46 = vpop.xlane.xlu0 %767 }
 0x60d   :  { %5146 = vpow2.f32 %v901_v45  ;;  %v772_v49 = vsub.f32 %v763_v14, %v768_v46 }
 0x60f   :  { %v774_v57 = vmul.f32 1.442695, %v772_v49 }
 0x610   :  { %v893_v47 = vpop.xlane.xlu0 %892 }
 0x611   :  { %v897_v58 = vsub.f32 %v889_v20, %v893_v47 }
 0x613   :  { %v5706_v48 = vpop.eup %5144  ;;  %v899_v1 = vmul.f32 1.442695, %v897_v58 }
 0x614   :  { %v1027_v51 = vpop.xlane.xlu0 %1026  ;;  %v781_v52 = vsel %vm765_vm13, %v5706_v48, 0.0 }
 0x615   :  { %v1029_v54 = vsub.f32 %v1021_v26, %v1027_v51  ;;  %782 = vadd.xlane.f32.xlu0 %v781_v52 }
 0x617   :  { %v5710_v55 = vpop.eup %5146  ;;  %v1032_v59 = vmul.f32 1.442695, %v1029_v54 }
 0x618   :  { %v1155_v61 = vpop.xlane.xlu0 %1154  ;;  %v906_v62 = vsel %vm765_vm13, %v5710_v55, 0.0 }
 0x619   :  { %5148 = vpow2.f32 %v1032_v59  ;;  %907 = vadd.xlane.f32.xlu0 %v906_v62  ;;  %v1159_v8 = vsub.f32 %v1151_v32, %v1155_v61 }
 0x61a   :  { %5150 = vpow2.f32 %v774_v57 }
 0x61b   :  { %5152 = vpow2.f32 %v899_v1  ;;  %v1161_v12 = vmul.f32 1.442695, %v1159_v8 }
 0x61c   :  { %v1158_v4 = vpop.xlane.xlu0 %1157 }
 0x61d   :  { %v1160_v5 = vsub.f32 %v1152_v35, %v1158_v4 }
 0x61f   :  { %v1163_v9 = vmul.f32 1.442695, %v1160_v5 }
 0x621   :  { %5154 = vpow2.f32 %v1163_v9 }
 0x622   :  { %5156 = vpow2.f32 %v1030_v6 }
 0x623   :  { %v5715_v11 = vpop.eup %5148  ;;  %5158 = vpow2.f32 %v1161_v12 }
 0x624   :  { %v1037_v13 = vsel %vm765_vm13, %v5715_v11, 0.0  ;;  %v5151_v14 = vpop.eup %5150 }
 0x625   :  { %1038 = vadd.xlane.f32.xlu0 %v1037_v13  ;;  %v778_v0 = vsel %vm765_vm13, %v5151_v14, 0.0  ;;  %v5153_v15 = vpop.eup %5152 }
 0x626   :  { %v903_v17 = vsel %vm765_vm13, %v5153_v15, 0.0 }
 0x629   :  { %779 = vadd.xlane.f32.xlu0 %v778_v0 }
 0x62b   :  { %v5720_v16 = vpop.eup %5154 }
 0x62c   :  { %v1168_v19 = vsel %vm765_vm13, %v5720_v16, 0.0  ;;  %v5157_v20 = vpop.eup %5156 }
 0x62d   :  { %904 = vadd.xlane.f32.xlu0 %v903_v17  ;;  %1169 = vadd.xlane.f32.xlu1 %v1168_v19  ;;  %v1034_v21 = vsel %vm765_vm13, %v5157_v20, 0.0  ;;  %v5159_v23 = vpop.eup %5158  ;;  %v1309_v17 = vld [vmem:[%s6140_s19 + $0x10] sm:$0xff]  ;;  %v1310_v19 = vld [vmem:[%s6140_s19 + $0x18] sm:$0xff] }
 0x62e   :  { %v1165_v24 = vsel %vm765_vm13, %v5159_v23, 0.0 }
 0x631   :  { %1035 = vadd.xlane.f32.xlu0 %v1034_v21 }
 0x635   :  { %1166 = vadd.xlane.f32.xlu0 %v1165_v24  ;;  %v1312_v24 = vld [vmem:[%s6141_s24 + $0x8] sm:$0xff] }
 0x63e   :  { %5054 = vrot.lane.b32.xlu1 %v5657_v22, %s5387_s0 }
 0x642   :  { %5059 = vrot.lane.b32.xlu1 %v5657_v22, %s5397_s14 }
 0x64b   :  { %5049 = vrot.lane.b32.xlu0 %v5657_v22, %s5391_s29 }
 0x6a2   :  { %v783_v25 = vpop.xlane.xlu0 %782 }
 0x6a3   :  { %5160 = vrcp.f32 %v783_v25  ;;  %v1315_v25 = vld [vmem:[%s6142_s30] sm:$0xff] }
 0x6a6   :  { %v908_v26 = vpop.xlane.xlu0 %907 }
 0x6ad   :  { %v5161_v40 = vpop.eup %5160 }
 0x6ae   :  { %v787_v45 = vmul.f32 %v5161_v40, %v5706_v48 }
 0x6b2   :  { %v1039_v29 = vpop.xlane.xlu0 %1038 }
 0x6b6   :  { %v780_v30 = vpop.xlane.xlu0 %779 }
 0x6b7   :  { %5162 = vrcp.f32 %v780_v30  ;;  %v1316_v30 = vld [vmem:[%s6142_s30 + $0x8] sm:$0xff] }
 0x6ba   :  { %v1170_v31 = vpop.xlane.xlu1 %1169  ;;  %v905_v32 = vpop.xlane.xlu0 %904 }
 0x6bb   :  { %5164 = vrcp.f32 %v905_v32  ;;  %v1314_v32 = vld [vmem:[%s6141_s24 + $0x18] sm:$0xff] }
 0x6bc   :  { %5166 = vrcp.f32 %v1039_v29 }
 0x6be   :  { %v5055_v33 = vpop.permute.xlu1 %5054  ;;  %v1036_v34 = vpop.xlane.xlu0 %1035 }
 0x6bf   :  { %v5057_v35 = vunpack.i.h.bf16 %v5055_v33  ;;  %v5056_v36 = vunpack.i.l.bf16 %v5055_v33  ;;  %5168 = vrcp.f32 %v1036_v34  ;;  %v4873_v33 = vpack.c.bf16 %v1316_v30, %v1315_v25 }
 0x6c0   :  { %5170 = vrcp.f32 %v908_v26 }
 0x6c1   :  { %v5163_v41 = vpop.eup %5162  ;;  %v4849_v42 = vpack.c.bf16 %v5057_v35, %v5056_v36 }
 0x6c2   :  { %v1167_v22 = vpop.xlane.xlu0 %1166  ;;  %v786_v43 = vmul.f32 %v5163_v41, %v5151_v14  ;;  %v5060_v44 = vpop.permute.xlu1 %5059  ;;  %v1308_v14 = vld [vmem:[%s6140_s19 + $0x8] sm:$0xff] }
 0x6c3   :  { %5172 = vrcp.f32 %v1167_v22  ;;  %4850 = vmatprep.subr.bf16.mxu1 %v4849_v42  ;;  %v5062_v47 = vunpack.i.h.bf16 %v5060_v44  ;;  %v5061_v51 = vunpack.i.l.bf16 %v5060_v44  ;;  %v4342_v22 = vld [vmem:[%s6143_s6] ss:$0 sm:$0xff] }
 0x6c4   :  { %5174 = vrcp.f32 %v1170_v31  ;;  %4587 = vmatprep.mubr.msk.f32.mxu1 %vm765_vm13, %v786_v43  ;;  %v1313_v31 = vld [vmem:[%s6141_s24 + $0x10] sm:$0xff] }
 0x6c5   :  { %4588 = vmatmul.mubr.msk.f32.vlgmr.msra.gmra.mrb[4].mxu1 %vm765_vm13, %v787_v45  ;;  %v5165_v46 = vpop.eup %5164  ;;  %v4853_v62 = vpack.c.bf16 %v5062_v47, %v5061_v51  ;;  %v4869_v34 = vpack.c.bf16 %v1314_v32, %v1313_v31 }
 0x6c6   :  { %4852 = vmatpush3.bf16.msra.mxu1 %v4849_v42  ;;  %v5050_v49 = vpop.permute.xlu0 %5049  ;;  %v911_v57 = vmul.f32 %v5165_v46, %v5153_v15  ;;  %v5167_v58 = vpop.eup %5166 }
 0x6c7   :  { %v5052_v52 = vunpack.i.h.bf16 %v5050_v49  ;;  %v5051_v54 = vunpack.i.l.bf16 %v5050_v49  ;;  %v1043_v63 = vmul.f32 %v5167_v58, %v5715_v11  ;;  %v1317_v58 = vld [vmem:[%s6142_s30 + $0x10] sm:$0xff] }
 0x6c8   :  { %4594 = vmatprep.mubr.msk.f32.mxu0 %vm765_vm13, %v911_v57 }
 0x6c9   :  { %v5169_v59 = vpop.eup %5168  ;;  %v4845_v60 = vpack.c.bf16 %v5052_v52, %v5051_v54 }
 0x6ca   :  { %v5171_v61 = vpop.eup %5170  ;;  %v1042_v48 = vmul.f32 %v5169_v59, %v5157_v20  ;;  %v4861_v20 = vpack.c.bf16 %v1310_v19, %v1309_v17  ;;  %v1318_v59 = vld [vmem:[%s6142_s30 + $0x18] sm:$0xff] }
 0x6cb   :  { %4846 = vmatprep.subr.bf16.mxu0 %v4845_v60  ;;  %v912_v4 = vmul.f32 %v5171_v61, %v5710_v55  ;;  %v1307_v55 = vld [vmem:[%s6140_s19] sm:$0xff] }
 0x6cc   :  { %4848 = vmatpush3.bf16.msra.mxu0 %v4845_v60  ;;  %4601 = vmatprep.mubr.msk.f32.mxu1 %vm765_vm13, %v1042_v48  ;;  %v4857_v15 = vpack.c.bf16 %v1308_v14, %v1307_v55  ;;  %v4877_v48 = vpack.c.bf16 %v1318_v59, %v1317_v58 }
 0x6cd   :  { %v5173_v1 = vpop.eup %5172  ;;  %4602 = vmatmul.mubr.msk.f32.vlgmr.msra.gmra.mrb[6].mxu1 %vm765_vm13, %v1043_v63  ;;  %4854 = vmatprep.subr.bf16.mxu0 %v4853_v62 }
 0x6ce   :  { %v5175_v5 = vpop.eup %5174  ;;  %v1173_v6 = vmul.f32 %v5173_v1, %v5159_v23  ;;  %4858 = vmatprep.subr.bf16.mxu1 %v4857_v15  ;;  %v1311_v23 = vld [vmem:[%s6141_s24] sm:$0xff] }
 0x6cf   :  { %4595 = vmatmul.mubr.msk.f32.vlgmr.msra.gmra.mrb[6].mxu0 %vm765_vm13, %v912_v4  ;;  %v1174_v8 = vmul.f32 %v5175_v5, %v5720_v16  ;;  %4860 = vmatpush3.bf16.msra.mxu1 %v4857_v15  ;;  %v4865_v29 = vpack.c.bf16 %v1312_v24, %v1311_v23 }
 0x6d0   :  { %4856 = vmatpush3.bf16.msra.mxu0 %v4853_v62  ;;  %4608 = vmatprep.mubr.msk.f32.mxu0 %vm765_vm13, %v1173_v6 }
 0x6d1   :  { %4862 = vmatprep.subr.bf16.mxu1 %v4861_v20  ;;  %4866 = vmatprep.subr.bf16.mxu0 %v4865_v29 }
 0x6d3   :  { %4609 = vmatmul.mubr.msk.f32.vlgmr.msra.gmra.mrb[8].mxu0 %vm765_vm13, %v1174_v8  ;;  %4864 = vmatpush3.bf16.msra.mxu1 %v4861_v20 }
 0x6d4   :  { %4874 = vmatprep.subr.bf16.mxu1 %v4873_v33  ;;  %4868 = vmatpush3.bf16.msra.mxu0 %v4865_v29 }
 0x6d5   :  { %4870 = vmatprep.subr.bf16.mxu0 %v4869_v34 }
 0x6d8   :  { %4872 = vmatpush3.bf16.msra.mxu0 %v4869_v34 }
 0x798   :  { %v4589_v9 = vpop.f32.mrb[4].mxu1 }
 0x799   :  { %v860_v11 = vpop.f32.mrb[5].mxu1 }
 0x7a0   :  { %v4603_v12 = vpop.f32.mrb[6].mxu1 }
 0x7a1   :  { %v1122_v13 = vpop.f32.mrb[7].mxu1 }
 0x7a2   :  { %v4596_v0 = vpop.f32.mrb[6].mxu0 }
 0x7a3   :  { %1266 = vrot.lane.b32.xlu1 %v4596_v0, %s5389_s17  ;;  %v991_v16 = vpop.f32.mrb[7].mxu0 }
 0x7a4   :  { %1264 = vrot.lane.b32.xlu0 %v991_v16, %s5389_s17 }
 0x7a6   :  { %v4610_v21 = vpop.f32.mrb[8].mxu0 }
 0x7a7   :  { %1274 = vrot.lane.b32.xlu1 %v4603_v12, %s5388_s13  ;;  %v1253_v26 = vpop.f32.mrb[9].mxu0 }
 0x7a8   :  { %1272 = vrot.lane.b32.xlu0 %v1122_v13, %s5388_s13 }
 0x7ab   :  { %1282 = vrot.lane.b32.xlu1 %v4610_v21, %s5398_s12 }
 0x7ac   :  { %1280 = vrot.lane.b32.xlu0 %v1253_v26, %s5398_s12 }
 0x815   :  { %v1267_v35 = vpop.permute.xlu1 %1266 }
 0x816   :  { %v1265_v36 = vpop.permute.xlu0 %1264  ;;  %v1287_v42 = vsel %vm200_vm0, %v4589_v9, %v1267_v35 }
 0x817   :  { %v1286_v43 = vsel %vm200_vm0, %v860_v11, %v1265_v36 }
 0x819   :  { %v1275_v40 = vpop.permute.xlu1 %1274 }
 0x81a   :  { %v1273_v41 = vpop.permute.xlu0 %1272  ;;  %v1289_v44 = vsel %vm765_vm13, %v1287_v42, %v1275_v40 }
 0x81b   :  { %v1288_v46 = vsel %vm765_vm13, %v1286_v43, %v1273_v41 }
 0x81d   :  { %v1283_v45 = vpop.permute.xlu1 %1282 }
 0x81e   :  { %v1292_v47 = vsel %vm1290_vm6, %v1289_v44, %v1283_v45  ;;  %v1281_v49 = vpop.permute.xlu0 %1280 }
 0x81f   :  { %v1300_v51 = vadd.f32 %v4342_v22, %v1292_v47  ;;  %v1291_v52 = vsel %vm1290_vm6, %v1288_v46, %v1281_v49 }
 0x820   :  { %v1299_v54 = vadd.f32 %v4342_v22, %v1291_v52 }
 0x821   :  { %v1304_v57 = vmul.f32 0.01, %v1300_v51  ;;  %vm1302_vm7 = vcmp.ge.f32.partialorder %v1300_v51, 0.0 }
 0x822   :  { %v1303_v60 = vmul.f32 0.01, %v1299_v54  ;;  %vm1301_vm9 = vcmp.ge.f32.partialorder %v1299_v54, 0.0 }
 0x823   :  { %v1306_v62 = vsel %vm1302_vm7, %v1300_v51, %v1304_v57 }
 0x824   :  { %v1305_v61 = vsel %vm1301_vm9, %v1299_v54, %v1303_v60 }
 0x825   :  { %4619 = vmatprep.mubr.msk.f32.mxu1 %vm552_vm8, %v1305_v61 }
 0x826   :  { %4620 = vmatmul.mubr.msk.f32.vlgmr.msra.gmra.mrb[8].mxu1 %vm552_vm8, %v1306_v62 }
 0x827   :  { %4876 = vmatpush3.bf16.msra.mxu1 %v4873_v33 }
 0x828   :  { %4878 = vmatprep.subr.bf16.mxu1 %v4877_v48 }
 0x82b   :  { %4880 = vmatpush3.bf16.msra.mxu1 %v4877_v48 }
 0x8f9   :  { %v4621_v63 = vpop.f32.mrb[8].mxu1 }
 0x8fa   :  { %v1392_v1 = vpop.f32.mrb[9].mxu1 }
 0x8fb   :  { %4630 = vmatprep.mubr.msk.f32.mxu0 %vm552_vm8, %v1392_v1  ;;  %4641 = vmatprep.mubr.msk.f32.mxu1 %vm552_vm8, %v1392_v1  ;;  %v4881_v4 = vpack.c.bf16 %v4621_v63, %v1392_v1  ;;  %v5774_v5 = vpack.i.bf16 %v4621_v63, %v1392_v1 }
 0x8fc   :  { %4631 = vmatmul.mubr.msk.f32.vlgmr.msra.gmra.mrb[10].mxu0 %vm552_vm8, %v4621_v63  ;;  %4642 = vmatmul.mubr.msk.f32.vlgmr.msra.gmra.mrb[10].mxu1 %vm552_vm8, %v4621_v63 }
 0x8fd   :  { %4882 = vmatprep.subr.bf16.mxu0 %v4881_v4 }
 0x8fe   :  { %4884 = vmatpush3.bf16.msra.mxu0 %v4881_v4 }
 0x9cf   :  { %v4632_v6 = vpop.f32.mrb[10].mxu0  ;;  %v4643_v8 = vpop.f32.mrb[10].mxu1 }
 0x9d0   :  { %1721 = vperm.xlu0 %5064, %v4643_v8   ;;  %1596 = vperm.xlu1 %5063, %v4643_v8   ;;  %v1473_v9 = vpop.f32.mrb[11].mxu0  ;;  %v1548_v11 = vpop.f32.mrb[11].mxu1 }
 0x9d4   :  { %5066 = vset.pattern.permute.xlu0 %v5386_v7  ;;  %5065 = vset.pattern.permute.xlu1 %v5393_v18 }
 0x9d5   :  { %1852 = vperm.xlu1 %5065, %v4643_v8   ;;  %1591 = vperm.xlu0 %5066, %v1548_v11  }
 0x9d9   :  { %5067 = vset.pattern.permute.xlu1 %v5394_v27  ;;  %5069 = vset.pattern.permute.xlu0 %v5395_v28 }
 0x9da   :  { %1717 = vperm.xlu1 %5067, %v1548_v11   ;;  %1979 = vperm.xlu0 %5069, %v1548_v11  }
 0x9de   :  { %5068 = vset.pattern.permute.xlu1 %v5393_v18  ;;  %5087 = vset.pattern.permute.xlu0 %v5394_v27 }
 0x9df   :  { %1848 = vperm.xlu1 %5068, %v1548_v11  }
 0x9e3   :  { %5070 = vset.pattern.permute.xlu1 %v5395_v28 }
 0x9e4   :  { %1983 = vperm.xlu1 %5070, %v4643_v8  }
 0xa0d   :  { %1557 = vxpose.xlu1.b32.start [1/2] (short) (narrow) %v1473_v9, 8 }
 0xa11   :  { %1558 = vxpose.xlu1.b32.end [2/2] (short) (narrow) %v4632_v6, 8 }
 0xa2f   :  { %5086 = vset.pattern.permute.xlu1 %v5386_v7 }
 0xa4f   :  { %v1597_v12 = vpop.permute.xlu1 %1596  ;;  %v1722_v0 = vpop.permute.xlu0 %1721 }
 0xa54   :  { %v1853_v13 = vpop.permute.xlu1 %1852  ;;  %v1592_v21 = vpop.permute.xlu0 %1591 }
 0xa59   :  { %v1718_v55 = vpop.permute.xlu1 %1717  ;;  %v1980_v49 = vpop.permute.xlu0 %1979 }
 0xa5e   :  { %v1849_v14 = vpop.permute.xlu1 %1848 }
 0xa63   :  { %v1984_v15 = vpop.permute.xlu1 %1983 }
 0xa8d   :  { %v1573_v17 = vpop.trf.xlu1 }
 0xa8e   :  { %v1602_v19 = vrot.slane %v1573_v17, %v5669_v37  ;;  %v1727_v16 = vrot.slane %v1573_v17, %v5671_v38  ;;  %v1858_v20 = vrot.slane %v1573_v17, %v5673_v39  ;;  %v1989_v42 = vrot.slane %v1573_v17, %v5680_v50 }
 0xa90   :  { %v1603_v23 = vadd.f32 %v1602_v19, %v1592_v21  ;;  %v1604_v24 = vadd.f32 %v1602_v19, %v1597_v12  ;;  %v1729_v25 = vadd.f32 %v1727_v16, %v1722_v0  ;;  %v1859_v26 = vadd.f32 %v1858_v20, %v1849_v14 }
 0xa91   :  { %v1728_v32 = vadd.f32 %v1727_v16, %v1718_v55  ;;  %v1860_v44 = vadd.f32 %v1858_v20, %v1853_v13  ;;  %v1990_v54 = vadd.f32 %v1989_v42, %v1980_v49  ;;  %v1991_v61 = vadd.f32 %v1989_v42, %v1984_v15 }
 0xa92   :  { %vm1606_vm10 = vcmp.ge.f32.partialorder %v1604_v24, 0.0  ;;  %v1608_v29 = vmul.f32 0.2, %v1604_v24  ;;  %vm1731_vm11 = vcmp.ge.f32.partialorder %v1729_v25, 0.0  ;;  %v1733_v30 = vmul.f32 0.2, %v1729_v25 }
 0xa93   :  { %vm1861_vm12 = vcmp.ge.f32.partialorder %v1859_v26, 0.0  ;;  %v1863_v31 = vmul.f32 0.2, %v1859_v26  ;;  %v1607_v35 = vmul.f32 0.2, %v1603_v23  ;;  %vm1605_vm14 = vcmp.ge.f32.partialorder %v1603_v23, 0.0 }
 0xa94   :  { %v1610_v33 = vsel %vm1606_vm10, %v1604_v24, %v1608_v29  ;;  %v1735_v34 = vsel %vm1731_vm11, %v1729_v25, %v1733_v30  ;;  %v1732_v47 = vmul.f32 0.2, %v1728_v32  ;;  %vm1730_vm15 = vcmp.ge.f32.partialorder %v1728_v32, 0.0 }
 0xa95   :  { %v1865_v36 = vsel %vm1861_vm12, %v1859_v26, %v1863_v31  ;;  %v1612_v40 = vadd.f32 %v1610_v33, %v5682_v53  ;;  %v1737_v43 = vadd.f32 %v1735_v34, %v5682_v53  ;;  %v1609_v46 = vsel %vm1605_vm14, %v1603_v23, %v1607_v35 }
 0xa96   :  { %v5791_v41 = vadd.f32 %v1865_v36, %v5684_v56  ;;  %v1611_v52 = vadd.f32 %v1609_v46, %v5684_v56  ;;  %v1734_v57 = vsel %vm1730_vm15, %v1728_v32, %v1732_v47  ;;  %v1864_v58 = vmul.f32 0.2, %v1860_v44 }
 0xa97   :  { %v1616_v22 = vsel %vm765_vm13, %v1612_v40, -inf  ;;  %v1741_v51 = vsel %vm765_vm13, %v1737_v43, -inf  ;;  %vm1862_vm2 = vcmp.ge.f32.partialorder %v1860_v44, 0.0  ;;  %v1736_v60 = vadd.f32 %v1734_v57, %v5684_v56 }
 0xa98   :  { %v1869_v45 = vsel %vm765_vm13, %v5791_v41, -inf  ;;  %1617 = vmax.xlane.f32.xlu0 %v1616_v22  ;;  %v1613_v59 = vsel %vm765_vm13, %v1611_v52, -inf  ;;  %v1866_v48 = vsel %vm1862_vm2, %v1860_v44, %v1864_v58  ;;  %v1994_v62 = vmul.f32 0.2, %v1990_v54 }
 0xa99   :  { %1870 = vmax.xlane.f32.xlu1 %v1869_v45  ;;  %vm1992_vm3 = vcmp.ge.f32.partialorder %v1990_v54, 0.0  ;;  %v1738_v63 = vsel %vm765_vm13, %v1736_v60, -inf  ;;  %v1868_v1 = vadd.f32 %v1866_v48, %v5682_v53  ;;  %v1995_v6 = vmul.f32 0.2, %v1991_v61 }
 0xa9a   :  { %v1996_v4 = vsel %vm1992_vm3, %v1990_v54, %v1994_v62  ;;  %vm1993_vm4 = vcmp.ge.f32.partialorder %v1991_v61, 0.0 }
 0xa9b   :  { %v1872_v8 = vsel %vm765_vm13, %v1868_v1, -inf  ;;  %v1998_v9 = vadd.f32 %v1996_v4, %v5684_v56  ;;  %v1997_v11 = vsel %vm1993_vm4, %v1991_v61, %v1995_v6 }
 0xa9c   :  { %1742 = vmax.xlane.f32.xlu0 %v1741_v51  ;;  %v1999_v13 = vadd.f32 %v1997_v11, %v5682_v53 }
 0xa9d   :  { %v2000_v12 = vsel %vm765_vm13, %v1998_v9, -inf }
 0xa9e   :  { %v2003_v55 = vsel %vm765_vm13, %v1999_v13, -inf }
 0xaa0   :  { %1614 = vmax.xlane.f32.xlu0 %v1613_v59 }
 0xaa4   :  { %1739 = vmax.xlane.f32.xlu0 %v1738_v63 }
 0xaa8   :  { %1873 = vmax.xlane.f32.xlu0 %v1872_v8 }
 0xaac   :  { %2001 = vmax.xlane.f32.xlu0 %v2000_v12 }
 0xab0   :  { %2004 = vmax.xlane.f32.xlu0 %v2003_v55 }
 0xb25   :  { %v1618_v14 = vpop.xlane.xlu0 %1617 }
 0xb26   :  { %v1620_v0 = vsub.f32 %v1612_v40, %v1618_v14  ;;  %v1871_v34 = vpop.xlane.xlu1 %1870 }
 0xb27   :  { %v1875_v40 = vsub.f32 %v5791_v41, %v1871_v34 }
 0xb28   :  { %v1623_v15 = vmul.f32 1.442695, %v1620_v0 }
 0xb29   :  { %v1743_v17 = vpop.xlane.xlu0 %1742  ;;  %v1877_v44 = vmul.f32 1.442695, %v1875_v40 }
 0xb2a   :  { %5176 = vpow2.f32 %v1623_v15  ;;  %v1745_v19 = vsub.f32 %v1737_v43, %v1743_v17 }
 0xb2c   :  { %v1748_v16 = vmul.f32 1.442695, %v1745_v19 }
 0xb2d   :  { %v1615_v20 = vpop.xlane.xlu0 %1614 }
 0xb2e   :  { %5178 = vpow2.f32 %v1748_v16  ;;  %v1619_v24 = vsub.f32 %v1611_v52, %v1615_v20 }
 0xb30   :  { %v1621_v31 = vmul.f32 1.442695, %v1619_v24 }
 0xb31   :  { %v1740_v21 = vpop.xlane.xlu0 %1739 }
 0xb32   :  { %v1744_v32 = vsub.f32 %v1736_v60, %v1740_v21 }
 0xb34   :  { %v5809_v23 = vpop.eup %5176  ;;  %v1746_v42 = vmul.f32 1.442695, %v1744_v32 }
 0xb35   :  { %v1874_v25 = vpop.xlane.xlu0 %1873  ;;  %v1628_v26 = vsel %vm765_vm13, %v5809_v23, 0.0 }
 0xb36   :  { %v1876_v29 = vsub.f32 %v1868_v1, %v1874_v25  ;;  %1629 = vadd.xlane.f32.xlu0 %v1628_v26 }
 0xb38   :  { %v5813_v30 = vpop.eup %5178  ;;  %v1879_v33 = vmul.f32 1.442695, %v1876_v29 }
 0xb39   :  { %v2002_v35 = vpop.xlane.xlu0 %2001  ;;  %v1753_v36 = vsel %vm765_vm13, %v5813_v30, 0.0 }
 0xb3a   :  { %5180 = vpow2.f32 %v1879_v33  ;;  %1754 = vadd.xlane.f32.xlu0 %v1753_v36  ;;  %v2006_v45 = vsub.f32 %v1998_v9, %v2002_v35 }
 0xb3b   :  { %5182 = vpow2.f32 %v1621_v31 }
 0xb3c   :  { %5184 = vpow2.f32 %v1746_v42  ;;  %v2008_v49 = vmul.f32 1.442695, %v2006_v45 }
 0xb3d   :  { %v2005_v22 = vpop.xlane.xlu0 %2004 }
 0xb3e   :  { %v2007_v43 = vsub.f32 %v1999_v13, %v2005_v22 }
 0xb40   :  { %v2010_v46 = vmul.f32 1.442695, %v2007_v43 }
 0xb42   :  { %5186 = vpow2.f32 %v2010_v46 }
 0xb43   :  { %5188 = vpow2.f32 %v1877_v44 }
 0xb44   :  { %v5818_v47 = vpop.eup %5180  ;;  %5190 = vpow2.f32 %v2008_v49  ;;  %v2153_v49 = vld [vmem:[%s6144_s20] sm:$0xff] }
 0xb45   :  { %v1884_v51 = vsel %vm765_vm13, %v5818_v47, 0.0  ;;  %v5183_v52 = vpop.eup %5182 }
 0xb46   :  { %1885 = vadd.xlane.f32.xlu0 %v1884_v51  ;;  %v1625_v41 = vsel %vm765_vm13, %v5183_v52, 0.0  ;;  %v5185_v54 = vpop.eup %5184  ;;  %v2154_v51 = vld [vmem:[%s6144_s20 + $0x8] sm:$0xff] }
 0xb47   :  { %v1750_v58 = vsel %vm765_vm13, %v5185_v54, 0.0 }
 0xb4a   :  { %1626 = vadd.xlane.f32.xlu0 %v1625_v41  ;;  %v2155_v41 = vld [vmem:[%s6144_s20 + $0x10] sm:$0xff] }
 0xb4c   :  { %v5823_v57 = vpop.eup %5186 }
 0xb4d   :  { %v2015_v59 = vsel %vm765_vm13, %v5823_v57, 0.0  ;;  %v5189_v60 = vpop.eup %5188 }
 0xb4e   :  { %1751 = vadd.xlane.f32.xlu0 %v1750_v58  ;;  %2016 = vadd.xlane.f32.xlu1 %v2015_v59  ;;  %v1881_v61 = vsel %vm765_vm13, %v5189_v60, 0.0  ;;  %v5191_v48 = vpop.eup %5190 }
 0xb4f   :  { %v2012_v62 = vsel %vm765_vm13, %v5191_v48, 0.0 }
 0xb52   :  { %1882 = vadd.xlane.f32.xlu0 %v1881_v61  ;;  %v2157_v61 = vld [vmem:[%s6145_s15] sm:$0xff] }
 0xb56   :  { %2013 = vadd.xlane.f32.xlu0 %v2012_v62  ;;  %v2161_v62 = vld [vmem:[%s6146_s16] sm:$0xff] }
 0xb5f   :  { %5077 = vrot.lane.b32.xlu1 %v5774_v5, %s5387_s0 }
 0xb63   :  { %5082 = vrot.lane.b32.xlu1 %v5774_v5, %s5397_s14 }
 0xb6c   :  { %5072 = vrot.lane.b32.xlu0 %v5774_v5, %s5391_s29 }
 0xbc3   :  { %v1630_v63 = vpop.xlane.xlu0 %1629 }
 0xbc4   :  { %5192 = vrcp.f32 %v1630_v63 }
 0xbc7   :  { %v1755_v1 = vpop.xlane.xlu0 %1754 }
 0xbce   :  { %v5193_v14 = vpop.eup %5192 }
 0xbcf   :  { %v1634_v16 = vmul.f32 %v5193_v14, %v5809_v23 }
 0xbd3   :  { %v1886_v4 = vpop.xlane.xlu0 %1885 }
 0xbd7   :  { %v1627_v6 = vpop.xlane.xlu0 %1626 }
 0xbd8   :  { %5194 = vrcp.f32 %v1627_v6  ;;  %v2160_v6 = vld [vmem:[%s6145_s15 + $0x18] sm:$0xff] }
 0xbdb   :  { %v2017_v8 = vpop.xlane.xlu1 %2016  ;;  %v1752_v9 = vpop.xlane.xlu0 %1751 }
 0xbdc   :  { %5196 = vrcp.f32 %v1752_v9 }
 0xbdd   :  { %5198 = vrcp.f32 %v1886_v4  ;;  %v2159_v4 = vld [vmem:[%s6145_s15 + $0x10] sm:$0xff] }
 0xbdf   :  { %v5078_v11 = vpop.permute.xlu1 %5077  ;;  %v1883_v12 = vpop.xlane.xlu0 %1882 }
 0xbe0   :  { %v5080_v13 = vunpack.i.h.bf16 %v5078_v11  ;;  %v5079_v55 = vunpack.i.l.bf16 %v5078_v11  ;;  %5200 = vrcp.f32 %v1883_v12  ;;  %v4909_v11 = vpack.c.bf16 %v2160_v6, %v2159_v4 }
 0xbe1   :  { %5202 = vrcp.f32 %v1755_v1  ;;  %v2162_v1 = vld [vmem:[%s6146_s16 + $0x8] sm:$0xff] }
 0xbe2   :  { %v5195_v0 = vpop.eup %5194  ;;  %v4889_v15 = vpack.c.bf16 %v5080_v13, %v5079_v55  ;;  %v4913_v9 = vpack.c.bf16 %v2162_v1, %v2161_v62 }
 0xbe3   :  { %v2014_v5 = vpop.xlane.xlu0 %2013  ;;  %v1633_v17 = vmul.f32 %v5195_v0, %v5183_v52  ;;  %v5083_v19 = vpop.permute.xlu1 %5082 }
 0xbe4   :  { %5204 = vrcp.f32 %v2014_v5  ;;  %4890 = vmatprep.subr.bf16.mxu1 %v4889_v15  ;;  %v5085_v21 = vunpack.i.h.bf16 %v5083_v19  ;;  %v5084_v25 = vunpack.i.l.bf16 %v5083_v19 }
 0xbe5   :  { %5206 = vrcp.f32 %v2017_v8  ;;  %4648 = vmatprep.mubr.msk.f32.mxu0 %vm765_vm13, %v1633_v17  ;;  %4892 = vmatpush3.bf16.msra.mxu1 %v4889_v15  ;;  %v4357_v17 = vld [vmem:[%s6147_s18] ss:$0 sm:$0xff] }
 0xbe6   :  { %4649 = vmatmul.mubr.msk.f32.vlgmr.msra.gmra.mrb[12].mxu0 %vm765_vm13, %v1634_v16  ;;  %v5197_v20 = vpop.eup %5196  ;;  %v4893_v36 = vpack.c.bf16 %v5085_v21, %v5084_v25 }
 0xbe7   :  { %v5073_v24 = vpop.permute.xlu0 %5072  ;;  %v1758_v31 = vmul.f32 %v5197_v20, %v5185_v54  ;;  %v5199_v32 = vpop.eup %5198  ;;  %v2156_v54 = vld [vmem:[%s6144_s20 + $0x18] sm:$0xff] }
 0xbe8   :  { %v5075_v26 = vunpack.i.h.bf16 %v5073_v24  ;;  %v5074_v29 = vunpack.i.l.bf16 %v5073_v24  ;;  %v1890_v40 = vmul.f32 %v5199_v32, %v5818_v47  ;;  %v2163_v32 = vld [vmem:[%s6146_s16 + $0x10] sm:$0xff] }
 0xbe9   :  { %4655 = vmatprep.mubr.msk.f32.mxu0 %vm765_vm13, %v1758_v31 }
 0xbea   :  { %v5201_v33 = vpop.eup %5200  ;;  %v4885_v34 = vpack.c.bf16 %v5075_v26, %v5074_v29 }
 0xbeb   :  { %v5203_v35 = vpop.eup %5202  ;;  %v1889_v23 = vmul.f32 %v5201_v33, %v5189_v60  ;;  %v2164_v33 = vld [vmem:[%s6146_s16 + $0x18] sm:$0xff] }
 0xbec   :  { %4886 = vmatprep.subr.bf16.mxu0 %v4885_v34  ;;  %v1759_v22 = vmul.f32 %v5203_v35, %v5813_v30  ;;  %v4897_v30 = vpack.c.bf16 %v2154_v51, %v2153_v49 }
 0xbed   :  { %4888 = vmatpush3.bf16.msra.mxu0 %v4885_v34  ;;  %4662 = vmatprep.mubr.msk.f32.mxu1 %vm765_vm13, %v1889_v23  ;;  %v4917_v23 = vpack.c.bf16 %v2164_v33, %v2163_v32 }
 0xbee   :  { %v5205_v42 = vpop.eup %5204  ;;  %4663 = vmatmul.mubr.msk.f32.vlgmr.msra.gmra.mrb[12].mxu1 %vm765_vm13, %v1890_v40  ;;  %4894 = vmatprep.subr.bf16.mxu0 %v4893_v36 }
 0xbef   :  { %v5207_v43 = vpop.eup %5206  ;;  %v2020_v44 = vmul.f32 %v5205_v42, %v5191_v48  ;;  %4898 = vmatprep.subr.bf16.mxu1 %v4897_v30  ;;  %v2158_v48 = vld [vmem:[%s6145_s15 + $0x8] sm:$0xff] }
 0xbf0   :  { %4656 = vmatmul.mubr.msk.f32.vlgmr.msra.gmra.mrb[14].mxu0 %vm765_vm13, %v1759_v22  ;;  %v2021_v45 = vmul.f32 %v5207_v43, %v5823_v57  ;;  %v4901_v57 = vpack.c.bf16 %v2156_v54, %v2155_v41  ;;  %4900 = vmatpush3.bf16.msra.mxu1 %v4897_v30  ;;  %v4905_v63 = vpack.c.bf16 %v2158_v48, %v2157_v61 }
 0xbf1   :  { %4896 = vmatpush3.bf16.msra.mxu0 %v4893_v36  ;;  %4669 = vmatprep.mubr.msk.f32.mxu0 %vm765_vm13, %v2020_v44 }
 0xbf2   :  { %4902 = vmatprep.subr.bf16.mxu1 %v4901_v57  ;;  %4906 = vmatprep.subr.bf16.mxu0 %v4905_v63 }
 0xbf4   :  { %4670 = vmatmul.mubr.msk.f32.vlgmr.msra.gmra.mrb[16].mxu0 %vm765_vm13, %v2021_v45  ;;  %4904 = vmatpush3.bf16.msra.mxu1 %v4901_v57 }
 0xbf5   :  { %4914 = vmatprep.subr.bf16.mxu1 %v4913_v9  ;;  %4908 = vmatpush3.bf16.msra.mxu0 %v4905_v63 }
 0xbf6   :  { %4910 = vmatprep.subr.bf16.mxu0 %v4909_v11 }
 0xbf9   :  { %4912 = vmatpush3.bf16.msra.mxu0 %v4909_v11 }
 0xcb9   :  { %v4650_v46 = vpop.f32.mrb[12].mxu0 }
 0xcba   :  { %v1707_v47 = vpop.f32.mrb[13].mxu0 }
 0xcc1   :  { %v4664_v52 = vpop.f32.mrb[12].mxu1 }
 0xcc2   :  { %2121 = vrot.lane.b32.xlu1 %v4664_v52, %s5388_s13  ;;  %v1969_v58 = vpop.f32.mrb[13].mxu1 }
 0xcc3   :  { %2119 = vrot.lane.b32.xlu0 %v1969_v58, %s5388_s13  ;;  %v4657_v59 = vpop.f32.mrb[14].mxu0 }
 0xcc4   :  { %v1838_v60 = vpop.f32.mrb[15].mxu0 }
 0xcc6   :  { %2113 = vrot.lane.b32.xlu1 %v4657_v59, %s5389_s17 }
 0xcc7   :  { %2111 = vrot.lane.b32.xlu0 %v1838_v60, %s5389_s17  ;;  %v4671_v8 = vpop.f32.mrb[16].mxu0 }
 0xcc8   :  { %v2100_v12 = vpop.f32.mrb[17].mxu0 }
 0xcca   :  { %2129 = vrot.lane.b32.xlu1 %v4671_v8, %s5398_s12 }
 0xccb   :  { %2127 = vrot.lane.b32.xlu0 %v2100_v12, %s5398_s12 }
 0xd34   :  { %v2122_v13 = vpop.permute.xlu1 %2121 }
 0xd35   :  { %v2120_v55 = vpop.permute.xlu0 %2119 }
 0xd38   :  { %v2114_v14 = vpop.permute.xlu1 %2113 }
 0xd39   :  { %v2134_v0 = vsel %vm200_vm0, %v4650_v46, %v2114_v14  ;;  %v2112_v15 = vpop.permute.xlu0 %2111 }
 0xd3a   :  { %v2133_v5 = vsel %vm200_vm0, %v1707_v47, %v2112_v15  ;;  %v2136_v19 = vsel %vm765_vm13, %v2134_v0, %v2122_v13 }
 0xd3b   :  { %v2135_v21 = vsel %vm765_vm13, %v2133_v5, %v2120_v55 }
 0xd3c   :  { %v2130_v16 = vpop.permute.xlu1 %2129 }
 0xd3d   :  { %v2138_v20 = vsel %vm1290_vm6, %v2136_v19, %v2130_v16  ;;  %v2128_v24 = vpop.permute.xlu0 %2127 }
 0xd3e   :  { %v2146_v25 = vadd.f32 %v4357_v17, %v2138_v20  ;;  %v2137_v26 = vsel %vm1290_vm6, %v2135_v21, %v2128_v24 }
 0xd3f   :  { %v2145_v29 = vadd.f32 %v4357_v17, %v2137_v26 }
 0xd40   :  { %v2150_v31 = vmul.f32 0.01, %v2146_v25  ;;  %vm2148_vm5 = vcmp.ge.f32.partialorder %v2146_v25, 0.0 }
 0xd41   :  { %v2149_v34 = vmul.f32 0.01, %v2145_v29  ;;  %vm2147_vm7 = vcmp.ge.f32.partialorder %v2145_v29, 0.0 }
 0xd42   :  { %v2152_v36 = vsel %vm2148_vm5, %v2146_v25, %v2150_v31 }
 0xd43   :  { %v2151_v35 = vsel %vm2147_vm7, %v2145_v29, %v2149_v34 }
 0xd44   :  { %4680 = vmatprep.mubr.msk.f32.mxu1 %vm552_vm8, %v2151_v35 }
 0xd45   :  { %4681 = vmatmul.mubr.msk.f32.vlgmr.msra.gmra.mrb[14].mxu1 %vm552_vm8, %v2152_v36 }
 0xd46   :  { %4916 = vmatpush3.bf16.msra.mxu1 %v4913_v9 }
 0xd47   :  { %4918 = vmatprep.subr.bf16.mxu1 %v4917_v23 }
 0xd4a   :  { %4920 = vmatpush3.bf16.msra.mxu1 %v4917_v23 }
 0xe18   :  { %v4682_v40 = vpop.f32.mrb[14].mxu1 }
 0xe19   :  { %v2238_v42 = vpop.f32.mrb[15].mxu1 }
 0xe1a   :  { %4691 = vmatprep.mubr.msk.f32.mxu0 %vm552_vm8, %v2238_v42  ;;  %4702 = vmatprep.mubr.msk.f32.mxu1 %vm552_vm8, %v2238_v42  ;;  %v4921_v22 = vpack.c.bf16 %v4682_v40, %v2238_v42  ;;  %v5877_v43 = vpack.i.bf16 %v4682_v40, %v2238_v42 }
 0xe1b   :  { %4692 = vmatmul.mubr.msk.f32.vlgmr.msra.gmra.mrb[18].mxu0 %vm552_vm8, %v4682_v40  ;;  %4703 = vmatmul.mubr.msk.f32.vlgmr.msra.gmra.mrb[16].mxu1 %vm552_vm8, %v4682_v40 }
 0xe1c   :  { %4922 = vmatprep.subr.bf16.mxu0 %v4921_v22 }
 0xe1d   :  { %4924 = vmatpush3.bf16.msra.mxu0 %v4921_v22 }
 0xeee   :  { %v4693_v44 = vpop.f32.mrb[18].mxu0  ;;  %v4704_v45 = vpop.f32.mrb[16].mxu1 }
 0xeef   :  { %2567 = vperm.xlu0 %5087, %v4704_v45   ;;  %2442 = vperm.xlu1 %5086, %v4704_v45   ;;  %v2319_v46 = vpop.f32.mrb[19].mxu0  ;;  %v2394_v47 = vpop.f32.mrb[17].mxu1 }
 0xef3   :  { %5089 = vset.pattern.permute.xlu0 %v5386_v7  ;;  %5088 = vset.pattern.permute.xlu1 %v5393_v18 }
 0xef4   :  { %2698 = vperm.xlu1 %5088, %v4704_v45   ;;  %2437 = vperm.xlu0 %5089, %v2394_v47  }
 0xef8   :  { %5090 = vset.pattern.permute.xlu1 %v5394_v27  ;;  %5092 = vset.pattern.permute.xlu0 %v5395_v28 }
 0xef9   :  { %2563 = vperm.xlu1 %5090, %v2394_v47   ;;  %2825 = vperm.xlu0 %5092, %v2394_v47  }
 0xefd   :  { %5091 = vset.pattern.permute.xlu1 %v5393_v18  ;;  %5109 = vset.pattern.permute.xlu0 %v5394_v27 }
 0xefe   :  { %2694 = vperm.xlu1 %5091, %v2394_v47  }
 0xf02   :  { %5093 = vset.pattern.permute.xlu1 %v5395_v28 }
 0xf03   :  { %2829 = vperm.xlu1 %5093, %v4704_v45  }
 0xf2c   :  { %2403 = vxpose.xlu1.b32.start [1/2] (short) (narrow) %v2319_v46, 8 }
 0xf30   :  { %2404 = vxpose.xlu1.b32.end [2/2] (short) (narrow) %v4693_v44, 8 }
 0xf4e   :  { %5110 = vset.pattern.permute.xlu1 %v5394_v27 }
 0xf6e   :  { %v2443_v49 = vpop.permute.xlu1 %2442  ;;  %v2568_v41 = vpop.permute.xlu0 %2567 }
 0xf73   :  { %v2699_v51 = vpop.permute.xlu1 %2698  ;;  %v2438_v61 = vpop.permute.xlu0 %2437 }
 0xf78   :  { %v2564_v52 = vpop.permute.xlu1 %2563  ;;  %v2826_v21 = vpop.permute.xlu0 %2825 }
 0xf7d   :  { %v2695_v30 = vpop.permute.xlu1 %2694 }
 0xf82   :  { %v2830_v54 = vpop.permute.xlu1 %2829 }
 0xfac   :  { %v2419_v58 = vpop.trf.xlu1 }
 0xfad   :  { %v2448_v57 = vrot.slane %v2419_v58, %v5669_v37  ;;  %v2573_v59 = vrot.slane %v2419_v58, %v5671_v38  ;;  %v2704_v60 = vrot.slane %v2419_v58, %v5673_v39  ;;  %v2835_v0 = vrot.slane %v2419_v58, %v5680_v50 }
 0xfaf   :  { %v2449_v48 = vadd.f32 %v2448_v57, %v2438_v61  ;;  %v2450_v62 = vadd.f32 %v2448_v57, %v2443_v49  ;;  %v2575_v63 = vadd.f32 %v2573_v59, %v2568_v41  ;;  %v2705_v1 = vadd.f32 %v2704_v60, %v2695_v30 }
 0xfb0   :  { %v2574_v8 = vadd.f32 %v2573_v59, %v2564_v52  ;;  %v2706_v17 = vadd.f32 %v2704_v60, %v2699_v51  ;;  %v2836_v26 = vadd.f32 %v2835_v0, %v2826_v21  ;;  %v2837_v34 = vadd.f32 %v2835_v0, %v2830_v54 }
 0xfb1   :  { %vm2452_vm9 = vcmp.ge.f32.partialorder %v2450_v62, 0.0  ;;  %v2454_v27 = vmul.f32 0.2, %v2450_v62  ;;  %vm2577_vm10 = vcmp.ge.f32.partialorder %v2575_v63, 0.0  ;;  %v2579_v4 = vmul.f32 0.2, %v2575_v63 }
 0xfb2   :  { %vm2707_vm11 = vcmp.ge.f32.partialorder %v2705_v1, 0.0  ;;  %v2709_v6 = vmul.f32 0.2, %v2705_v1  ;;  %v2453_v12 = vmul.f32 0.2, %v2449_v48  ;;  %vm2451_vm12 = vcmp.ge.f32.partialorder %v2449_v48, 0.0 }
 0xfb3   :  { %v2456_v9 = vsel %vm2452_vm9, %v2450_v62, %v2454_v27  ;;  %v2581_v11 = vsel %vm2577_vm10, %v2575_v63, %v2579_v4  ;;  %v2578_v20 = vmul.f32 0.2, %v2574_v8  ;;  %vm2576_vm14 = vcmp.ge.f32.partialorder %v2574_v8, 0.0 }
 0xfb4   :  { %v2711_v13 = vsel %vm2707_vm11, %v2705_v1, %v2709_v6  ;;  %v2458_v55 = vadd.f32 %v2456_v9, %v5682_v53  ;;  %v2583_v5 = vadd.f32 %v2581_v11, %v5682_v53  ;;  %v2455_v16 = vsel %vm2451_vm12, %v2449_v48, %v2453_v12 }
 0xfb5   :  { %v5894_v14 = vadd.f32 %v2711_v13, %v5684_v56  ;;  %v2457_v25 = vadd.f32 %v2455_v16, %v5684_v56  ;;  %v2580_v29 = vsel %vm2576_vm14, %v2574_v8, %v2578_v20  ;;  %v2710_v31 = vmul.f32 0.2, %v2706_v17 }
 0xfb6   :  { %v2462_v15 = vsel %vm765_vm13, %v2458_v55, -inf  ;;  %v2587_v24 = vsel %vm765_vm13, %v2583_v5, -inf  ;;  %vm2708_vm15 = vcmp.ge.f32.partialorder %v2706_v17, 0.0  ;;  %v2582_v33 = vadd.f32 %v2580_v29, %v5684_v56 }
 0xfb7   :  { %v2715_v19 = vsel %vm765_vm13, %v5894_v14, -inf  ;;  %2463 = vmax.xlane.f32.xlu0 %v2462_v15  ;;  %v2459_v32 = vsel %vm765_vm13, %v2457_v25, -inf  ;;  %v2712_v35 = vsel %vm2708_vm15, %v2706_v17, %v2710_v31  ;;  %v2840_v23 = vmul.f32 0.2, %v2836_v26 }
 0xfb8   :  { %2716 = vmax.xlane.f32.xlu1 %v2715_v19  ;;  %vm2838_vm2 = vcmp.ge.f32.partialorder %v2836_v26, 0.0  ;;  %v2584_v36 = vsel %vm765_vm13, %v2582_v33, -inf  ;;  %v2714_v40 = vadd.f32 %v2712_v35, %v5682_v53  ;;  %v2841_v22 = vmul.f32 0.2, %v2837_v34 }
 0xfb9   :  { %v2842_v42 = vsel %vm2838_vm2, %v2836_v26, %v2840_v23  ;;  %vm2839_vm3 = vcmp.ge.f32.partialorder %v2837_v34, 0.0  ;;  %vm434_vm15 = vcmask 60416  }
 0xfba   :  { %v2718_v44 = vsel %vm765_vm13, %v2714_v40, -inf  ;;  %v2844_v45 = vadd.f32 %v2842_v42, %v5684_v56  ;;  %v2843_v46 = vsel %vm2839_vm3, %v2837_v34, %v2841_v22  ;;  %vm4104_vm3 = vcmask 7168  }
 0xfbb   :  { %2588 = vmax.xlane.f32.xlu0 %v2587_v24  ;;  %v2845_v49 = vadd.f32 %v2843_v46, %v5682_v53 }
 0xfbc   :  { %v2846_v47 = vsel %vm765_vm13, %v2844_v45, -inf }
 0xfbd   :  { %v2849_v51 = vsel %vm765_vm13, %v2845_v49, -inf }
 0xfbf   :  { %2460 = vmax.xlane.f32.xlu0 %v2459_v32 }
 0xfc3   :  { %2585 = vmax.xlane.f32.xlu0 %v2584_v36 }
 0xfc7   :  { %2719 = vmax.xlane.f32.xlu0 %v2718_v44 }
 0xfcb   :  { %2847 = vmax.xlane.f32.xlu0 %v2846_v47 }
 0xfcf   :  { %2850 = vmax.xlane.f32.xlu0 %v2849_v51 }
0x1044   :  { %v2464_v52 = vpop.xlane.xlu0 %2463 }
0x1045   :  { %v2466_v30 = vsub.f32 %v2458_v55, %v2464_v52  ;;  %v2717_v9 = vpop.xlane.xlu1 %2716 }
0x1046   :  { %v2721_v13 = vsub.f32 %v5894_v14, %v2717_v9 }
0x1047   :  { %v2469_v41 = vmul.f32 1.442695, %v2466_v30 }
0x1048   :  { %v2589_v54 = vpop.xlane.xlu0 %2588 }
0x1049   :  { %5208 = vpow2.f32 %v2469_v41  ;;  %v2591_v58 = vsub.f32 %v2583_v5, %v2589_v54  ;;  %v2723_v5 = vmul.f32 1.442695, %v2721_v13 }
0x104b   :  { %v2594_v57 = vmul.f32 1.442695, %v2591_v58 }
0x104c   :  { %v2461_v59 = vpop.xlane.xlu0 %2460 }
0x104d   :  { %5210 = vpow2.f32 %v2594_v57  ;;  %v2465_v48 = vsub.f32 %v2457_v25, %v2461_v59 }
0x104f   :  { %v2467_v4 = vmul.f32 1.442695, %v2465_v48 }
0x1050   :  { %v2586_v60 = vpop.xlane.xlu0 %2585 }
0x1051   :  { %v2590_v6 = vsub.f32 %v2582_v33, %v2586_v60 }
0x1053   :  { %v5912_v61 = vpop.eup %5208  ;;  %v2592_v55 = vmul.f32 1.442695, %v2590_v6 }
0x1054   :  { %v2720_v62 = vpop.xlane.xlu0 %2719  ;;  %v2474_v63 = vsel %vm765_vm13, %v5912_v61, 0.0 }
0x1055   :  { %v2722_v1 = vsub.f32 %v2714_v40, %v2720_v62  ;;  %2475 = vadd.xlane.f32.xlu0 %v2474_v63 }
0x1057   :  { %v5916_v27 = vpop.eup %5210  ;;  %v2725_v8 = vmul.f32 1.442695, %v2722_v1 }
0x1058   :  { %v2848_v11 = vpop.xlane.xlu0 %2847  ;;  %v2599_v12 = vsel %vm765_vm13, %v5916_v27, 0.0 }
0x1059   :  { %5212 = vpow2.f32 %v2725_v8  ;;  %2600 = vadd.xlane.f32.xlu0 %v2599_v12  ;;  %v2852_v17 = vsub.f32 %v2844_v45, %v2848_v11 }
0x105a   :  { %5214 = vpow2.f32 %v2467_v4 }
0x105b   :  { %5216 = vpow2.f32 %v2592_v55  ;;  %v2854_v20 = vmul.f32 1.442695, %v2852_v17 }
0x105c   :  { %v2851_v0 = vpop.xlane.xlu0 %2850 }
0x105d   :  { %v2853_v15 = vsub.f32 %v2845_v49, %v2851_v0 }
0x105f   :  { %v2856_v19 = vmul.f32 1.442695, %v2853_v15 }
0x1061   :  { %5218 = vpow2.f32 %v2856_v19 }
0x1062   :  { %5220 = vpow2.f32 %v2723_v5 }
0x1063   :  { %v5921_v16 = vpop.eup %5212  ;;  %5222 = vpow2.f32 %v2854_v20 }
0x1064   :  { %v2730_v21 = vsel %vm765_vm13, %v5921_v16, 0.0  ;;  %v5215_v24 = vpop.eup %5214 }
0x1065   :  { %2731 = vadd.xlane.f32.xlu0 %v2730_v21  ;;  %v2471_v14 = vsel %vm765_vm13, %v5215_v24, 0.0  ;;  %v5217_v25 = vpop.eup %5216 }
0x1066   :  { %v2596_v29 = vsel %vm765_vm13, %v5217_v25, 0.0 }
0x1069   :  { %2472 = vadd.xlane.f32.xlu0 %v2471_v14  ;;  %v3002_v14 = vld [vmem:[%s6148_s23 + $0x18] sm:$0xff] }
0x106b   :  { %v5926_v26 = vpop.eup %5218 }
0x106c   :  { %v2861_v31 = vsel %vm765_vm13, %v5926_v26, 0.0  ;;  %v5221_v32 = vpop.eup %5220 }
0x106d   :  { %2597 = vadd.xlane.f32.xlu0 %v2596_v29  ;;  %2862 = vadd.xlane.f32.xlu1 %v2861_v31  ;;  %v2727_v33 = vsel %vm765_vm13, %v5221_v32, 0.0  ;;  %v5223_v34 = vpop.eup %5222 }
0x106e   :  { %v2858_v35 = vsel %vm765_vm13, %v5223_v34, 0.0 }
0x1071   :  { %2728 = vadd.xlane.f32.xlu0 %v2727_v33  ;;  %v3004_v33 = vld [vmem:[%s6149_s22 + $0x8] sm:$0xff] }
0x1075   :  { %2859 = vadd.xlane.f32.xlu0 %v2858_v35 }
0x107e   :  { %5100 = vrot.lane.b32.xlu1 %v5877_v43, %s5387_s0 }
0x1082   :  { %5105 = vrot.lane.b32.xlu1 %v5877_v43, %s5397_s14 }
0x108b   :  { %5095 = vrot.lane.b32.xlu0 %v5877_v43, %s5391_s29 }
0x10e2   :  { %v2476_v23 = vpop.xlane.xlu0 %2475 }
0x10e3   :  { %5224 = vrcp.f32 %v2476_v23  ;;  %v3008_v23 = vld [vmem:[%s6150_s26 + $0x8] sm:$0xff] }
0x10e6   :  { %v2601_v36 = vpop.xlane.xlu0 %2600 }
0x10ed   :  { %v5225_v51 = vpop.eup %5224 }
0x10ee   :  { %v2480_v54 = vmul.f32 %v5225_v51, %v5912_v61 }
0x10f2   :  { %v2732_v40 = vpop.xlane.xlu0 %2731 }
0x10f6   :  { %v2473_v42 = vpop.xlane.xlu0 %2472 }
0x10f7   :  { %5226 = vrcp.f32 %v2473_v42 }
0x10fa   :  { %v2863_v22 = vpop.xlane.xlu1 %2862  ;;  %v2598_v44 = vpop.xlane.xlu0 %2597 }
0x10fb   :  { %5228 = vrcp.f32 %v2598_v44 }
0x10fc   :  { %5230 = vrcp.f32 %v2732_v40  ;;  %v3006_v40 = vld [vmem:[%s6149_s22 + $0x18] sm:$0xff] }
0x10fe   :  { %v5101_v45 = vpop.permute.xlu1 %5100  ;;  %v2729_v46 = vpop.xlane.xlu0 %2728 }
0x10ff   :  { %v5103_v47 = vunpack.i.h.bf16 %v5101_v45  ;;  %v5102_v49 = vunpack.i.l.bf16 %v5101_v45  ;;  %5232 = vrcp.f32 %v2729_v46 }
0x1100   :  { %5234 = vrcp.f32 %v2601_v36  ;;  %v3005_v36 = vld [vmem:[%s6149_s22 + $0x10] sm:$0xff] }
0x1101   :  { %v5227_v52 = vpop.eup %5226  ;;  %v4929_v30 = vpack.c.bf16 %v5103_v47, %v5102_v49  ;;  %v4949_v44 = vpack.c.bf16 %v3006_v40, %v3005_v36 }
0x1102   :  { %v2860_v43 = vpop.xlane.xlu0 %2859  ;;  %v2479_v41 = vmul.f32 %v5227_v52, %v5215_v24  ;;  %v5106_v58 = vpop.permute.xlu1 %5105  ;;  %v3001_v24 = vld [vmem:[%s6148_s23 + $0x10] sm:$0xff] }
0x1103   :  { %5236 = vrcp.f32 %v2860_v43  ;;  %4930 = vmatprep.subr.bf16.mxu1 %v4929_v30  ;;  %v5108_v59 = vunpack.i.h.bf16 %v5106_v58  ;;  %v5107_v48 = vunpack.i.l.bf16 %v5106_v58  ;;  %v4372_v43 = vld [vmem:[%s6151_s1] ss:$0 sm:$0xff] }
0x1104   :  { %5238 = vrcp.f32 %v2863_v22  ;;  %4709 = vmatprep.mubr.msk.f32.mxu0 %vm765_vm13, %v2479_v41  ;;  %4932 = vmatpush3.bf16.msra.mxu1 %v4929_v30 }
0x1105   :  { %4710 = vmatmul.mubr.msk.f32.vlgmr.msra.gmra.mrb[20].mxu0 %vm765_vm13, %v2480_v54  ;;  %v5229_v57 = vpop.eup %5228  ;;  %v4933_v12 = vpack.c.bf16 %v5108_v59, %v5107_v48 }
0x1106   :  { %v5096_v60 = vpop.permute.xlu0 %5095  ;;  %v2604_v1 = vmul.f32 %v5229_v57, %v5217_v25  ;;  %v5231_v4 = vpop.eup %5230 }
0x1107   :  { %v5098_v62 = vunpack.i.h.bf16 %v5096_v60  ;;  %v5097_v63 = vunpack.i.l.bf16 %v5096_v60  ;;  %v2736_v11 = vmul.f32 %v5231_v4, %v5921_v16  ;;  %v3000_v16 = vld [vmem:[%s6148_s23 + $0x8] sm:$0xff]  ;;  %v3010_v4 = vld [vmem:[%s6150_s26 + $0x18] sm:$0xff] }
0x1108   :  { %4716 = vmatprep.mubr.msk.f32.mxu0 %vm765_vm13, %v2604_v1  ;;  %v3009_v1 = vld [vmem:[%s6150_s26 + $0x10] sm:$0xff] }
0x1109   :  { %v5233_v6 = vpop.eup %5232  ;;  %v4925_v8 = vpack.c.bf16 %v5098_v62, %v5097_v63 }
0x110a   :  { %v5235_v61 = vpop.eup %5234  ;;  %v2735_v9 = vmul.f32 %v5233_v6, %v5221_v32  ;;  %v3003_v32 = vld [vmem:[%s6149_s22] sm:$0xff] }
0x110b   :  { %4926 = vmatprep.subr.bf16.mxu0 %v4925_v8  ;;  %v2605_v55 = vmul.f32 %v5235_v61, %v5916_v27  ;;  %v2999_v27 = vld [vmem:[%s6148_s23] sm:$0xff]  ;;  %v4945_v35 = vpack.c.bf16 %v3004_v33, %v3003_v32  ;;  %v4957_v61 = vpack.c.bf16 %v3010_v4, %v3009_v1 }
0x110c   :  { %4928 = vmatpush3.bf16.msra.mxu0 %v4925_v8  ;;  %4723 = vmatprep.mubr.msk.f32.mxu1 %vm765_vm13, %v2735_v9  ;;  %v4937_v21 = vpack.c.bf16 %v3000_v16, %v2999_v27 }
0x110d   :  { %v5237_v13 = vpop.eup %5236  ;;  %4724 = vmatmul.mubr.msk.f32.vlgmr.msra.gmra.mrb[18].mxu1 %vm765_vm13, %v2736_v11  ;;  %4934 = vmatprep.subr.bf16.mxu0 %v4933_v12 }
0x110e   :  { %v5239_v0 = vpop.eup %5238  ;;  %v2866_v15 = vmul.f32 %v5237_v13, %v5223_v34  ;;  %4938 = vmatprep.subr.bf16.mxu1 %v4937_v21  ;;  %v3007_v34 = vld [vmem:[%s6150_s26] sm:$0xff] }
0x110f   :  { %4717 = vmatmul.mubr.msk.f32.vlgmr.msra.gmra.mrb[22].mxu0 %vm765_vm13, %v2605_v55  ;;  %v2867_v5 = vmul.f32 %v5239_v0, %v5926_v26  ;;  %v4941_v26 = vpack.c.bf16 %v3002_v14, %v3001_v24  ;;  %4940 = vmatpush3.bf16.msra.mxu1 %v4937_v21  ;;  %v4953_v22 = vpack.c.bf16 %v3008_v23, %v3007_v34 }
0x1110   :  { %4936 = vmatpush3.bf16.msra.mxu0 %v4933_v12  ;;  %4730 = vmatprep.mubr.msk.f32.mxu0 %vm765_vm13, %v2866_v15 }
0x1111   :  { %4942 = vmatprep.subr.bf16.mxu1 %v4941_v26  ;;  %4946 = vmatprep.subr.bf16.mxu0 %v4945_v35 }
0x1113   :  { %4731 = vmatmul.mubr.msk.f32.vlgmr.msra.gmra.mrb[24].mxu0 %vm765_vm13, %v2867_v5  ;;  %4944 = vmatpush3.bf16.msra.mxu1 %v4941_v26 }
0x1114   :  { %4954 = vmatprep.subr.bf16.mxu1 %v4953_v22  ;;  %4948 = vmatpush3.bf16.msra.mxu0 %v4945_v35 }
0x1115   :  { %4950 = vmatprep.subr.bf16.mxu0 %v4949_v44 }
0x1118   :  { %4952 = vmatpush3.bf16.msra.mxu0 %v4949_v44 }
0x11d8   :  { %v4711_v17 = vpop.f32.mrb[20].mxu0 }
0x11d9   :  { %v2553_v19 = vpop.f32.mrb[21].mxu0 }
0x11e0   :  { %v4725_v20 = vpop.f32.mrb[18].mxu1 }
0x11e1   :  { %2967 = vrot.lane.b32.xlu1 %v4725_v20, %s5388_s13  ;;  %v2815_v25 = vpop.f32.mrb[19].mxu1 }
0x11e2   :  { %2965 = vrot.lane.b32.xlu0 %v2815_v25, %s5388_s13  ;;  %v4718_v29 = vpop.f32.mrb[22].mxu0 }
0x11e3   :  { %v2684_v31 = vpop.f32.mrb[23].mxu0 }
0x11e5   :  { %2959 = vrot.lane.b32.xlu1 %v4718_v29, %s5389_s17 }
0x11e6   :  { %2957 = vrot.lane.b32.xlu0 %v2684_v31, %s5389_s17  ;;  %v4732_v42 = vpop.f32.mrb[24].mxu0  ;;  %s5401_s17 = smov [#allocation3]  }
0x11e7   :  { %v2946_v45 = vpop.f32.mrb[25].mxu0  ;;  %s4244_s21 = sshll.u32 %s5401_s17, 4  ;;  %s4245_s21 = int_to_ptr.vmem [resolvable:$true] %s4244_s21 }
0x11e9   :  { %2975 = vrot.lane.b32.xlu1 %v4732_v42, %s5398_s12 }
0x11ea   :  { %2973 = vrot.lane.b32.xlu0 %v2946_v45, %s5398_s12 }
0x1253   :  { %v2968_v46 = vpop.permute.xlu1 %2967 }
0x1254   :  { %v2966_v47 = vpop.permute.xlu0 %2965 }
0x1257   :  { %v2960_v49 = vpop.permute.xlu1 %2959 }
0x1258   :  { %v2980_v51 = vsel %vm200_vm0, %v4711_v17, %v2960_v49  ;;  %v2958_v52 = vpop.permute.xlu0 %2957 }
0x1259   :  { %v2979_v30 = vsel %vm200_vm0, %v2553_v19, %v2958_v52  ;;  %v2982_v41 = vsel %vm765_vm13, %v2980_v51, %v2968_v46 }
0x125a   :  { %v2981_v57 = vsel %vm765_vm13, %v2979_v30, %v2966_v47 }
0x125b   :  { %v2976_v54 = vpop.permute.xlu1 %2975 }
0x125c   :  { %v2984_v58 = vsel %vm1290_vm6, %v2982_v41, %v2976_v54  ;;  %v2974_v59 = vpop.permute.xlu0 %2973 }
0x125d   :  { %v2992_v60 = vadd.f32 %v4372_v43, %v2984_v58  ;;  %v2983_v48 = vsel %vm1290_vm6, %v2981_v57, %v2974_v59 }
0x125e   :  { %v2991_v62 = vadd.f32 %v4372_v43, %v2983_v48 }
0x125f   :  { %v2996_v63 = vmul.f32 0.01, %v2992_v60  ;;  %vm2994_vm4 = vcmp.ge.f32.partialorder %v2992_v60, 0.0 }
0x1260   :  { %v2995_v6 = vmul.f32 0.01, %v2991_v62  ;;  %vm2993_vm5 = vcmp.ge.f32.partialorder %v2991_v62, 0.0 }
0x1261   :  { %v2998_v9 = vsel %vm2994_vm4, %v2992_v60, %v2996_v63 }
0x1262   :  { %v2997_v8 = vsel %vm2993_vm5, %v2991_v62, %v2995_v6 }
0x1263   :  { %4741 = vmatprep.mubr.msk.f32.mxu1 %vm552_vm8, %v2997_v8 }
0x1264   :  { %4742 = vmatmul.mubr.msk.f32.vlgmr.msra.gmra.mrb[20].mxu1 %vm552_vm8, %v2998_v9 }
0x1265   :  { %4956 = vmatpush3.bf16.msra.mxu1 %v4953_v22 }
0x1266   :  { %4958 = vmatprep.subr.bf16.mxu1 %v4957_v61 }
0x1269   :  { %4960 = vmatpush3.bf16.msra.mxu1 %v4957_v61 }
0x126a   :  { %4794 = vmatprep.subr.mxu1 %v5384_v3 }
0x1337   :  { %v4743_v11 = vpop.f32.mrb[20].mxu1 }
0x1338   :  { %v3084_v12 = vpop.f32.mrb[21].mxu1 }
0x1339   :  { %4752 = vmatprep.mubr.msk.f32.mxu0 %vm552_vm8, %v3084_v12  ;;  %4763 = vmatprep.mubr.msk.f32.mxu1 %vm552_vm8, %v3084_v12  ;;  %v5981_v13 = vpack.i.bf16 %v4743_v11, %v3084_v12  ;;  %v5985_v55 = vpack.c.bf16 %v4743_v11, %v3084_v12 }
0x133a   :  { %4753 = vmatmul.mubr.msk.f32.vlgmr.msra.gmra.mrb[26].mxu0 %vm552_vm8, %v4743_v11  ;;  %4764 = vmatmul.mubr.msk.f32.vlgmr.msra.gmra.mrb[22].mxu1 %vm552_vm8, %v4743_v11 }
0x133b   :  { %4796 = vmatprep.mubr.msk.f32.mxu1 %vm5385_vm1, %v5384_v3 }
0x140d   :  { %v4754_v0 = vpop.f32.mrb[26].mxu0  ;;  %v4765_v15 = vpop.f32.mrb[22].mxu1 }
0x140e   :  { %3332 = vperm.xlu1 %5110, %v4765_v15   ;;  %v3165_v5 = vpop.f32.mrb[27].mxu0  ;;  %v3240_v17 = vpop.f32.mrb[23].mxu1 }
0x140f   :  { %3328 = vperm.xlu0 %5109, %v3240_v17  }
0x1412   :  { %5112 = vset.pattern.permute.xlu1 %v5395_v28 }
0x1413   :  { %3592 = vperm.xlu1 %5112, %v4765_v15   ;;  %5111 = vset.pattern.permute.xlu0 %v5393_v18 }
0x1414   :  { %3462 = vperm.xlu0 %5111, %v4765_v15  }
0x1417   :  { %5113 = vset.pattern.permute.xlu1 %v5393_v18 }
0x1418   :  { %3458 = vperm.xlu1 %5113, %v3240_v17   ;;  %5115 = vset.pattern.permute.xlu0 %v5386_v7 }
0x1419   :  { %3283 = vperm.xlu0 %5115, %v3240_v17  }
0x141c   :  { %5114 = vset.pattern.permute.xlu1 %v5395_v28 }
0x141d   :  { %3588 = vperm.xlu1 %5114, %v3240_v17  }
0x1421   :  { %5116 = vset.pattern.permute.xlu1 %v5386_v7 }
0x1422   :  { %3288 = vperm.xlu1 %5116, %v4765_v15  }
0x144b   :  { %3249 = vxpose.xlu1.b32.start [1/2] (short) (narrow) %v3165_v5, 8 }
0x144f   :  { %3250 = vxpose.xlu1.b32.end [2/2] (short) (narrow) %v4754_v0, 8 }
0x148d   :  { %v3333_v19 = vpop.permute.xlu1 %3332 }
0x148e   :  { %v3329_v24 = vpop.permute.xlu0 %3328 }
0x1492   :  { %v3593_v27 = vpop.permute.xlu1 %3592 }
0x1493   :  { %v3463_v34 = vpop.permute.xlu0 %3462 }
0x1497   :  { %v3459_v16 = vpop.permute.xlu1 %3458 }
0x1498   :  { %v3284_v54 = vpop.permute.xlu0 %3283 }
0x149c   :  { %v3589_v20 = vpop.permute.xlu1 %3588 }
0x14a1   :  { %v3289_v21 = vpop.permute.xlu1 %3288 }
0x14cb   :  { %v3265_v14 = vpop.trf.xlu1 }
0x14cc   :  { %v3338_v18 = vrot.slane %v3265_v14, %v5671_v38  ;;  %v3468_v25 = vrot.slane %v3265_v14, %v5673_v39  ;;  %v3598_v26 = vrot.slane %v3265_v14, %v5680_v50  ;;  %v3294_v22 = vrot.slane %v3265_v14, %v5669_v37 }
0x14ce   :  { %v3339_v28 = vadd.f32 %v3338_v18, %v3329_v24  ;;  %v3340_v29 = vadd.f32 %v3338_v18, %v3333_v19  ;;  %v3469_v31 = vadd.f32 %v3468_v25, %v3459_v16  ;;  %v3599_v7 = vadd.f32 %v3598_v26, %v3589_v20 }
0x14cf   :  { %v3470_v23 = vadd.f32 %v3468_v25, %v3463_v34  ;;  %v3600_v46 = vadd.f32 %v3598_v26, %v3593_v27  ;;  %v3296_v43 = vadd.f32 %v3294_v22, %v3289_v21  ;;  %v3295_v59 = vadd.f32 %v3294_v22, %v3284_v54 }
0x14d0   :  { %vm3341_vm8 = vcmp.ge.f32.partialorder %v3339_v28, 0.0  ;;  %v3343_v32 = vmul.f32 0.2, %v3339_v28  ;;  %vm3342_vm6 = vcmp.ge.f32.partialorder %v3340_v29, 0.0  ;;  %v3344_v33 = vmul.f32 0.2, %v3340_v29 }
0x14d1   :  { %vm3601_vm7 = vcmp.ge.f32.partialorder %v3599_v7, 0.0  ;;  %v3603_v35 = vmul.f32 0.2, %v3599_v7  ;;  %v3473_v42 = vmul.f32 0.2, %v3469_v31  ;;  %vm3471_vm9 = vcmp.ge.f32.partialorder %v3469_v31, 0.0 }
0x14d2   :  { %v3345_v36 = vsel %vm3341_vm8, %v3339_v28, %v3343_v32  ;;  %v3346_v40 = vsel %vm3342_vm6, %v3340_v29, %v3344_v33  ;;  %v3474_v51 = vmul.f32 0.2, %v3470_v23  ;;  %vm3472_vm10 = vcmp.ge.f32.partialorder %v3470_v23, 0.0 }
0x14d3   :  { %v3605_v38 = vsel %vm3601_vm7, %v3599_v7, %v3603_v35  ;;  %v3347_v39 = vadd.f32 %v3345_v36, %v5684_v56  ;;  %v3348_v45 = vadd.f32 %v3346_v40, %v5682_v53  ;;  %v3475_v49 = vsel %vm3471_vm9, %v3469_v31, %v3473_v42 }
0x14d4   :  { %v6000_v50 = vadd.f32 %v3605_v38, %v5684_v56  ;;  %v3477_v30 = vadd.f32 %v3475_v49, %v5684_v56  ;;  %v3476_v37 = vsel %vm3472_vm10, %v3470_v23, %v3474_v51  ;;  %v3604_v41 = vmul.f32 0.2, %v3600_v46 }
0x14d5   :  { %v3349_v44 = vsel %vm765_vm13, %v3347_v39, -inf  ;;  %v3352_v52 = vsel %vm765_vm13, %v3348_v45, -inf  ;;  %vm3602_vm11 = vcmp.ge.f32.partialorder %v3600_v46, 0.0  ;;  %v3478_v57 = vadd.f32 %v3476_v37, %v5682_v53 }
0x14d6   :  { %v3609_v47 = vsel %vm765_vm13, %v6000_v50, -inf  ;;  %3350 = vmax.xlane.f32.xlu0 %v3349_v44  ;;  %v3479_v58 = vsel %vm765_vm13, %v3477_v30, -inf  ;;  %v3606_v60 = vsel %vm3602_vm11, %v3600_v46, %v3604_v41  ;;  %v3300_v48 = vmul.f32 0.2, %v3296_v43 }
0x14d7   :  { %3610 = vmax.xlane.f32.xlu1 %v3609_v47  ;;  %vm3298_vm12 = vcmp.ge.f32.partialorder %v3296_v43, 0.0  ;;  %v3482_v62 = vsel %vm765_vm13, %v3478_v57, -inf  ;;  %v3608_v63 = vadd.f32 %v3606_v60, %v5682_v53  ;;  %v3299_v4 = vmul.f32 0.2, %v3295_v59 }
0x14d8   :  { %v3302_v1 = vsel %vm3298_vm12, %v3296_v43, %v3300_v48  ;;  %vm3297_vm14 = vcmp.ge.f32.partialorder %v3295_v59, 0.0 }
0x14d9   :  { %v3612_v6 = vsel %vm765_vm13, %v3608_v63, -inf  ;;  %v3304_v8 = vadd.f32 %v3302_v1, %v5682_v53  ;;  %v3301_v61 = vsel %vm3297_vm14, %v3295_v59, %v3299_v4 }
0x14da   :  { %3353 = vmax.xlane.f32.xlu0 %v3352_v52  ;;  %v3303_v11 = vadd.f32 %v3301_v61, %v5684_v56 }
0x14db   :  { %v3308_v9 = vsel %vm765_vm13, %v3304_v8, -inf }
0x14dc   :  { %v3305_v12 = vsel %vm765_vm13, %v3303_v11, -inf }
0x14de   :  { %3480 = vmax.xlane.f32.xlu0 %v3479_v58 }
0x14e2   :  { %3483 = vmax.xlane.f32.xlu0 %v3482_v62 }
0x14e6   :  { %3613 = vmax.xlane.f32.xlu0 %v3612_v6 }
0x14ea   :  { %3309 = vmax.xlane.f32.xlu0 %v3308_v9 }
0x14ee   :  { %3306 = vmax.xlane.f32.xlu0 %v3305_v12 }
0x1504   :  { %5118 = vrot.lane.b32.xlu0 %v5981_v13, %s5391_s29 }
0x1563   :  { %v3351_v0 = vpop.xlane.xlu0 %3350 }
0x1564   :  { %v3355_v16 = vsub.f32 %v3347_v39, %v3351_v0  ;;  %v3611_v26 = vpop.xlane.xlu1 %3610 }
0x1565   :  { %v3615_v7 = vsub.f32 %v6000_v50, %v3611_v26 }
0x1566   :  { %v3357_v14 = vmul.f32 1.442695, %v3355_v16 }
0x1567   :  { %v3354_v15 = vpop.xlane.xlu0 %3353  ;;  %v3617_v36 = vmul.f32 1.442695, %v3615_v7 }
0x1568   :  { %v3356_v5 = vsub.f32 %v3348_v45, %v3354_v15 }
0x156a   :  { %v3359_v17 = vmul.f32 1.442695, %v3356_v5 }
0x156b   :  { %v3481_v19 = vpop.xlane.xlu0 %3480 }
0x156c   :  { %5240 = vpow2.f32 %v3359_v17  ;;  %v3485_v18 = vsub.f32 %v3477_v30, %v3481_v19 }
0x156e   :  { %v3487_v32 = vmul.f32 1.442695, %v3485_v18 }
0x156f   :  { %v3484_v53 = vpop.xlane.xlu0 %3483 }
0x1570   :  { %v3486_v27 = vsub.f32 %v3478_v57, %v3484_v53 }
0x1572   :  { %v3489_v20 = vmul.f32 1.442695, %v3486_v27 }
0x1573   :  { %v3614_v21 = vpop.xlane.xlu0 %3613 }
0x1574   :  { %5242 = vpow2.f32 %v3489_v20  ;;  %v3616_v56 = vsub.f32 %v3608_v63, %v3614_v21 }
0x1576   :  { %v6020_v24 = vpop.eup %5240  ;;  %v3619_v25 = vmul.f32 1.442695, %v3616_v56 }
0x1577   :  { %v3310_v28 = vpop.xlane.xlu0 %3309  ;;  %v3364_v29 = vsel %vm765_vm13, %v6020_v24, 0.0 }
0x1578   :  { %5244 = vpow2.f32 %v3619_v25  ;;  %v3312_v31 = vsub.f32 %v3304_v8, %v3310_v28  ;;  %3365 = vadd.xlane.f32.xlu0 %v3364_v29  ;;  %v3810_v28 = vld [vmem:[%s6152_s28] sm:$0xff] }
0x1579   :  { %5246 = vpow2.f32 %v3357_v14  ;;  %4795 = vmatpush3.msra.mxu1 %v3810_v28  ;;  %v4387_v29 = vld [vmem:[%s6153_s2] ss:$0 sm:$0xff] }
0x157a   :  { %v3315_v33 = vmul.f32 1.442695, %v3312_v31  ;;  %4799 = vmatprep.subr.mxu1 %v5384_v3 }
0x157b   :  { %v3307_v34 = vpop.xlane.xlu0 %3306 }
0x157c   :  { %5248 = vpow2.f32 %v3315_v33  ;;  %v3311_v35 = vsub.f32 %v3303_v11, %v3307_v34  ;;  %v3811_v34 = vld [vmem:[%s6154_s10] sm:$0xff] }
0x157d   :  { %5250 = vpow2.f32 %v3487_v32 }
0x157e   :  { %v6025_v23 = vpop.eup %5242  ;;  %v3313_v40 = vmul.f32 1.442695, %v3311_v35 }
0x157f   :  { %v5119_v42 = vpop.permute.xlu0 %5118  ;;  %v3494_v38 = vsel %vm765_vm13, %v6025_v23, 0.0 }
0x1580   :  { %5252 = vpow2.f32 %v3313_v40  ;;  %v5121_v39 = vunpack.i.h.bf16 %v5119_v42  ;;  %v5120_v22 = vunpack.i.l.bf16 %v5119_v42  ;;  %3495 = vadd.xlane.f32.xlu0 %v3494_v38 }
0x1581   :  { %5254 = vpow2.f32 %v3617_v36  ;;  %v3813_v36 = vld [vmem:[%s6156_s11] sm:$0xff] }
0x1582   :  { %v6029_v50 = vpop.eup %5244  ;;  %v4961_v44 = vpack.c.bf16 %v5121_v39, %v5120_v22  ;;  %v5399_v22 = vmov 1.0  }
0x1583   :  { %v3624_v45 = vsel %vm765_vm13, %v6029_v50, 0.0  ;;  %v5247_v46 = vpop.eup %5246 }
0x1584   :  { %3625 = vadd.xlane.f32.xlu0 %v3624_v45  ;;  %4962 = vmatprep.subr.bf16.mxu0 %v4961_v44  ;;  %v3361_v51 = vsel %vm765_vm13, %v5247_v46, 0.0  ;;  %v4394_v45 = vld [vmem:[#allocation2] ss:$0 sm:$0xff] }
0x1585   :  { %4964 = vmatpush3.bf16.msra.mxu0 %v4961_v44 }
0x1586   :  { %v6033_v47 = vpop.eup %5248 }
0x1587   :  { %v3320_v49 = vsel %vm765_vm13, %v6033_v47, 0.0  ;;  %v5251_v52 = vpop.eup %5250 }
0x1588   :  { %3321 = vadd.xlane.f32.xlu1 %v3320_v49  ;;  %3362 = vadd.xlane.f32.xlu0 %v3361_v51  ;;  %v3491_v43 = vsel %vm765_vm13, %v5251_v52, 0.0 }
0x158a   :  { %v6038_v30 = vpop.eup %5252 }
0x158b   :  { %v3317_v37 = vsel %vm765_vm13, %v6038_v30, 0.0  ;;  %v5255_v41 = vpop.eup %5254 }
0x158c   :  { %3492 = vadd.xlane.f32.xlu0 %v3491_v43  ;;  %3318 = vadd.xlane.f32.xlu1 %v3317_v37  ;;  %v3621_v54 = vsel %vm765_vm13, %v5255_v41, 0.0 }
0x1590   :  { %3622 = vadd.xlane.f32.xlu0 %v3621_v54 }
0x159d   :  { %5123 = vrot.lane.b32.xlu1 %v5981_v13, %s5387_s0  ;;  %s5400_s0 = smov [#allocation5]  }
0x159e   :  { %s4254_s13 = sshll.u32 %s5400_s0, 4  ;;  %s4255_s13 = int_to_ptr.vmem [resolvable:$true] %s4254_s13 }
0x159f   :  { %s5276_s25 = scalar_lea.vmem %s4255_s13, 64  ;;  %p5281_p1 = scmp.lt.s32.totalorder %s4255_s13, %s4255_s13 }
0x15a0   :  { %p5277_p0 = scmp.ne.s32.totalorder %s4255_s13, %s5276_s25  ;;  %p5282_p2 = scmp.lt.s32.totalorder %s5276_s25, %s5276_s25 }
0x15a1   :  { %437 = vrot.lane.b32.xlu1 %v5644_v2, %s5391_s29 }
0x15a2   :  { %p5283_p3 = por %p5282_p2, %p5281_p1 }
0x15a4   :  { %p5284_p4 = pnand %p5283_p3, %p5277_p0 }
0x15a6   :  { %5128 = vrot.lane.b32.xlu0 %v5981_v13, %s5397_s14 }
0x15aa   :  { %431 = vrot.lane.b32.xlu0 %v5647_v10, %s5391_s29 }
0x1605   :  { %v3366_v58 = vpop.xlane.xlu0 %3365 }
0x1606   :  { %5256 = vrcp.f32 %v3366_v58 }
0x160d   :  { %v3496_v57 = vpop.xlane.xlu0 %3495 }
0x1610   :  { %v5257_v13 = vpop.eup %5256 }
0x1611   :  { %v3626_v59 = vpop.xlane.xlu0 %3625  ;;  %v3370_v15 = vmul.f32 %v5257_v13, %v6020_v24 }
0x1615   :  { %v3322_v60 = vpop.xlane.xlu1 %3321  ;;  %v3363_v48 = vpop.xlane.xlu0 %3362 }
0x1616   :  { %5258 = vrcp.f32 %v3363_v48 }
0x1619   :  { %v3319_v62 = vpop.xlane.xlu1 %3318  ;;  %v3493_v63 = vpop.xlane.xlu0 %3492 }
0x161a   :  { %5260 = vrcp.f32 %v3493_v63 }
0x161b   :  { %5262 = vrcp.f32 %v3496_v57 }
0x161d   :  { %v5124_v1 = vpop.permute.xlu1 %5123  ;;  %v3623_v4 = vpop.xlane.xlu0 %3622 }
0x161e   :  { %v5126_v2 = vunpack.i.h.bf16 %v5124_v1  ;;  %v5125_v6 = vunpack.i.l.bf16 %v5124_v1  ;;  %5264 = vrcp.f32 %v3623_v4 }
0x161f   :  { %5266 = vrcp.f32 %v3626_v59 }
0x1620   :  { %v4965_v8 = vpack.c.bf16 %v5126_v2, %v5125_v6  ;;  %v5259_v10 = vpop.eup %5258  ;;  %5268 = vrcp.f32 %v3319_v62 }
0x1621   :  { %v438_v61 = vpop.permute.xlu1 %437  ;;  %v5129_v9 = vpop.permute.xlu0 %5128  ;;  %v3369_v0 = vmul.f32 %v5259_v10, %v5247_v46  ;;  %5270 = vrcp.f32 %v3322_v60 }
0x1622   :  { %440 = vst.msk [vmem:[#allocation5] sm:$0xf] %vm434_vm15, %v438_v61  ;;  %v5131_v11 = vunpack.i.h.bf16 %v5129_v9  ;;  %v5130_v12 = vunpack.i.l.bf16 %v5129_v9  ;;  %4966 = vmatprep.subr.bf16.mxu0 %v4965_v8 }
0x1623   :  { %4770 = vmatprep.mubr.msk.f32.mxu0 %vm765_vm13, %v3369_v0 }
0x1624   :  { %v4969_v5 = vpack.c.bf16 %v5131_v11, %v5130_v12  ;;  %v5261_v17 = vpop.eup %5260  ;;  %4771 = vmatmul.mubr.msk.f32.vlgmr.msra.gmra.mrb[28].mxu0 %vm765_vm13, %v3370_v15 }
0x1625   :  { %v432_v19 = vpop.permute.xlu0 %431  ;;  %4968 = vmatpush3.bf16.msra.mxu0 %v4965_v8  ;;  %v3499_v53 = vmul.f32 %v5261_v17, %v5251_v52  ;;  %v5263_v27 = vpop.eup %5262 }
0x1626   :  { %435 = vst.msk [vmem:[#allocation3] sm:$0xf] %vm434_vm15, %v432_v19  ;;  %4970 = vmatprep.subr.bf16.mxu0 %v4969_v5  ;;  %v3500_v20 = vmul.f32 %v5263_v27, %v6025_v23  ;;  %v3812_v23 = vld [vmem:[%s6155_s7] sm:$0xff] }
0x1627   :  { %4777 = vmatprep.mubr.msk.f32.mxu0 %vm765_vm13, %v3499_v53 }
0x1628   :  { %v5265_v16 = vpop.eup %5264 }
0x1629   :  { %v3629_v21 = vmul.f32 %v5265_v16, %v5255_v41  ;;  %v5267_v56 = vpop.eup %5266 }
0x162a   :  { %v5269_v24 = vpop.eup %5268  ;;  %v3630_v14 = vmul.f32 %v5267_v56, %v6029_v50 }
0x162b   :  { %v3325_v18 = vmul.f32 %v5269_v24, %v6038_v30  ;;  %v5271_v25 = vpop.eup %5270 }
0x162c   :  { %4778 = vmatmul.mubr.msk.f32.vlgmr.msra.gmra.mrb[28].mxu0 %vm765_vm13, %v3500_v20  ;;  %v3326_v26 = vmul.f32 %v5271_v25, %v6033_v47 }
0x162d   :  { %4972 = vmatpush3.bf16.msra.mxu0 %v4969_v5  ;;  %4784 = vmatprep.mubr.msk.f32.mxu0 %vm765_vm13, %v3629_v21 }
0x162e   :  { %4974 = vmatprep.subr.bf16.mxu0 %v5985_v55 }
0x1634   :  { %4785 = vmatmul.mubr.msk.f32.vlgmr.msra.gmra.mrb[28].mxu0 %vm765_vm13, %v3630_v14 }
0x1635   :  { %4976 = vmatpush3.bf16.msra.mxu0 %v5985_v55  ;;  %4791 = vmatprep.mubr.msk.f32.mxu0 %vm765_vm13, %v3325_v18 }
0x1636   :  { %4809 = vmatprep.subr.mxu0 %v5384_v3 }
0x163c   :  { %4792 = vmatmul.mubr.msk.f32.vlgmr.msra.gmra.mrb[28].mxu0 %vm765_vm13, %v3326_v26  ;;  %vm4108_vm13 = vcmask 1040384  }
0x163d   :  { %4811 = vmatprep.mubr.msk.f32.mxu0 %vm5385_vm1, %v5384_v3  ;;  %4810 = vmatpush3.msra.mxu0 %v3813_v36 }
0x170f   :  { %v4793_v55 = vpop.f32.mrb[28].mxu0 }
0x1710   :  { %v3799_v31 = vmul.f32 0.25, %v4793_v55  ;;  %v3789_v7 = vpop.f32.mrb[29].mxu0 }
0x1712   :  { %v3806_v32 = vadd.f32 %v4387_v29, %v3799_v31 }
0x1714   :  { %vm3807_vm2 = vcmp.ge.f32.partialorder %v3806_v32, 0.0  ;;  %v3808_v33 = vmul.f32 0.01, %v3806_v32 }
0x1716   :  { %v3809_v35 = vsel %vm3807_vm2, %v3806_v32, %v3808_v33 }
0x1717   :  { %4797 = vmatmul.mubr.msk.f32.vlgmr.msra.gmra.mrb[24].mxu1 %vm200_vm0, %v3809_v35 }
0x1718   :  { %4800 = vmatpush3.msra.mxu1 %v3811_v34  ;;  %4801 = vmatprep.mubr.msk.f32.mxu1 %vm5385_vm1, %v5384_v3 }
0x1719   :  { %4804 = vmatprep.subr.mxu1 %v5384_v3 }
0x171b   :  { %4802 = vmatmul.mubr.msk.f32.vlgmr.msra.gmra.mrb[26].mxu1 %vm200_vm0, %v3809_v35 }
0x171c   :  { %4806 = vmatprep.mubr.msk.f32.mxu1 %vm5385_vm1, %v5384_v3  ;;  %4805 = vmatpush3.msra.mxu1 %v3812_v23 }
0x171d   :  { %4814 = vmatprep.subr.mxu1 %v5384_v3 }
0x17ea   :  { %v3884_v40 = vpop.f32.mrb[24].mxu1 }
0x17eb   :  { %v4798_v42 = vpop.f32.mrb[25].mxu1  ;;  %4807 = vmatmul.mubr.msk.f32.vlgmr.msra.gmra.mrb[28].mxu1 %vm200_vm0, %v3884_v40 }
0x17ec   :  { %4816 = vmatprep.mubr.msk.f32.mxu1 %vm5385_vm1, %v5384_v3  ;;  %4815 = vmatpush3.msk.msra.mxu1 %vm4108_vm13, %v5399_v22 }
0x17ee   :  { %v3954_v38 = vpop.f32.mrb[26].mxu1 }
0x17ef   :  { %v4803_v39 = vpop.f32.mrb[27].mxu1  ;;  %4812 = vmatmul.mubr.msk.f32.vlgmr.msra.gmra.mrb[30].mxu0 %vm200_vm0, %v3954_v38 }
0x18be   :  { %v4027_v50 = vpop.f32.mrb[28].mxu1 }
0x18bf   :  { %4216 = vperm.xlu1 %5116, %v4027_v50   ;;  %v4808_v44 = vpop.f32.mrb[29].mxu1 }
0x18c2   :  { %v4100_v46 = vpop.f32.mrb[30].mxu0 }
0x18c3   :  { %4226 = vperm.xlu1 %5116, %v4394_v45   ;;  %v4813_v47 = vpop.f32.mrb[31].mxu0  ;;  %4817 = vmatmul.mubr.msk.f32.vlgmr.msra.gmra.mrb[30].mxu1 %vm4104_vm3, %v4100_v46 }
0x1996   :  { %v4178_v49 = vpop.f32.mrb[30].mxu1 }
0x1997   :  { %4182 = vxpose.xlu0.b32.start.end [1/1] (short) (narrow) %v4178_v49, 8  ;;  %v4818_v51 = vpop.f32.mrb[31].mxu1 }
0x1998   :  { %5287 = shalt.err (!%p5284_p4)
}
0x1999   :  { %s5288_s29 = scalar_lea.hbm %s5594_s4, 64 }
0x199a   :  { %p5289_p5 = scmp.ne.s32.totalorder %s5594_s4, %s5288_s29  ;;  %p5292_p6 = scmp.lt.u32.totalorder %s5288_s29, %s5594_s4 }
0x199c   :  { %p5294_p7 = pnand %p5292_p6, %p5289_p5 }
0x199e   :  { %5297 = shalt.err (!%p5294_p7)
}
0x199f   :  { %4257 = dma.vmem_to_hbm [thread:$0]  %s4255_s13, 64, %s5594_s4, [#allocation6]  }
0x19a0   :  { %s5298_s5 = scalar_lea.vmem %s4245_s21, 64  ;;  %p5303_p9 = scmp.lt.s32.totalorder %s4245_s21, %s4245_s21 }
0x19a1   :  { %p5299_p8 = scmp.ne.s32.totalorder %s4245_s21, %s5298_s5  ;;  %p5304_p10 = scmp.lt.s32.totalorder %s5298_s5, %s5298_s5 }
0x19a3   :  { %p5305_p11 = por %p5304_p10, %p5303_p9 }
0x19a5   :  { %p5306_p12 = pnand %p5305_p11, %p5299_p8 }
0x19a7   :  { %5309 = shalt.err (!%p5306_p12)
}
0x19a8   :  { %s5310_s3 = scalar_lea.hbm %s5589_s27, 64 }
0x19a9   :  { %p5311_p13 = scmp.ne.s32.totalorder %s5589_s27, %s5310_s3  ;;  %p5314_p0 = scmp.lt.u32.totalorder %s5310_s3, %s5589_s27 }
0x19ab   :  { %p5316_p1 = pnand %p5314_p0, %p5311_p13 }
0x19ad   :  { %5319 = shalt.err (!%p5316_p1)
}
0x19ae   :  { %4247 = dma.vmem_to_hbm [thread:$0]  %s4245_s21, 64, %s5589_s27, [#allocation4]   ;;  %v4217_v3 = vpop.permute.xlu1 %4216  ;;  %vm4236_vm0 = vcmask 27648  }
0x19af   :  { %s5402_s4 = smov [#allocation7]  }
0x19b0   :  { %s4264_s8 = sshll.u32 %s5402_s4, 4  ;;  %s4265_s8 = int_to_ptr.vmem [resolvable:$true] %s4264_s8 }
0x19b1   :  { %s5320_s14 = scalar_lea.vmem %s4265_s8, 64  ;;  %p5325_p3 = scmp.lt.s32.totalorder %s4265_s8, %s4265_s8 }
0x19b2   :  { %v4227_v43 = vpop.permute.xlu1 %4226  ;;  %p5321_p2 = scmp.ne.s32.totalorder %s4265_s8, %s5320_s14  ;;  %p5326_p4 = scmp.lt.s32.totalorder %s5320_s14, %s5320_s14 }
0x19b4   :  { %p5327_p5 = por %p5326_p4, %p5325_p3 }
0x19b6   :  { %p5328_p6 = pnand %p5327_p5, %p5321_p2 }
0x1a17   :  { %v4198_v52 = vpop.trf.xlu0 }
0x1a18   :  { %v4219_v30 = vadd.f32 %v4217_v3, %v4198_v52 }
0x1a1a   :  { %v4229_v37 = vadd.f32 %v4227_v43, %v4219_v30 }
0x1a1c   :  { %v4395_v41 = vmul.f32 -1.442695, %v4229_v37 }
0x1a1e   :  { %5272 = vpow2.f32 %v4395_v41 }
0x1a28   :  { %v5273_v54 = vpop.eup %5272 }
0x1a29   :  { %v4233_v58 = vadd.f32 1.0, %v5273_v54 }
0x1a2b   :  { %5274 = vrcp.f32 %v4233_v58 }
0x1a35   :  { %v5275_v57 = vpop.eup %5274 }
0x1a36   :  { %4237 = vst.msk [vmem:[#allocation7] sm:$0xf] %vm4236_vm0, %v5275_v57 }
0x1a37   :  { %5331 = shalt.err (!%p5328_p6)
}
0x1a38   :  { %s5332_s27 = scalar_lea.hbm %s5599_s9, 64 }
0x1a39   :  { %p5333_p7 = scmp.ne.s32.totalorder %s5599_s9, %s5332_s27  ;;  %p5336_p8 = scmp.lt.u32.totalorder %s5332_s27, %s5599_s9 }
0x1a3b   :  { %p5338_p9 = pnand %p5336_p8, %p5333_p7 }
0x1a3d   :  { %5341 = shalt.err (!%p5338_p9)
}
0x1a3e   :  { %4267 = dma.vmem_to_hbm [thread:$0]  %s4265_s8, 64, %s5599_s9, [#allocation6]  }
0x1a3f   :  { %5342 = dma.done.wait [#allocation4], 64  }
0x1a40   :  { %5343 = vsyncadd [#allocation4], 4294967232 }
0x1a41   :  { %5344 = dma.done.wait [#allocation6], 128  }
0x1a42   :  { %5345 = vsyncadd [#allocation6], 4294967168 }
0x1a43   :  { %4277 = vsyncpa [#allocation4], 1 }
0x1a44   :  { %4278 = vsyncpa [#allocation6], 1 }

</bundles_post_ra>
